<compile_context>
chip_gen: v7x
topology: tpu7x:2x2x1
jax: 0.10.0
libtpu: 0.0.40
codegen_flags: <defaults>
</compile_context>

<pallas_src>
import math

import numpy as np
import jax
import jax.numpy as jnp
from jax.experimental import pallas as pl
from jax.experimental.pallas import tpu as pltpu

_LANE = 128      # vreg lane width
_SUBLANE = 8     # vreg sublane height (f32)
_K = 4           # every conv in DCDiscriminator is 4x4
_LRELU_SLOPE = 0.2


def _ceil_to(x, m):
    return ((x + m - 1) // m) * m


def _layer_cfgs(h, w, c, conv_cfg):
    """Static per-layer geometry shared by wrapper and kernel."""
    cfgs = []
    cur_h, cur_w, cur_c = h, w, c
    for (wl, stride, pad) in conv_cfg:
        oc, ic, kh, kw = wl.shape
        assert ic == cur_c and kh == _K and kw == _K
        oh = (cur_h + 2 * pad - _K) // stride + 1
        ow = (cur_w + 2 * pad - _K) // stride + 1
        cfgs.append(dict(
            H=cur_h, W=cur_w,
            Hp=cur_h + 2 * pad, Wp=cur_w + 2 * pad,
            OH=oh, OW=ow, stride=stride, pad=pad,
            cin=ic, cout=oc,
            cin_p=_ceil_to(ic, _LANE), cout_p=_ceil_to(oc, _LANE),
            rout=oh * ow, rout_p=_ceil_to(oh * ow, _SUBLANE)))
        cur_h, cur_w, cur_c = oh, ow, oc
    for a, b in zip(cfgs[:-1], cfgs[1:]):
        assert a["cout_p"] == b["cin_p"]          # channel padding chains
    return cfgs


# ---------------------------------------------------------------------------
# Fused kernel: one grid step == one image through the whole network.
#   refs = (x_ref, w_0 .. w_{L}, o_ref,
#           in_0 .. in_L, patch_0 .. patch_L, act_0 .. act_{L-1})
#   x_ref   : (1, Hp0*Wp0, Cin0_p)     f32  spatially pre-padded, flattened image
#   w_l     : (K*K*Cin_p, Cout_p)      bf16 tap-major flattened conv weight
#   o_ref   : (1, Rlast_p, Clast_p)    f32  conv_out result (logit at [0,0,0])
#   in_l    : (Hp_l*Wp_l, Cin_p)       f32  zero-padded layer input (scratch)
#   patch_l : (Rout_p, K*K*Cin_p)      f32  im2col panel (scratch)
#   act_l   : (Rout_p, Cout_p)         f32  post-LeakyReLU activation (scratch)
# ---------------------------------------------------------------------------
def _make_kernel(cfgs):
    n = len(cfgs)

    def kernel(*refs):
        x_ref = refs[0]
        w_refs = refs[1:1 + n]
        o_ref = refs[1 + n]
        scratch = refs[2 + n:]
        in_refs = scratch[:n]
        patch_refs = scratch[n:2 * n]
        act_refs = scratch[2 * n:]

        # Stage the (pre-padded, pre-flattened) image into layer 0's buffer.
        in_refs[0][...] = x_ref[0]

        for l, cfg in enumerate(cfgs):            # static unroll over layers
            OH, OW, Wp = cfg["OH"], cfg["OW"], cfg["Wp"]
            s, cin_p = cfg["stride"], cfg["cin_p"]
            src, patch = in_refs[l], patch_refs[l]

            if cfg["rout_p"] != cfg["rout"]:
                patch[...] = jnp.zeros_like(patch)   # zero sublane-pad rows

            # -- im2col gather: strided sublane loads from the padded input.
            #    Output row-block oh / tap (kh,kw) reads padded flat rows
            #    (s*oh+kh)*Wp + kw + s*ow for ow = 0..OW-1 (stride s).
            for oh in range(OH):
                r0 = oh * OW
                for kh in range(_K):
                    base = (s * oh + kh) * Wp
                    for kw in range(_K):
                        t = kh * _K + kw
                        if s > 1:
                            rows = src[pl.ds(base + kw, OW, stride=s), :]
                        else:
                            rows = src[pl.ds(base + kw, OW), :]
                        patch[r0:r0 + OW, t * cin_p:(t + 1) * cin_p] = rows

            # -- one dense MXU matmul per layer (bf16 x bf16 -> f32 accum).
            acc = jnp.dot(patch[...].astype(jnp.bfloat16), w_refs[l][...],
                          preferred_element_type=jnp.float32)

            if l == n - 1:
                o_ref[0] = acc                       # conv_out: no activation
            else:
                # Fused LeakyReLU(0.2) on the f32 accumulator.
                acc = jnp.where(acc >= 0.0, acc, _LRELU_SLOPE * acc)
                act_refs[l][...] = acc
                # Scatter row-major activation rows into the next layer's
                # zero-padded input buffer.
                nxt = cfgs[l + 1]
                p2, Wp2 = nxt["pad"], nxt["Wp"]
                dst = in_refs[l + 1]
                dst[...] = jnp.zeros_like(dst)
                for oh in range(OH):
                    d0 = (oh + p2) * Wp2 + p2
                    dst[d0:d0 + OW, :] = act_refs[l][oh * OW:oh * OW + OW, :]

    return kernel


# ---------------------------------------------------------------------------
# DCDiscriminator: parameter init + forward
# ---------------------------------------------------------------------------
def init_params(key, in_dim, num_feat, img_size):
    num_layers = int(math.log2(img_size) - 2)
    chans = [in_dim] + [num_feat // (2 ** (num_layers - 1 - i)) for i in range(num_layers)]
    keys = jax.random.split(key, num_layers + 1)
    layers = [0.05 * jax.random.normal(keys[i], (chans[i + 1], chans[i], _K, _K), jnp.float32)
              for i in range(num_layers)]
    conv_out = 0.05 * jax.random.normal(keys[-1], (1, num_feat, _K, _K), jnp.float32)
    return {"layers": layers, "conv_out": conv_out}


def dc_discriminator_forward(x_nchw, params, in_dim):
    b = x_nchw.shape[0]
    if x_nchw.shape[1] != in_dim:
        x_nchw = x_nchw[:, :in_dim]
    x = jnp.transpose(x_nchw, (0, 2, 3, 1))          # NCHW -> NHWC
    _, h, w, c = x.shape

    conv_cfg = [(wl, 2, 1) for wl in params["layers"]] + [(params["conv_out"], 1, 0)]
    cfgs = _layer_cfgs(h, w, c, conv_cfg)

    # Flattened per-layer weights: (K*K*Cin_p, Cout_p) bf16, tap-major so that
    # column block t = kh*K + kw of the patch panel hits the matching rows.
    weights = []
    flops = 0
    for cfg, (wl, _, _) in zip(cfgs, conv_cfg):
        wt = jnp.transpose(wl, (2, 3, 1, 0)).reshape(_K * _K, cfg["cin"], cfg["cout"])
        wt = jnp.pad(wt, ((0, 0), (0, cfg["cin_p"] - cfg["cin"]),
                          (0, cfg["cout_p"] - cfg["cout"])))
        weights.append(wt.reshape(_K * _K * cfg["cin_p"], cfg["cout_p"]).astype(jnp.bfloat16))
        flops += 2 * b * cfg["rout_p"] * (_K * _K * cfg["cin_p"]) * cfg["cout_p"]

    # Spatial zero-padding + channel padding to 128 + flatten spatial -> rows.
    # This is layout plumbing only (NOT an im2col materialized in HBM).
    c0 = cfgs[0]
    xp = jnp.pad(x, ((0, 0), (c0["pad"], c0["pad"]), (c0["pad"], c0["pad"]),
                     (0, c0["cin_p"] - c)))
    xp = xp.reshape(b, c0["Hp"] * c0["Wp"], c0["cin_p"]).astype(jnp.float32)

    scratch_shapes = (
        [pltpu.VMEM((cfg["Hp"] * cfg["Wp"], cfg["cin_p"]), jnp.float32) for cfg in cfgs] +
        [pltpu.VMEM((cfg["rout_p"], _K * _K * cfg["cin_p"]), jnp.float32) for cfg in cfgs] +
        [pltpu.VMEM((cfg["rout_p"], cfg["cout_p"]), jnp.float32) for cfg in cfgs[:-1]])

    last = cfgs[-1]
    out_shape = jax.ShapeDtypeStruct((b, last["rout_p"], last["cout_p"]), jnp.float32)

    in_specs = [pl.BlockSpec((1, c0["Hp"] * c0["Wp"], c0["cin_p"]), lambda i: (i, 0, 0))]
    in_specs += [pl.BlockSpec(wt.shape, lambda i: (0, 0)) for wt in weights]
    out_specs = pl.BlockSpec((1, last["rout_p"], last["cout_p"]), lambda i: (i, 0, 0))

    bytes_accessed = (int(xp.size) * 4 + sum(int(wt.size) * 2 for wt in weights)
                      + b * last["rout_p"] * last["cout_p"] * 4)

    out = pl.pallas_call(
        _make_kernel(cfgs),
        out_shape=out_shape,
        grid_spec=pltpu.PrefetchScalarGridSpec(
            num_scalar_prefetch=0,
            grid=(b,),                               # one image per grid step
            in_specs=in_specs,
            out_specs=out_specs,
            scratch_shapes=scratch_shapes),
        compiler_params=pltpu.CompilerParams(
            dimension_semantics=("parallel",),       # shard batch across TCs
            vmem_limit_bytes=32 * 1024 * 1024),
        cost_estimate=pl.CostEstimate(
            flops=flops, transcendentals=0, bytes_accessed=bytes_accessed),
    )(xp, *weights)

    # Real logit lives at [:, 0, 0]; everything else is lane/sublane padding.
    return out[:, 0, 0].reshape(b, 1)


# ---------------------------------------------------------------------------
# Pure-JAX reference mirroring the kernel's bf16-operand / f32-accum precision
# ---------------------------------------------------------------------------
def ref_forward(x, params, in_dim):
    if x.shape[1] != in_dim:
        x = x[:, :in_dim]

    def conv(hh, wgt, stride, pad):
        return jax.lax.conv_general_dilated(
            hh.astype(jnp.bfloat16), wgt.astype(jnp.bfloat16),
            (stride, stride), [(pad, pad), (pad, pad)],
            dimension_numbers=("NCHW", "OIHW", "NCHW"),
            preferred_element_type=jnp.float32)

    hh = x
    for wl in params["layers"]:
        hh = conv(hh, wl, 2, 1)
        hh = jnp.where(hh >= 0, hh, 0.2 * hh)
    out = conv(hh, params["conv_out"], 1, 0)
    return out.reshape(x.shape[0], 1)


if __name__ == "__main__":
    # Small, module-consistent config: img_size=16 -> num_layers=2, num_feat=32.
    in_dim, num_feat, img_size = 4, 32, 16
    key = jax.random.PRNGKey(0)
    kx, kp = jax.random.split(key)

    x = jax.random.normal(kx, (2, in_dim, img_size, img_size), jnp.float32)
    params = init_params(kp, in_dim, num_feat, img_size)

    out = jax.block_until_ready(dc_discriminator_forward(x, params, in_dim))
    assert out.shape == (2, 1), out.shape

    ref = jax.block_until_ready(ref_forward(x, params, in_dim))
    np.testing.assert_allclose(np.asarray(out), np.asarray(ref), rtol=1e-2, atol=1e-2)

    print("KERNEL_OK")
</pallas_src>

<mosaic_0001>
module attributes {stable_mosaic.version = 11 : i64} {
  func.func @kernel(%arg0: i32, %arg1: memref<1x324x128xf32, #tpu.memory_space<vmem>>, %arg2: memref<2048x128xbf16, #tpu.memory_space<vmem>>, %arg3: memref<2048x128xbf16, #tpu.memory_space<vmem>>, %arg4: memref<2048x128xbf16, #tpu.memory_space<vmem>>, %arg5: memref<1x8x128xf32, #tpu.memory_space<vmem>>, %arg6: memref<324x128xf32, #tpu.memory_space<vmem>>, %arg7: memref<100x128xf32, #tpu.memory_space<vmem>>, %arg8: memref<16x128xf32, #tpu.memory_space<vmem>>, %arg9: memref<64x2048xf32, #tpu.memory_space<vmem>>, %arg10: memref<16x2048xf32, #tpu.memory_space<vmem>>, %arg11: memref<8x2048xf32, #tpu.memory_space<vmem>>, %arg12: memref<64x128xf32, #tpu.memory_space<vmem>>, %arg13: memref<16x128xf32, #tpu.memory_space<vmem>>) attributes {dimension_semantics = [#tpu.dimension_semantics<parallel>], iteration_bounds = array<i64: 2>, scalar_prefetch = 0 : i64, scratch_operands = 8 : i64, tpu.core_type = #tpu.core_type<tc>, window_params = [{transform_indices = @transform_0, window_bounds = array<i64: 1, 324, 128>}, {pipeline_mode = #tpu.pipeline_mode<synchronous>, transform_indices = @transform_1, window_bounds = array<i64: 2048, 128>}, {pipeline_mode = #tpu.pipeline_mode<synchronous>, transform_indices = @transform_2, window_bounds = array<i64: 2048, 128>}, {pipeline_mode = #tpu.pipeline_mode<synchronous>, transform_indices = @transform_3, window_bounds = array<i64: 2048, 128>}, {transform_indices = @transform_4, window_bounds = array<i64: 1, 8, 128>}]} {
    %c0 = arith.constant 0 : index
    %c0_0 = arith.constant 0 : index
    %c0_1 = arith.constant 0 : index
    %0 = vector.load %arg1[%c0, %c0_0, %c0_1] : memref<1x324x128xf32, #tpu.memory_space<vmem>>, vector<1x324x128xf32>
    %1 = vector.shape_cast %0 : vector<1x324x128xf32> to vector<324x128xf32>
    %c0_2 = arith.constant 0 : index
    %c0_3 = arith.constant 0 : index
    %2 = vector.load %arg6[%c0_2, %c0_3] : memref<324x128xf32, #tpu.memory_space<vmem>>, vector<324x128xf32>
    tpu.vector_store %arg6[%c0_2, %c0_3], %1 {strides = array<i32>} : memref<324x128xf32, #tpu.memory_space<vmem>>, vector<324x128xf32>,
    %c0_4 = arith.constant 0 : index
    %c0_5 = arith.constant 0 : index
    %3 = tpu.strided_load %arg6[%c0_4, %c0_5] {strides = array<i32: 2, 1>} : memref<324x128xf32, #tpu.memory_space<vmem>>, vector<8x128xf32>
    %c0_6 = arith.constant 0 : index
    %c0_7 = arith.constant 0 : index
    %4 = vector.load %arg9[%c0_6, %c0_7] : memref<64x2048xf32, #tpu.memory_space<vmem>>, vector<8x128xf32>
    tpu.vector_store %arg9[%c0_6, %c0_7], %3 {strides = array<i32>} : memref<64x2048xf32, #tpu.memory_space<vmem>>, vector<8x128xf32>,
    %c1 = arith.constant 1 : index
    %c0_8 = arith.constant 0 : index
    %5 = tpu.strided_load %arg6[%c1, %c0_8] {strides = array<i32: 2, 1>} : memref<324x128xf32, #tpu.memory_space<vmem>>, vector<8x128xf32>
    %c0_9 = arith.constant 0 : index
    %c128 = arith.constant 128 : index
    %6 = vector.load %arg9[%c0_9, %c128] : memref<64x2048xf32, #tpu.memory_space<vmem>>, vector<8x128xf32>
    tpu.vector_store %arg9[%c0_9, %c128], %5 {strides = array<i32>} : memref<64x2048xf32, #tpu.memory_space<vmem>>, vector<8x128xf32>,
    %c2 = arith.constant 2 : index
    %c0_10 = arith.constant 0 : index
    %7 = tpu.strided_load %arg6[%c2, %c0_10] {strides = array<i32: 2, 1>} : memref<324x128xf32, #tpu.memory_space<vmem>>, vector<8x128xf32>
    %c0_11 = arith.constant 0 : index
    %c256 = arith.constant 256 : index
    %8 = vector.load %arg9[%c0_11, %c256] : memref<64x2048xf32, #tpu.memory_space<vmem>>, vector<8x128xf32>
    tpu.vector_store %arg9[%c0_11, %c256], %7 {strides = array<i32>} : memref<64x2048xf32, #tpu.memory_space<vmem>>, vector<8x128xf32>,
    %c3 = arith.constant 3 : index
    %c0_12 = arith.constant 0 : index
    %9 = tpu.strided_load %arg6[%c3, %c0_12] {strides = array<i32: 2, 1>} : memref<324x128xf32, #tpu.memory_space<vmem>>, vector<8x128xf32>
    %c0_13 = arith.constant 0 : index
    %c384 = arith.constant 384 : index
    %10 = vector.load %arg9[%c0_13, %c384] : memref<64x2048xf32, #tpu.memory_space<vmem>>, vector<8x128xf32>
    tpu.vector_store %arg9[%c0_13, %c384], %9 {strides = array<i32>} : memref<64x2048xf32, #tpu.memory_space<vmem>>, vector<8x128xf32>,
    %c18 = arith.constant 18 : index
    %c0_14 = arith.constant 0 : index
    %11 = tpu.strided_load %arg6[%c18, %c0_14] {strides = array<i32: 2, 1>} : memref<324x128xf32, #tpu.memory_space<vmem>>, vector<8x128xf32>
    %c0_15 = arith.constant 0 : index
    %c512 = arith.constant 512 : index
    %12 = vector.load %arg9[%c0_15, %c512] : memref<64x2048xf32, #tpu.memory_space<vmem>>, vector<8x128xf32>
    tpu.vector_store %arg9[%c0_15, %c512], %11 {strides = array<i32>} : memref<64x2048xf32, #tpu.memory_space<vmem>>, vector<8x128xf32>,
    %c19 = arith.constant 19 : index
    %c0_16 = arith.constant 0 : index
    %13 = tpu.strided_load %arg6[%c19, %c0_16] {strides = array<i32: 2, 1>} : memref<324x128xf32, #tpu.memory_space<vmem>>, vector<8x128xf32>
    %c0_17 = arith.constant 0 : index
    %c640 = arith.constant 640 : index
    %14 = vector.load %arg9[%c0_17, %c640] : memref<64x2048xf32, #tpu.memory_space<vmem>>, vector<8x128xf32>
    tpu.vector_store %arg9[%c0_17, %c640], %13 {strides = array<i32>} : memref<64x2048xf32, #tpu.memory_space<vmem>>, vector<8x128xf32>,
    %c20 = arith.constant 20 : index
    %c0_18 = arith.constant 0 : index
    %15 = tpu.strided_load %arg6[%c20, %c0_18] {strides = array<i32: 2, 1>} : memref<324x128xf32, #tpu.memory_space<vmem>>, vector<8x128xf32>
    %c0_19 = arith.constant 0 : index
    %c768 = arith.constant 768 : index
    %16 = vector.load %arg9[%c0_19, %c768] : memref<64x2048xf32, #tpu.memory_space<vmem>>, vector<8x128xf32>
    tpu.vector_store %arg9[%c0_19, %c768], %15 {strides = array<i32>} : memref<64x2048xf32, #tpu.memory_space<vmem>>, vector<8x128xf32>,
    %c21 = arith.constant 21 : index
    %c0_20 = arith.constant 0 : index
    %17 = tpu.strided_load %arg6[%c21, %c0_20] {strides = array<i32: 2, 1>} : memref<324x128xf32, #tpu.memory_space<vmem>>, vector<8x128xf32>
    %c0_21 = arith.constant 0 : index
    %c896 = arith.constant 896 : index
    %18 = vector.load %arg9[%c0_21, %c896] : memref<64x2048xf32, #tpu.memory_space<vmem>>, vector<8x128xf32>
    tpu.vector_store %arg9[%c0_21, %c896], %17 {strides = array<i32>} : memref<64x2048xf32, #tpu.memory_space<vmem>>, vector<8x128xf32>,
    %c36 = arith.constant 36 : index
    %c0_22 = arith.constant 0 : index
    %19 = tpu.strided_load %arg6[%c36, %c0_22] {strides = array<i32: 2, 1>} : memref<324x128xf32, #tpu.memory_space<vmem>>, vector<8x128xf32>
    %c0_23 = arith.constant 0 : index
    %c1024 = arith.constant 1024 : index
    %20 = vector.load %arg9[%c0_23, %c1024] : memref<64x2048xf32, #tpu.memory_space<vmem>>, vector<8x128xf32>
    tpu.vector_store %arg9[%c0_23, %c1024], %19 {strides = array<i32>} : memref<64x2048xf32, #tpu.memory_space<vmem>>, vector<8x128xf32>,
    %c37 = arith.constant 37 : index
    %c0_24 = arith.constant 0 : index
    %21 = tpu.strided_load %arg6[%c37, %c0_24] {strides = array<i32: 2, 1>} : memref<324x128xf32, #tpu.memory_space<vmem>>, vector<8x128xf32>
    %c0_25 = arith.constant 0 : index
    %c1152 = arith.constant 1152 : index
    %22 = vector.load %arg9[%c0_25, %c1152] : memref<64x2048xf32, #tpu.memory_space<vmem>>, vector<8x128xf32>
    tpu.vector_store %arg9[%c0_25, %c1152], %21 {strides = array<i32>} : memref<64x2048xf32, #tpu.memory_space<vmem>>, vector<8x128xf32>,
    %c38 = arith.constant 38 : index
    %c0_26 = arith.constant 0 : index
    %23 = tpu.strided_load %arg6[%c38, %c0_26] {strides = array<i32: 2, 1>} : memref<324x128xf32, #tpu.memory_space<vmem>>, vector<8x128xf32>
    %c0_27 = arith.constant 0 : index
    %c1280 = arith.constant 1280 : index
    %24 = vector.load %arg9[%c0_27, %c1280] : memref<64x2048xf32, #tpu.memory_space<vmem>>, vector<8x128xf32>
    tpu.vector_store %arg9[%c0_27, %c1280], %23 {strides = array<i32>} : memref<64x2048xf32, #tpu.memory_space<vmem>>, vector<8x128xf32>,
    %c39 = arith.constant 39 : index
    %c0_28 = arith.constant 0 : index
    %25 = tpu.strided_load %arg6[%c39, %c0_28] {strides = array<i32: 2, 1>} : memref<324x128xf32, #tpu.memory_space<vmem>>, vector<8x128xf32>
    %c0_29 = arith.constant 0 : index
    %c1408 = arith.constant 1408 : index
    %26 = vector.load %arg9[%c0_29, %c1408] : memref<64x2048xf32, #tpu.memory_space<vmem>>, vector<8x128xf32>
    tpu.vector_store %arg9[%c0_29, %c1408], %25 {strides = array<i32>} : memref<64x2048xf32, #tpu.memory_space<vmem>>, vector<8x128xf32>,
    %c54 = arith.constant 54 : index
    %c0_30 = arith.constant 0 : index
    %27 = tpu.strided_load %arg6[%c54, %c0_30] {strides = array<i32: 2, 1>} : memref<324x128xf32, #tpu.memory_space<vmem>>, vector<8x128xf32>
    %c0_31 = arith.constant 0 : index
    %c1536 = arith.constant 1536 : index
    %28 = vector.load %arg9[%c0_31, %c1536] : memref<64x2048xf32, #tpu.memory_space<vmem>>, vector<8x128xf32>
    tpu.vector_store %arg9[%c0_31, %c1536], %27 {strides = array<i32>} : memref<64x2048xf32, #tpu.memory_space<vmem>>, vector<8x128xf32>,
    %c55 = arith.constant 55 : index
    %c0_32 = arith.constant 0 : index
    %29 = tpu.strided_load %arg6[%c55, %c0_32] {strides = array<i32: 2, 1>} : memref<324x128xf32, #tpu.memory_space<vmem>>, vector<8x128xf32>
    %c0_33 = arith.constant 0 : index
    %c1664 = arith.constant 1664 : index
    %30 = vector.load %arg9[%c0_33, %c1664] : memref<64x2048xf32, #tpu.memory_space<vmem>>, vector<8x128xf32>
    tpu.vector_store %arg9[%c0_33, %c1664], %29 {strides = array<i32>} : memref<64x2048xf32, #tpu.memory_space<vmem>>, vector<8x128xf32>,
    %c56 = arith.constant 56 : index
    %c0_34 = arith.constant 0 : index
    %31 = tpu.strided_load %arg6[%c56, %c0_34] {strides = array<i32: 2, 1>} : memref<324x128xf32, #tpu.memory_space<vmem>>, vector<8x128xf32>
    %c0_35 = arith.constant 0 : index
    %c1792 = arith.constant 1792 : index
    %32 = vector.load %arg9[%c0_35, %c1792] : memref<64x2048xf32, #tpu.memory_space<vmem>>, vector<8x128xf32>
    tpu.vector_store %arg9[%c0_35, %c1792], %31 {strides = array<i32>} : memref<64x2048xf32, #tpu.memory_space<vmem>>, vector<8x128xf32>,
    %c57 = arith.constant 57 : index
    %c0_36 = arith.constant 0 : index
    %33 = tpu.strided_load %arg6[%c57, %c0_36] {strides = array<i32: 2, 1>} : memref<324x128xf32, #tpu.memory_space<vmem>>, vector<8x128xf32>
    %c0_37 = arith.constant 0 : index
    %c1920 = arith.constant 1920 : index
    %34 = vector.load %arg9[%c0_37, %c1920] : memref<64x2048xf32, #tpu.memory_space<vmem>>, vector<8x128xf32>
    tpu.vector_store %arg9[%c0_37, %c1920], %33 {strides = array<i32>} : memref<64x2048xf32, #tpu.memory_space<vmem>>, vector<8x128xf32>,
    %c36_38 = arith.constant 36 : index
    %c0_39 = arith.constant 0 : index
    %35 = tpu.strided_load %arg6[%c36_38, %c0_39] {strides = array<i32: 2, 1>} : memref<324x128xf32, #tpu.memory_space<vmem>>, vector<8x128xf32>
    %c8 = arith.constant 8 : index
    %c0_40 = arith.constant 0 : index
    %36 = vector.load %arg9[%c8, %c0_40] : memref<64x2048xf32, #tpu.memory_space<vmem>>, vector<8x128xf32>
    tpu.vector_store %arg9[%c8, %c0_40], %35 {strides = array<i32>} : memref<64x2048xf32, #tpu.memory_space<vmem>>, vector<8x128xf32>,
    %c37_41 = arith.constant 37 : index
    %c0_42 = arith.constant 0 : index
    %37 = tpu.strided_load %arg6[%c37_41, %c0_42] {strides = array<i32: 2, 1>} : memref<324x128xf32, #tpu.memory_space<vmem>>, vector<8x128xf32>
    %c8_43 = arith.constant 8 : index
    %c128_44 = arith.constant 128 : index
    %38 = vector.load %arg9[%c8_43, %c128_44] : memref<64x2048xf32, #tpu.memory_space<vmem>>, vector<8x128xf32>
    tpu.vector_store %arg9[%c8_43, %c128_44], %37 {strides = array<i32>} : memref<64x2048xf32, #tpu.memory_space<vmem>>, vector<8x128xf32>,
    %c38_45 = arith.constant 38 : index
    %c0_46 = arith.constant 0 : index
    %39 = tpu.strided_load %arg6[%c38_45, %c0_46] {strides = array<i32: 2, 1>} : memref<324x128xf32, #tpu.memory_space<vmem>>, vector<8x128xf32>
    %c8_47 = arith.constant 8 : index
    %c256_48 = arith.constant 256 : index
    %40 = vector.load %arg9[%c8_47, %c256_48] : memref<64x2048xf32, #tpu.memory_space<vmem>>, vector<8x128xf32>
    tpu.vector_store %arg9[%c8_47, %c256_48], %39 {strides = array<i32>} : memref<64x2048xf32, #tpu.memory_space<vmem>>, vector<8x128xf32>,
    %c39_49 = arith.constant 39 : index
    %c0_50 = arith.constant 0 : index
    %41 = tpu.strided_load %arg6[%c39_49, %c0_50] {strides = array<i32: 2, 1>} : memref<324x128xf32, #tpu.memory_space<vmem>>, vector<8x128xf32>
    %c8_51 = arith.constant 8 : index
    %c384_52 = arith.constant 384 : index
    %42 = vector.load %arg9[%c8_51, %c384_52] : memref<64x2048xf32, #tpu.memory_space<vmem>>, vector<8x128xf32>
    tpu.vector_store %arg9[%c8_51, %c384_52], %41 {strides = array<i32>} : memref<64x2048xf32, #tpu.memory_space<vmem>>, vector<8x128xf32>,
    %c54_53 = arith.constant 54 : index
    %c0_54 = arith.constant 0 : index
    %43 = tpu.strided_load %arg6[%c54_53, %c0_54] {strides = array<i32: 2, 1>} : memref<324x128xf32, #tpu.memory_space<vmem>>, vector<8x128xf32>
    %c8_55 = arith.constant 8 : index
    %c512_56 = arith.constant 512 : index
    %44 = vector.load %arg9[%c8_55, %c512_56] : memref<64x2048xf32, #tpu.memory_space<vmem>>, vector<8x128xf32>
    tpu.vector_store %arg9[%c8_55, %c512_56], %43 {strides = array<i32>} : memref<64x2048xf32, #tpu.memory_space<vmem>>, vector<8x128xf32>,
    %c55_57 = arith.constant 55 : index
    %c0_58 = arith.constant 0 : index
    %45 = tpu.strided_load %arg6[%c55_57, %c0_58] {strides = array<i32: 2, 1>} : memref<324x128xf32, #tpu.memory_space<vmem>>, vector<8x128xf32>
    %c8_59 = arith.constant 8 : index
    %c640_60 = arith.constant 640 : index
    %46 = vector.load %arg9[%c8_59, %c640_60] : memref<64x2048xf32, #tpu.memory_space<vmem>>, vector<8x128xf32>
    tpu.vector_store %arg9[%c8_59, %c640_60], %45 {strides = array<i32>} : memref<64x2048xf32, #tpu.memory_space<vmem>>, vector<8x128xf32>,
    %c56_61 = arith.constant 56 : index
    %c0_62 = arith.constant 0 : index
    %47 = tpu.strided_load %arg6[%c56_61, %c0_62] {strides = array<i32: 2, 1>} : memref<324x128xf32, #tpu.memory_space<vmem>>, vector<8x128xf32>
    %c8_63 = arith.constant 8 : index
    %c768_64 = arith.constant 768 : index
    %48 = vector.load %arg9[%c8_63, %c768_64] : memref<64x2048xf32, #tpu.memory_space<vmem>>, vector<8x128xf32>
    tpu.vector_store %arg9[%c8_63, %c768_64], %47 {strides = array<i32>} : memref<64x2048xf32, #tpu.memory_space<vmem>>, vector<8x128xf32>,
    %c57_65 = arith.constant 57 : index
    %c0_66 = arith.constant 0 : index
    %49 = tpu.strided_load %arg6[%c57_65, %c0_66] {strides = array<i32: 2, 1>} : memref<324x128xf32, #tpu.memory_space<vmem>>, vector<8x128xf32>
    %c8_67 = arith.constant 8 : index
    %c896_68 = arith.constant 896 : index
    %50 = vector.load %arg9[%c8_67, %c896_68] : memref<64x2048xf32, #tpu.memory_space<vmem>>, vector<8x128xf32>
    tpu.vector_store %arg9[%c8_67, %c896_68], %49 {strides = array<i32>} : memref<64x2048xf32, #tpu.memory_space<vmem>>, vector<8x128xf32>,
    %c72 = arith.constant 72 : index
    %c0_69 = arith.constant 0 : index
    %51 = tpu.strided_load %arg6[%c72, %c0_69] {strides = array<i32: 2, 1>} : memref<324x128xf32, #tpu.memory_space<vmem>>, vector<8x128xf32>
    %c8_70 = arith.constant 8 : index
    %c1024_71 = arith.constant 1024 : index
    %52 = vector.load %arg9[%c8_70, %c1024_71] : memref<64x2048xf32, #tpu.memory_space<vmem>>, vector<8x128xf32>
    tpu.vector_store %arg9[%c8_70, %c1024_71], %51 {strides = array<i32>} : memref<64x2048xf32, #tpu.memory_space<vmem>>, vector<8x128xf32>,
    %c73 = arith.constant 73 : index
    %c0_72 = arith.constant 0 : index
    %53 = tpu.strided_load %arg6[%c73, %c0_72] {strides = array<i32: 2, 1>} : memref<324x128xf32, #tpu.memory_space<vmem>>, vector<8x128xf32>
    %c8_73 = arith.constant 8 : index
    %c1152_74 = arith.constant 1152 : index
    %54 = vector.load %arg9[%c8_73, %c1152_74] : memref<64x2048xf32, #tpu.memory_space<vmem>>, vector<8x128xf32>
    tpu.vector_store %arg9[%c8_73, %c1152_74], %53 {strides = array<i32>} : memref<64x2048xf32, #tpu.memory_space<vmem>>, vector<8x128xf32>,
    %c74 = arith.constant 74 : index
    %c0_75 = arith.constant 0 : index
    %55 = tpu.strided_load %arg6[%c74, %c0_75] {strides = array<i32: 2, 1>} : memref<324x128xf32, #tpu.memory_space<vmem>>, vector<8x128xf32>
    %c8_76 = arith.constant 8 : index
    %c1280_77 = arith.constant 1280 : index
    %56 = vector.load %arg9[%c8_76, %c1280_77] : memref<64x2048xf32, #tpu.memory_space<vmem>>, vector<8x128xf32>
    tpu.vector_store %arg9[%c8_76, %c1280_77], %55 {strides = array<i32>} : memref<64x2048xf32, #tpu.memory_space<vmem>>, vector<8x128xf32>,
    %c75 = arith.constant 75 : index
    %c0_78 = arith.constant 0 : index
    %57 = tpu.strided_load %arg6[%c75, %c0_78] {strides = array<i32: 2, 1>} : memref<324x128xf32, #tpu.memory_space<vmem>>, vector<8x128xf32>
    %c8_79 = arith.constant 8 : index
    %c1408_80 = arith.constant 1408 : index
    %58 = vector.load %arg9[%c8_79, %c1408_80] : memref<64x2048xf32, #tpu.memory_space<vmem>>, vector<8x128xf32>
    tpu.vector_store %arg9[%c8_79, %c1408_80], %57 {strides = array<i32>} : memref<64x2048xf32, #tpu.memory_space<vmem>>, vector<8x128xf32>,
    %c90 = arith.constant 90 : index
    %c0_81 = arith.constant 0 : index
    %59 = tpu.strided_load %arg6[%c90, %c0_81] {strides = array<i32: 2, 1>} : memref<324x128xf32, #tpu.memory_space<vmem>>, vector<8x128xf32>
    %c8_82 = arith.constant 8 : index
    %c1536_83 = arith.constant 1536 : index
    %60 = vector.load %arg9[%c8_82, %c1536_83] : memref<64x2048xf32, #tpu.memory_space<vmem>>, vector<8x128xf32>
    tpu.vector_store %arg9[%c8_82, %c1536_83], %59 {strides = array<i32>} : memref<64x2048xf32, #tpu.memory_space<vmem>>, vector<8x128xf32>,
    %c91 = arith.constant 91 : index
    %c0_84 = arith.constant 0 : index
    %61 = tpu.strided_load %arg6[%c91, %c0_84] {strides = array<i32: 2, 1>} : memref<324x128xf32, #tpu.memory_space<vmem>>, vector<8x128xf32>
    %c8_85 = arith.constant 8 : index
    %c1664_86 = arith.constant 1664 : index
    %62 = vector.load %arg9[%c8_85, %c1664_86] : memref<64x2048xf32, #tpu.memory_space<vmem>>, vector<8x128xf32>
    tpu.vector_store %arg9[%c8_85, %c1664_86], %61 {strides = array<i32>} : memref<64x2048xf32, #tpu.memory_space<vmem>>, vector<8x128xf32>,
    %c92 = arith.constant 92 : index
    %c0_87 = arith.constant 0 : index
    %63 = tpu.strided_load %arg6[%c92, %c0_87] {strides = array<i32: 2, 1>} : memref<324x128xf32, #tpu.memory_space<vmem>>, vector<8x128xf32>
    %c8_88 = arith.constant 8 : index
    %c1792_89 = arith.constant 1792 : index
    %64 = vector.load %arg9[%c8_88, %c1792_89] : memref<64x2048xf32, #tpu.memory_space<vmem>>, vector<8x128xf32>
    tpu.vector_store %arg9[%c8_88, %c1792_89], %63 {strides = array<i32>} : memref<64x2048xf32, #tpu.memory_space<vmem>>, vector<8x128xf32>,
    %c93 = arith.constant 93 : index
    %c0_90 = arith.constant 0 : index
    %65 = tpu.strided_load %arg6[%c93, %c0_90] {strides = array<i32: 2, 1>} : memref<324x128xf32, #tpu.memory_space<vmem>>, vector<8x128xf32>
    %c8_91 = arith.constant 8 : index
    %c1920_92 = arith.constant 1920 : index
    %66 = vector.load %arg9[%c8_91, %c1920_92] : memref<64x2048xf32, #tpu.memory_space<vmem>>, vector<8x128xf32>
    tpu.vector_store %arg9[%c8_91, %c1920_92], %65 {strides = array<i32>} : memref<64x2048xf32, #tpu.memory_space<vmem>>, vector<8x128xf32>,
    %c72_93 = arith.constant 72 : index
    %c0_94 = arith.constant 0 : index
    %67 = tpu.strided_load %arg6[%c72_93, %c0_94] {strides = array<i32: 2, 1>} : memref<324x128xf32, #tpu.memory_space<vmem>>, vector<8x128xf32>
    %c16 = arith.constant 16 : index
    %c0_95 = arith.constant 0 : index
    %68 = vector.load %arg9[%c16, %c0_95] : memref<64x2048xf32, #tpu.memory_space<vmem>>, vector<8x128xf32>
    tpu.vector_store %arg9[%c16, %c0_95], %67 {strides = array<i32>} : memref<64x2048xf32, #tpu.memory_space<vmem>>, vector<8x128xf32>,
    %c73_96 = arith.constant 73 : index
    %c0_97 = arith.constant 0 : index
    %69 = tpu.strided_load %arg6[%c73_96, %c0_97] {strides = array<i32: 2, 1>} : memref<324x128xf32, #tpu.memory_space<vmem>>, vector<8x128xf32>
    %c16_98 = arith.constant 16 : index
    %c128_99 = arith.constant 128 : index
    %70 = vector.load %arg9[%c16_98, %c128_99] : memref<64x2048xf32, #tpu.memory_space<vmem>>, vector<8x128xf32>
    tpu.vector_store %arg9[%c16_98, %c128_99], %69 {strides = array<i32>} : memref<64x2048xf32, #tpu.memory_space<vmem>>, vector<8x128xf32>,
    %c74_100 = arith.constant 74 : index
    %c0_101 = arith.constant 0 : index
    %71 = tpu.strided_load %arg6[%c74_100, %c0_101] {strides = array<i32: 2, 1>} : memref<324x128xf32, #tpu.memory_space<vmem>>, vector<8x128xf32>
    %c16_102 = arith.constant 16 : index
    %c256_103 = arith.constant 256 : index
    %72 = vector.load %arg9[%c16_102, %c256_103] : memref<64x2048xf32, #tpu.memory_space<vmem>>, vector<8x128xf32>
    tpu.vector_store %arg9[%c16_102, %c256_103], %71 {strides = array<i32>} : memref<64x2048xf32, #tpu.memory_space<vmem>>, vector<8x128xf32>,
    %c75_104 = arith.constant 75 : index
    %c0_105 = arith.constant 0 : index
    %73 = tpu.strided_load %arg6[%c75_104, %c0_105] {strides = array<i32: 2, 1>} : memref<324x128xf32, #tpu.memory_space<vmem>>, vector<8x128xf32>
    %c16_106 = arith.constant 16 : index
    %c384_107 = arith.constant 384 : index
    %74 = vector.load %arg9[%c16_106, %c384_107] : memref<64x2048xf32, #tpu.memory_space<vmem>>, vector<8x128xf32>
    tpu.vector_store %arg9[%c16_106, %c384_107], %73 {strides = array<i32>} : memref<64x2048xf32, #tpu.memory_space<vmem>>, vector<8x128xf32>,
    %c90_108 = arith.constant 90 : index
    %c0_109 = arith.constant 0 : index
    %75 = tpu.strided_load %arg6[%c90_108, %c0_109] {strides = array<i32: 2, 1>} : memref<324x128xf32, #tpu.memory_space<vmem>>, vector<8x128xf32>
    %c16_110 = arith.constant 16 : index
    %c512_111 = arith.constant 512 : index
    %76 = vector.load %arg9[%c16_110, %c512_111] : memref<64x2048xf32, #tpu.memory_space<vmem>>, vector<8x128xf32>
    tpu.vector_store %arg9[%c16_110, %c512_111], %75 {strides = array<i32>} : memref<64x2048xf32, #tpu.memory_space<vmem>>, vector<8x128xf32>,
    %c91_112 = arith.constant 91 : index
    %c0_113 = arith.constant 0 : index
    %77 = tpu.strided_load %arg6[%c91_112, %c0_113] {strides = array<i32: 2, 1>} : memref<324x128xf32, #tpu.memory_space<vmem>>, vector<8x128xf32>
    %c16_114 = arith.constant 16 : index
    %c640_115 = arith.constant 640 : index
    %78 = vector.load %arg9[%c16_114, %c640_115] : memref<64x2048xf32, #tpu.memory_space<vmem>>, vector<8x128xf32>
    tpu.vector_store %arg9[%c16_114, %c640_115], %77 {strides = array<i32>} : memref<64x2048xf32, #tpu.memory_space<vmem>>, vector<8x128xf32>,
    %c92_116 = arith.constant 92 : index
    %c0_117 = arith.constant 0 : index
    %79 = tpu.strided_load %arg6[%c92_116, %c0_117] {strides = array<i32: 2, 1>} : memref<324x128xf32, #tpu.memory_space<vmem>>, vector<8x128xf32>
    %c16_118 = arith.constant 16 : index
    %c768_119 = arith.constant 768 : index
    %80 = vector.load %arg9[%c16_118, %c768_119] : memref<64x2048xf32, #tpu.memory_space<vmem>>, vector<8x128xf32>
    tpu.vector_store %arg9[%c16_118, %c768_119], %79 {strides = array<i32>} : memref<64x2048xf32, #tpu.memory_space<vmem>>, vector<8x128xf32>,
    %c93_120 = arith.constant 93 : index
    %c0_121 = arith.constant 0 : index
    %81 = tpu.strided_load %arg6[%c93_120, %c0_121] {strides = array<i32: 2, 1>} : memref<324x128xf32, #tpu.memory_space<vmem>>, vector<8x128xf32>
    %c16_122 = arith.constant 16 : index
    %c896_123 = arith.constant 896 : index
    %82 = vector.load %arg9[%c16_122, %c896_123] : memref<64x2048xf32, #tpu.memory_space<vmem>>, vector<8x128xf32>
    tpu.vector_store %arg9[%c16_122, %c896_123], %81 {strides = array<i32>} : memref<64x2048xf32, #tpu.memory_space<vmem>>, vector<8x128xf32>,
    %c108 = arith.constant 108 : index
    %c0_124 = arith.constant 0 : index
    %83 = tpu.strided_load %arg6[%c108, %c0_124] {strides = array<i32: 2, 1>} : memref<324x128xf32, #tpu.memory_space<vmem>>, vector<8x128xf32>
    %c16_125 = arith.constant 16 : index
    %c1024_126 = arith.constant 1024 : index
    %84 = vector.load %arg9[%c16_125, %c1024_126] : memref<64x2048xf32, #tpu.memory_space<vmem>>, vector<8x128xf32>
    tpu.vector_store %arg9[%c16_125, %c1024_126], %83 {strides = array<i32>} : memref<64x2048xf32, #tpu.memory_space<vmem>>, vector<8x128xf32>,
    %c109 = arith.constant 109 : index
    %c0_127 = arith.constant 0 : index
    %85 = tpu.strided_load %arg6[%c109, %c0_127] {strides = array<i32: 2, 1>} : memref<324x128xf32, #tpu.memory_space<vmem>>, vector<8x128xf32>
    %c16_128 = arith.constant 16 : index
    %c1152_129 = arith.constant 1152 : index
    %86 = vector.load %arg9[%c16_128, %c1152_129] : memref<64x2048xf32, #tpu.memory_space<vmem>>, vector<8x128xf32>
    tpu.vector_store %arg9[%c16_128, %c1152_129], %85 {strides = array<i32>} : memref<64x2048xf32, #tpu.memory_space<vmem>>, vector<8x128xf32>,
    %c110 = arith.constant 110 : index
    %c0_130 = arith.constant 0 : index
    %87 = tpu.strided_load %arg6[%c110, %c0_130] {strides = array<i32: 2, 1>} : memref<324x128xf32, #tpu.memory_space<vmem>>, vector<8x128xf32>
    %c16_131 = arith.constant 16 : index
    %c1280_132 = arith.constant 1280 : index
    %88 = vector.load %arg9[%c16_131, %c1280_132] : memref<64x2048xf32, #tpu.memory_space<vmem>>, vector<8x128xf32>
    tpu.vector_store %arg9[%c16_131, %c1280_132], %87 {strides = array<i32>} : memref<64x2048xf32, #tpu.memory_space<vmem>>, vector<8x128xf32>,
    %c111 = arith.constant 111 : index
    %c0_133 = arith.constant 0 : index
    %89 = tpu.strided_load %arg6[%c111, %c0_133] {strides = array<i32: 2, 1>} : memref<324x128xf32, #tpu.memory_space<vmem>>, vector<8x128xf32>
    %c16_134 = arith.constant 16 : index
    %c1408_135 = arith.constant 1408 : index
    %90 = vector.load %arg9[%c16_134, %c1408_135] : memref<64x2048xf32, #tpu.memory_space<vmem>>, vector<8x128xf32>
    tpu.vector_store %arg9[%c16_134, %c1408_135], %89 {strides = array<i32>} : memref<64x2048xf32, #tpu.memory_space<vmem>>, vector<8x128xf32>,
    %c126 = arith.constant 126 : index
    %c0_136 = arith.constant 0 : index
    %91 = tpu.strided_load %arg6[%c126, %c0_136] {strides = array<i32: 2, 1>} : memref<324x128xf32, #tpu.memory_space<vmem>>, vector<8x128xf32>
    %c16_137 = arith.constant 16 : index
    %c1536_138 = arith.constant 1536 : index
    %92 = vector.load %arg9[%c16_137, %c1536_138] : memref<64x2048xf32, #tpu.memory_space<vmem>>, vector<8x128xf32>
    tpu.vector_store %arg9[%c16_137, %c1536_138], %91 {strides = array<i32>} : memref<64x2048xf32, #tpu.memory_space<vmem>>, vector<8x128xf32>,
    %c127 = arith.constant 127 : index
    %c0_139 = arith.constant 0 : index
    %93 = tpu.strided_load %arg6[%c127, %c0_139] {strides = array<i32: 2, 1>} : memref<324x128xf32, #tpu.memory_space<vmem>>, vector<8x128xf32>
    %c16_140 = arith.constant 16 : index
    %c1664_141 = arith.constant 1664 : index
    %94 = vector.load %arg9[%c16_140, %c1664_141] : memref<64x2048xf32, #tpu.memory_space<vmem>>, vector<8x128xf32>
    tpu.vector_store %arg9[%c16_140, %c1664_141], %93 {strides = array<i32>} : memref<64x2048xf32, #tpu.memory_space<vmem>>, vector<8x128xf32>,
    %c128_142 = arith.constant 128 : index
    %c0_143 = arith.constant 0 : index
    %95 = tpu.strided_load %arg6[%c128_142, %c0_143] {strides = array<i32: 2, 1>} : memref<324x128xf32, #tpu.memory_space<vmem>>, vector<8x128xf32>
    %c16_144 = arith.constant 16 : index
    %c1792_145 = arith.constant 1792 : index
    %96 = vector.load %arg9[%c16_144, %c1792_145] : memref<64x2048xf32, #tpu.memory_space<vmem>>, vector<8x128xf32>
    tpu.vector_store %arg9[%c16_144, %c1792_145], %95 {strides = array<i32>} : memref<64x2048xf32, #tpu.memory_space<vmem>>, vector<8x128xf32>,
    %c129 = arith.constant 129 : index
    %c0_146 = arith.constant 0 : index
    %97 = tpu.strided_load %arg6[%c129, %c0_146] {strides = array<i32: 2, 1>} : memref<324x128xf32, #tpu.memory_space<vmem>>, vector<8x128xf32>
    %c16_147 = arith.constant 16 : index
    %c1920_148 = arith.constant 1920 : index
    %98 = vector.load %arg9[%c16_147, %c1920_148] : memref<64x2048xf32, #tpu.memory_space<vmem>>, vector<8x128xf32>
    tpu.vector_store %arg9[%c16_147, %c1920_148], %97 {strides = array<i32>} : memref<64x2048xf32, #tpu.memory_space<vmem>>, vector<8x128xf32>,
    %c108_149 = arith.constant 108 : index
    %c0_150 = arith.constant 0 : index
    %99 = tpu.strided_load %arg6[%c108_149, %c0_150] {strides = array<i32: 2, 1>} : memref<324x128xf32, #tpu.memory_space<vmem>>, vector<8x128xf32>
    %c24 = arith.constant 24 : index
    %c0_151 = arith.constant 0 : index
    %100 = vector.load %arg9[%c24, %c0_151] : memref<64x2048xf32, #tpu.memory_space<vmem>>, vector<8x128xf32>
    tpu.vector_store %arg9[%c24, %c0_151], %99 {strides = array<i32>} : memref<64x2048xf32, #tpu.memory_space<vmem>>, vector<8x128xf32>,
    %c109_152 = arith.constant 109 : index
    %c0_153 = arith.constant 0 : index
    %101 = tpu.strided_load %arg6[%c109_152, %c0_153] {strides = array<i32: 2, 1>} : memref<324x128xf32, #tpu.memory_space<vmem>>, vector<8x128xf32>
    %c24_154 = arith.constant 24 : index
    %c128_155 = arith.constant 128 : index
    %102 = vector.load %arg9[%c24_154, %c128_155] : memref<64x2048xf32, #tpu.memory_space<vmem>>, vector<8x128xf32>
    tpu.vector_store %arg9[%c24_154, %c128_155], %101 {strides = array<i32>} : memref<64x2048xf32, #tpu.memory_space<vmem>>, vector<8x128xf32>,
    %c110_156 = arith.constant 110 : index
    %c0_157 = arith.constant 0 : index
    %103 = tpu.strided_load %arg6[%c110_156, %c0_157] {strides = array<i32: 2, 1>} : memref<324x128xf32, #tpu.memory_space<vmem>>, vector<8x128xf32>
    %c24_158 = arith.constant 24 : index
    %c256_159 = arith.constant 256 : index
    %104 = vector.load %arg9[%c24_158, %c256_159] : memref<64x2048xf32, #tpu.memory_space<vmem>>, vector<8x128xf32>
    tpu.vector_store %arg9[%c24_158, %c256_159], %103 {strides = array<i32>} : memref<64x2048xf32, #tpu.memory_space<vmem>>, vector<8x128xf32>,
    %c111_160 = arith.constant 111 : index
    %c0_161 = arith.constant 0 : index
    %105 = tpu.strided_load %arg6[%c111_160, %c0_161] {strides = array<i32: 2, 1>} : memref<324x128xf32, #tpu.memory_space<vmem>>, vector<8x128xf32>
    %c24_162 = arith.constant 24 : index
    %c384_163 = arith.constant 384 : index
    %106 = vector.load %arg9[%c24_162, %c384_163] : memref<64x2048xf32, #tpu.memory_space<vmem>>, vector<8x128xf32>
    tpu.vector_store %arg9[%c24_162, %c384_163], %105 {strides = array<i32>} : memref<64x2048xf32, #tpu.memory_space<vmem>>, vector<8x128xf32>,
    %c126_164 = arith.constant 126 : index
    %c0_165 = arith.constant 0 : index
    %107 = tpu.strided_load %arg6[%c126_164, %c0_165] {strides = array<i32: 2, 1>} : memref<324x128xf32, #tpu.memory_space<vmem>>, vector<8x128xf32>
    %c24_166 = arith.constant 24 : index
    %c512_167 = arith.constant 512 : index
    %108 = vector.load %arg9[%c24_166, %c512_167] : memref<64x2048xf32, #tpu.memory_space<vmem>>, vector<8x128xf32>
    tpu.vector_store %arg9[%c24_166, %c512_167], %107 {strides = array<i32>} : memref<64x2048xf32, #tpu.memory_space<vmem>>, vector<8x128xf32>,
    %c127_168 = arith.constant 127 : index
    %c0_169 = arith.constant 0 : index
    %109 = tpu.strided_load %arg6[%c127_168, %c0_169] {strides = array<i32: 2, 1>} : memref<324x128xf32, #tpu.memory_space<vmem>>, vector<8x128xf32>
    %c24_170 = arith.constant 24 : index
    %c640_171 = arith.constant 640 : index
    %110 = vector.load %arg9[%c24_170, %c640_171] : memref<64x2048xf32, #tpu.memory_space<vmem>>, vector<8x128xf32>
    tpu.vector_store %arg9[%c24_170, %c640_171], %109 {strides = array<i32>} : memref<64x2048xf32, #tpu.memory_space<vmem>>, vector<8x128xf32>,
    %c128_172 = arith.constant 128 : index
    %c0_173 = arith.constant 0 : index
    %111 = tpu.strided_load %arg6[%c128_172, %c0_173] {strides = array<i32: 2, 1>} : memref<324x128xf32, #tpu.memory_space<vmem>>, vector<8x128xf32>
    %c24_174 = arith.constant 24 : index
    %c768_175 = arith.constant 768 : index
    %112 = vector.load %arg9[%c24_174, %c768_175] : memref<64x2048xf32, #tpu.memory_space<vmem>>, vector<8x128xf32>
    tpu.vector_store %arg9[%c24_174, %c768_175], %111 {strides = array<i32>} : memref<64x2048xf32, #tpu.memory_space<vmem>>, vector<8x128xf32>,
    %c129_176 = arith.constant 129 : index
    %c0_177 = arith.constant 0 : index
    %113 = tpu.strided_load %arg6[%c129_176, %c0_177] {strides = array<i32: 2, 1>} : memref<324x128xf32, #tpu.memory_space<vmem>>, vector<8x128xf32>
    %c24_178 = arith.constant 24 : index
    %c896_179 = arith.constant 896 : index
    %114 = vector.load %arg9[%c24_178, %c896_179] : memref<64x2048xf32, #tpu.memory_space<vmem>>, vector<8x128xf32>
    tpu.vector_store %arg9[%c24_178, %c896_179], %113 {strides = array<i32>} : memref<64x2048xf32, #tpu.memory_space<vmem>>, vector<8x128xf32>,
    %c144 = arith.constant 144 : index
    %c0_180 = arith.constant 0 : index
    %115 = tpu.strided_load %arg6[%c144, %c0_180] {strides = array<i32: 2, 1>} : memref<324x128xf32, #tpu.memory_space<vmem>>, vector<8x128xf32>
    %c24_181 = arith.constant 24 : index
    %c1024_182 = arith.constant 1024 : index
    %116 = vector.load %arg9[%c24_181, %c1024_182] : memref<64x2048xf32, #tpu.memory_space<vmem>>, vector<8x128xf32>
    tpu.vector_store %arg9[%c24_181, %c1024_182], %115 {strides = array<i32>} : memref<64x2048xf32, #tpu.memory_space<vmem>>, vector<8x128xf32>,
    %c145 = arith.constant 145 : index
    %c0_183 = arith.constant 0 : index
    %117 = tpu.strided_load %arg6[%c145, %c0_183] {strides = array<i32: 2, 1>} : memref<324x128xf32, #tpu.memory_space<vmem>>, vector<8x128xf32>
    %c24_184 = arith.constant 24 : index
    %c1152_185 = arith.constant 1152 : index
    %118 = vector.load %arg9[%c24_184, %c1152_185] : memref<64x2048xf32, #tpu.memory_space<vmem>>, vector<8x128xf32>
    tpu.vector_store %arg9[%c24_184, %c1152_185], %117 {strides = array<i32>} : memref<64x2048xf32, #tpu.memory_space<vmem>>, vector<8x128xf32>,
    %c146 = arith.constant 146 : index
    %c0_186 = arith.constant 0 : index
    %119 = tpu.strided_load %arg6[%c146, %c0_186] {strides = array<i32: 2, 1>} : memref<324x128xf32, #tpu.memory_space<vmem>>, vector<8x128xf32>
    %c24_187 = arith.constant 24 : index
    %c1280_188 = arith.constant 1280 : index
    %120 = vector.load %arg9[%c24_187, %c1280_188] : memref<64x2048xf32, #tpu.memory_space<vmem>>, vector<8x128xf32>
    tpu.vector_store %arg9[%c24_187, %c1280_188], %119 {strides = array<i32>} : memref<64x2048xf32, #tpu.memory_space<vmem>>, vector<8x128xf32>,
    %c147 = arith.constant 147 : index
    %c0_189 = arith.constant 0 : index
    %121 = tpu.strided_load %arg6[%c147, %c0_189] {strides = array<i32: 2, 1>} : memref<324x128xf32, #tpu.memory_space<vmem>>, vector<8x128xf32>
    %c24_190 = arith.constant 24 : index
    %c1408_191 = arith.constant 1408 : index
    %122 = vector.load %arg9[%c24_190, %c1408_191] : memref<64x2048xf32, #tpu.memory_space<vmem>>, vector<8x128xf32>
    tpu.vector_store %arg9[%c24_190, %c1408_191], %121 {strides = array<i32>} : memref<64x2048xf32, #tpu.memory_space<vmem>>, vector<8x128xf32>,
    %c162 = arith.constant 162 : index
    %c0_192 = arith.constant 0 : index
    %123 = tpu.strided_load %arg6[%c162, %c0_192] {strides = array<i32: 2, 1>} : memref<324x128xf32, #tpu.memory_space<vmem>>, vector<8x128xf32>
    %c24_193 = arith.constant 24 : index
    %c1536_194 = arith.constant 1536 : index
    %124 = vector.load %arg9[%c24_193, %c1536_194] : memref<64x2048xf32, #tpu.memory_space<vmem>>, vector<8x128xf32>
    tpu.vector_store %arg9[%c24_193, %c1536_194], %123 {strides = array<i32>} : memref<64x2048xf32, #tpu.memory_space<vmem>>, vector<8x128xf32>,
    %c163 = arith.constant 163 : index
    %c0_195 = arith.constant 0 : index
    %125 = tpu.strided_load %arg6[%c163, %c0_195] {strides = array<i32: 2, 1>} : memref<324x128xf32, #tpu.memory_space<vmem>>, vector<8x128xf32>
    %c24_196 = arith.constant 24 : index
    %c1664_197 = arith.constant 1664 : index
    %126 = vector.load %arg9[%c24_196, %c1664_197] : memref<64x2048xf32, #tpu.memory_space<vmem>>, vector<8x128xf32>
    tpu.vector_store %arg9[%c24_196, %c1664_197], %125 {strides = array<i32>} : memref<64x2048xf32, #tpu.memory_space<vmem>>, vector<8x128xf32>,
    %c164 = arith.constant 164 : index
    %c0_198 = arith.constant 0 : index
    %127 = tpu.strided_load %arg6[%c164, %c0_198] {strides = array<i32: 2, 1>} : memref<324x128xf32, #tpu.memory_space<vmem>>, vector<8x128xf32>
    %c24_199 = arith.constant 24 : index
    %c1792_200 = arith.constant 1792 : index
    %128 = vector.load %arg9[%c24_199, %c1792_200] : memref<64x2048xf32, #tpu.memory_space<vmem>>, vector<8x128xf32>
    tpu.vector_store %arg9[%c24_199, %c1792_200], %127 {strides = array<i32>} : memref<64x2048xf32, #tpu.memory_space<vmem>>, vector<8x128xf32>,
    %c165 = arith.constant 165 : index
    %c0_201 = arith.constant 0 : index
    %129 = tpu.strided_load %arg6[%c165, %c0_201] {strides = array<i32: 2, 1>} : memref<324x128xf32, #tpu.memory_space<vmem>>, vector<8x128xf32>
    %c24_202 = arith.constant 24 : index
    %c1920_203 = arith.constant 1920 : index
    %130 = vector.load %arg9[%c24_202, %c1920_203] : memref<64x2048xf32, #tpu.memory_space<vmem>>, vector<8x128xf32>
    tpu.vector_store %arg9[%c24_202, %c1920_203], %129 {strides = array<i32>} : memref<64x2048xf32, #tpu.memory_space<vmem>>, vector<8x128xf32>,
    %c144_204 = arith.constant 144 : index
    %c0_205 = arith.constant 0 : index
    %131 = tpu.strided_load %arg6[%c144_204, %c0_205] {strides = array<i32: 2, 1>} : memref<324x128xf32, #tpu.memory_space<vmem>>, vector<8x128xf32>
    %c32 = arith.constant 32 : index
    %c0_206 = arith.constant 0 : index
    %132 = vector.load %arg9[%c32, %c0_206] : memref<64x2048xf32, #tpu.memory_space<vmem>>, vector<8x128xf32>
    tpu.vector_store %arg9[%c32, %c0_206], %131 {strides = array<i32>} : memref<64x2048xf32, #tpu.memory_space<vmem>>, vector<8x128xf32>,
    %c145_207 = arith.constant 145 : index
    %c0_208 = arith.constant 0 : index
    %133 = tpu.strided_load %arg6[%c145_207, %c0_208] {strides = array<i32: 2, 1>} : memref<324x128xf32, #tpu.memory_space<vmem>>, vector<8x128xf32>
    %c32_209 = arith.constant 32 : index
    %c128_210 = arith.constant 128 : index
    %134 = vector.load %arg9[%c32_209, %c128_210] : memref<64x2048xf32, #tpu.memory_space<vmem>>, vector<8x128xf32>
    tpu.vector_store %arg9[%c32_209, %c128_210], %133 {strides = array<i32>} : memref<64x2048xf32, #tpu.memory_space<vmem>>, vector<8x128xf32>,
    %c146_211 = arith.constant 146 : index
    %c0_212 = arith.constant 0 : index
    %135 = tpu.strided_load %arg6[%c146_211, %c0_212] {strides = array<i32: 2, 1>} : memref<324x128xf32, #tpu.memory_space<vmem>>, vector<8x128xf32>
    %c32_213 = arith.constant 32 : index
    %c256_214 = arith.constant 256 : index
    %136 = vector.load %arg9[%c32_213, %c256_214] : memref<64x2048xf32, #tpu.memory_space<vmem>>, vector<8x128xf32>
    tpu.vector_store %arg9[%c32_213, %c256_214], %135 {strides = array<i32>} : memref<64x2048xf32, #tpu.memory_space<vmem>>, vector<8x128xf32>,
    %c147_215 = arith.constant 147 : index
    %c0_216 = arith.constant 0 : index
    %137 = tpu.strided_load %arg6[%c147_215, %c0_216] {strides = array<i32: 2, 1>} : memref<324x128xf32, #tpu.memory_space<vmem>>, vector<8x128xf32>
    %c32_217 = arith.constant 32 : index
    %c384_218 = arith.constant 384 : index
    %138 = vector.load %arg9[%c32_217, %c384_218] : memref<64x2048xf32, #tpu.memory_space<vmem>>, vector<8x128xf32>
    tpu.vector_store %arg9[%c32_217, %c384_218], %137 {strides = array<i32>} : memref<64x2048xf32, #tpu.memory_space<vmem>>, vector<8x128xf32>,
    %c162_219 = arith.constant 162 : index
    %c0_220 = arith.constant 0 : index
    %139 = tpu.strided_load %arg6[%c162_219, %c0_220] {strides = array<i32: 2, 1>} : memref<324x128xf32, #tpu.memory_space<vmem>>, vector<8x128xf32>
    %c32_221 = arith.constant 32 : index
    %c512_222 = arith.constant 512 : index
    %140 = vector.load %arg9[%c32_221, %c512_222] : memref<64x2048xf32, #tpu.memory_space<vmem>>, vector<8x128xf32>
    tpu.vector_store %arg9[%c32_221, %c512_222], %139 {strides = array<i32>} : memref<64x2048xf32, #tpu.memory_space<vmem>>, vector<8x128xf32>,
    %c163_223 = arith.constant 163 : index
    %c0_224 = arith.constant 0 : index
    %141 = tpu.strided_load %arg6[%c163_223, %c0_224] {strides = array<i32: 2, 1>} : memref<324x128xf32, #tpu.memory_space<vmem>>, vector<8x128xf32>
    %c32_225 = arith.constant 32 : index
    %c640_226 = arith.constant 640 : index
    %142 = vector.load %arg9[%c32_225, %c640_226] : memref<64x2048xf32, #tpu.memory_space<vmem>>, vector<8x128xf32>
    tpu.vector_store %arg9[%c32_225, %c640_226], %141 {strides = array<i32>} : memref<64x2048xf32, #tpu.memory_space<vmem>>, vector<8x128xf32>,
    %c164_227 = arith.constant 164 : index
    %c0_228 = arith.constant 0 : index
    %143 = tpu.strided_load %arg6[%c164_227, %c0_228] {strides = array<i32: 2, 1>} : memref<324x128xf32, #tpu.memory_space<vmem>>, vector<8x128xf32>
    %c32_229 = arith.constant 32 : index
    %c768_230 = arith.constant 768 : index
    %144 = vector.load %arg9[%c32_229, %c768_230] : memref<64x2048xf32, #tpu.memory_space<vmem>>, vector<8x128xf32>
    tpu.vector_store %arg9[%c32_229, %c768_230], %143 {strides = array<i32>} : memref<64x2048xf32, #tpu.memory_space<vmem>>, vector<8x128xf32>,
    %c165_231 = arith.constant 165 : index
    %c0_232 = arith.constant 0 : index
    %145 = tpu.strided_load %arg6[%c165_231, %c0_232] {strides = array<i32: 2, 1>} : memref<324x128xf32, #tpu.memory_space<vmem>>, vector<8x128xf32>
    %c32_233 = arith.constant 32 : index
    %c896_234 = arith.constant 896 : index
    %146 = vector.load %arg9[%c32_233, %c896_234] : memref<64x2048xf32, #tpu.memory_space<vmem>>, vector<8x128xf32>
    tpu.vector_store %arg9[%c32_233, %c896_234], %145 {strides = array<i32>} : memref<64x2048xf32, #tpu.memory_space<vmem>>, vector<8x128xf32>,
    %c180 = arith.constant 180 : index
    %c0_235 = arith.constant 0 : index
    %147 = tpu.strided_load %arg6[%c180, %c0_235] {strides = array<i32: 2, 1>} : memref<324x128xf32, #tpu.memory_space<vmem>>, vector<8x128xf32>
    %c32_236 = arith.constant 32 : index
    %c1024_237 = arith.constant 1024 : index
    %148 = vector.load %arg9[%c32_236, %c1024_237] : memref<64x2048xf32, #tpu.memory_space<vmem>>, vector<8x128xf32>
    tpu.vector_store %arg9[%c32_236, %c1024_237], %147 {strides = array<i32>} : memref<64x2048xf32, #tpu.memory_space<vmem>>, vector<8x128xf32>,
    %c181 = arith.constant 181 : index
    %c0_238 = arith.constant 0 : index
    %149 = tpu.strided_load %arg6[%c181, %c0_238] {strides = array<i32: 2, 1>} : memref<324x128xf32, #tpu.memory_space<vmem>>, vector<8x128xf32>
    %c32_239 = arith.constant 32 : index
    %c1152_240 = arith.constant 1152 : index
    %150 = vector.load %arg9[%c32_239, %c1152_240] : memref<64x2048xf32, #tpu.memory_space<vmem>>, vector<8x128xf32>
    tpu.vector_store %arg9[%c32_239, %c1152_240], %149 {strides = array<i32>} : memref<64x2048xf32, #tpu.memory_space<vmem>>, vector<8x128xf32>,
    %c182 = arith.constant 182 : index
    %c0_241 = arith.constant 0 : index
    %151 = tpu.strided_load %arg6[%c182, %c0_241] {strides = array<i32: 2, 1>} : memref<324x128xf32, #tpu.memory_space<vmem>>, vector<8x128xf32>
    %c32_242 = arith.constant 32 : index
    %c1280_243 = arith.constant 1280 : index
    %152 = vector.load %arg9[%c32_242, %c1280_243] : memref<64x2048xf32, #tpu.memory_space<vmem>>, vector<8x128xf32>
    tpu.vector_store %arg9[%c32_242, %c1280_243], %151 {strides = array<i32>} : memref<64x2048xf32, #tpu.memory_space<vmem>>, vector<8x128xf32>,
    %c183 = arith.constant 183 : index
    %c0_244 = arith.constant 0 : index
    %153 = tpu.strided_load %arg6[%c183, %c0_244] {strides = array<i32: 2, 1>} : memref<324x128xf32, #tpu.memory_space<vmem>>, vector<8x128xf32>
    %c32_245 = arith.constant 32 : index
    %c1408_246 = arith.constant 1408 : index
    %154 = vector.load %arg9[%c32_245, %c1408_246] : memref<64x2048xf32, #tpu.memory_space<vmem>>, vector<8x128xf32>
    tpu.vector_store %arg9[%c32_245, %c1408_246], %153 {strides = array<i32>} : memref<64x2048xf32, #tpu.memory_space<vmem>>, vector<8x128xf32>,
    %c198 = arith.constant 198 : index
    %c0_247 = arith.constant 0 : index
    %155 = tpu.strided_load %arg6[%c198, %c0_247] {strides = array<i32: 2, 1>} : memref<324x128xf32, #tpu.memory_space<vmem>>, vector<8x128xf32>
    %c32_248 = arith.constant 32 : index
    %c1536_249 = arith.constant 1536 : index
    %156 = vector.load %arg9[%c32_248, %c1536_249] : memref<64x2048xf32, #tpu.memory_space<vmem>>, vector<8x128xf32>
    tpu.vector_store %arg9[%c32_248, %c1536_249], %155 {strides = array<i32>} : memref<64x2048xf32, #tpu.memory_space<vmem>>, vector<8x128xf32>,
    %c199 = arith.constant 199 : index
    %c0_250 = arith.constant 0 : index
    %157 = tpu.strided_load %arg6[%c199, %c0_250] {strides = array<i32: 2, 1>} : memref<324x128xf32, #tpu.memory_space<vmem>>, vector<8x128xf32>
    %c32_251 = arith.constant 32 : index
    %c1664_252 = arith.constant 1664 : index
    %158 = vector.load %arg9[%c32_251, %c1664_252] : memref<64x2048xf32, #tpu.memory_space<vmem>>, vector<8x128xf32>
    tpu.vector_store %arg9[%c32_251, %c1664_252], %157 {strides = array<i32>} : memref<64x2048xf32, #tpu.memory_space<vmem>>, vector<8x128xf32>,
    %c200 = arith.constant 200 : index
    %c0_253 = arith.constant 0 : index
    %159 = tpu.strided_load %arg6[%c200, %c0_253] {strides = array<i32: 2, 1>} : memref<324x128xf32, #tpu.memory_space<vmem>>, vector<8x128xf32>
    %c32_254 = arith.constant 32 : index
    %c1792_255 = arith.constant 1792 : index
    %160 = vector.load %arg9[%c32_254, %c1792_255] : memref<64x2048xf32, #tpu.memory_space<vmem>>, vector<8x128xf32>
    tpu.vector_store %arg9[%c32_254, %c1792_255], %159 {strides = array<i32>} : memref<64x2048xf32, #tpu.memory_space<vmem>>, vector<8x128xf32>,
    %c201 = arith.constant 201 : index
    %c0_256 = arith.constant 0 : index
    %161 = tpu.strided_load %arg6[%c201, %c0_256] {strides = array<i32: 2, 1>} : memref<324x128xf32, #tpu.memory_space<vmem>>, vector<8x128xf32>
    %c32_257 = arith.constant 32 : index
    %c1920_258 = arith.constant 1920 : index
    %162 = vector.load %arg9[%c32_257, %c1920_258] : memref<64x2048xf32, #tpu.memory_space<vmem>>, vector<8x128xf32>
    tpu.vector_store %arg9[%c32_257, %c1920_258], %161 {strides = array<i32>} : memref<64x2048xf32, #tpu.memory_space<vmem>>, vector<8x128xf32>,
    %c180_259 = arith.constant 180 : index
    %c0_260 = arith.constant 0 : index
    %163 = tpu.strided_load %arg6[%c180_259, %c0_260] {strides = array<i32: 2, 1>} : memref<324x128xf32, #tpu.memory_space<vmem>>, vector<8x128xf32>
    %c40 = arith.constant 40 : index
    %c0_261 = arith.constant 0 : index
    %164 = vector.load %arg9[%c40, %c0_261] : memref<64x2048xf32, #tpu.memory_space<vmem>>, vector<8x128xf32>
    tpu.vector_store %arg9[%c40, %c0_261], %163 {strides = array<i32>} : memref<64x2048xf32, #tpu.memory_space<vmem>>, vector<8x128xf32>,
    %c181_262 = arith.constant 181 : index
    %c0_263 = arith.constant 0 : index
    %165 = tpu.strided_load %arg6[%c181_262, %c0_263] {strides = array<i32: 2, 1>} : memref<324x128xf32, #tpu.memory_space<vmem>>, vector<8x128xf32>
    %c40_264 = arith.constant 40 : index
    %c128_265 = arith.constant 128 : index
    %166 = vector.load %arg9[%c40_264, %c128_265] : memref<64x2048xf32, #tpu.memory_space<vmem>>, vector<8x128xf32>
    tpu.vector_store %arg9[%c40_264, %c128_265], %165 {strides = array<i32>} : memref<64x2048xf32, #tpu.memory_space<vmem>>, vector<8x128xf32>,
    %c182_266 = arith.constant 182 : index
    %c0_267 = arith.constant 0 : index
    %167 = tpu.strided_load %arg6[%c182_266, %c0_267] {strides = array<i32: 2, 1>} : memref<324x128xf32, #tpu.memory_space<vmem>>, vector<8x128xf32>
    %c40_268 = arith.constant 40 : index
    %c256_269 = arith.constant 256 : index
    %168 = vector.load %arg9[%c40_268, %c256_269] : memref<64x2048xf32, #tpu.memory_space<vmem>>, vector<8x128xf32>
    tpu.vector_store %arg9[%c40_268, %c256_269], %167 {strides = array<i32>} : memref<64x2048xf32, #tpu.memory_space<vmem>>, vector<8x128xf32>,
    %c183_270 = arith.constant 183 : index
    %c0_271 = arith.constant 0 : index
    %169 = tpu.strided_load %arg6[%c183_270, %c0_271] {strides = array<i32: 2, 1>} : memref<324x128xf32, #tpu.memory_space<vmem>>, vector<8x128xf32>
    %c40_272 = arith.constant 40 : index
    %c384_273 = arith.constant 384 : index
    %170 = vector.load %arg9[%c40_272, %c384_273] : memref<64x2048xf32, #tpu.memory_space<vmem>>, vector<8x128xf32>
    tpu.vector_store %arg9[%c40_272, %c384_273], %169 {strides = array<i32>} : memref<64x2048xf32, #tpu.memory_space<vmem>>, vector<8x128xf32>,
    %c198_274 = arith.constant 198 : index
    %c0_275 = arith.constant 0 : index
    %171 = tpu.strided_load %arg6[%c198_274, %c0_275] {strides = array<i32: 2, 1>} : memref<324x128xf32, #tpu.memory_space<vmem>>, vector<8x128xf32>
    %c40_276 = arith.constant 40 : index
    %c512_277 = arith.constant 512 : index
    %172 = vector.load %arg9[%c40_276, %c512_277] : memref<64x2048xf32, #tpu.memory_space<vmem>>, vector<8x128xf32>
    tpu.vector_store %arg9[%c40_276, %c512_277], %171 {strides = array<i32>} : memref<64x2048xf32, #tpu.memory_space<vmem>>, vector<8x128xf32>,
    %c199_278 = arith.constant 199 : index
    %c0_279 = arith.constant 0 : index
    %173 = tpu.strided_load %arg6[%c199_278, %c0_279] {strides = array<i32: 2, 1>} : memref<324x128xf32, #tpu.memory_space<vmem>>, vector<8x128xf32>
    %c40_280 = arith.constant 40 : index
    %c640_281 = arith.constant 640 : index
    %174 = vector.load %arg9[%c40_280, %c640_281] : memref<64x2048xf32, #tpu.memory_space<vmem>>, vector<8x128xf32>
    tpu.vector_store %arg9[%c40_280, %c640_281], %173 {strides = array<i32>} : memref<64x2048xf32, #tpu.memory_space<vmem>>, vector<8x128xf32>,
    %c200_282 = arith.constant 200 : index
    %c0_283 = arith.constant 0 : index
    %175 = tpu.strided_load %arg6[%c200_282, %c0_283] {strides = array<i32: 2, 1>} : memref<324x128xf32, #tpu.memory_space<vmem>>, vector<8x128xf32>
    %c40_284 = arith.constant 40 : index
    %c768_285 = arith.constant 768 : index
    %176 = vector.load %arg9[%c40_284, %c768_285] : memref<64x2048xf32, #tpu.memory_space<vmem>>, vector<8x128xf32>
    tpu.vector_store %arg9[%c40_284, %c768_285], %175 {strides = array<i32>} : memref<64x2048xf32, #tpu.memory_space<vmem>>, vector<8x128xf32>,
    %c201_286 = arith.constant 201 : index
    %c0_287 = arith.constant 0 : index
    %177 = tpu.strided_load %arg6[%c201_286, %c0_287] {strides = array<i32: 2, 1>} : memref<324x128xf32, #tpu.memory_space<vmem>>, vector<8x128xf32>
    %c40_288 = arith.constant 40 : index
    %c896_289 = arith.constant 896 : index
    %178 = vector.load %arg9[%c40_288, %c896_289] : memref<64x2048xf32, #tpu.memory_space<vmem>>, vector<8x128xf32>
    tpu.vector_store %arg9[%c40_288, %c896_289], %177 {strides = array<i32>} : memref<64x2048xf32, #tpu.memory_space<vmem>>, vector<8x128xf32>,
    %c216 = arith.constant 216 : index
    %c0_290 = arith.constant 0 : index
    %179 = tpu.strided_load %arg6[%c216, %c0_290] {strides = array<i32: 2, 1>} : memref<324x128xf32, #tpu.memory_space<vmem>>, vector<8x128xf32>
    %c40_291 = arith.constant 40 : index
    %c1024_292 = arith.constant 1024 : index
    %180 = vector.load %arg9[%c40_291, %c1024_292] : memref<64x2048xf32, #tpu.memory_space<vmem>>, vector<8x128xf32>
    tpu.vector_store %arg9[%c40_291, %c1024_292], %179 {strides = array<i32>} : memref<64x2048xf32, #tpu.memory_space<vmem>>, vector<8x128xf32>,
    %c217 = arith.constant 217 : index
    %c0_293 = arith.constant 0 : index
    %181 = tpu.strided_load %arg6[%c217, %c0_293] {strides = array<i32: 2, 1>} : memref<324x128xf32, #tpu.memory_space<vmem>>, vector<8x128xf32>
    %c40_294 = arith.constant 40 : index
    %c1152_295 = arith.constant 1152 : index
    %182 = vector.load %arg9[%c40_294, %c1152_295] : memref<64x2048xf32, #tpu.memory_space<vmem>>, vector<8x128xf32>
    tpu.vector_store %arg9[%c40_294, %c1152_295], %181 {strides = array<i32>} : memref<64x2048xf32, #tpu.memory_space<vmem>>, vector<8x128xf32>,
    %c218 = arith.constant 218 : index
    %c0_296 = arith.constant 0 : index
    %183 = tpu.strided_load %arg6[%c218, %c0_296] {strides = array<i32: 2, 1>} : memref<324x128xf32, #tpu.memory_space<vmem>>, vector<8x128xf32>
    %c40_297 = arith.constant 40 : index
    %c1280_298 = arith.constant 1280 : index
    %184 = vector.load %arg9[%c40_297, %c1280_298] : memref<64x2048xf32, #tpu.memory_space<vmem>>, vector<8x128xf32>
    tpu.vector_store %arg9[%c40_297, %c1280_298], %183 {strides = array<i32>} : memref<64x2048xf32, #tpu.memory_space<vmem>>, vector<8x128xf32>,
    %c219 = arith.constant 219 : index
    %c0_299 = arith.constant 0 : index
    %185 = tpu.strided_load %arg6[%c219, %c0_299] {strides = array<i32: 2, 1>} : memref<324x128xf32, #tpu.memory_space<vmem>>, vector<8x128xf32>
    %c40_300 = arith.constant 40 : index
    %c1408_301 = arith.constant 1408 : index
    %186 = vector.load %arg9[%c40_300, %c1408_301] : memref<64x2048xf32, #tpu.memory_space<vmem>>, vector<8x128xf32>
    tpu.vector_store %arg9[%c40_300, %c1408_301], %185 {strides = array<i32>} : memref<64x2048xf32, #tpu.memory_space<vmem>>, vector<8x128xf32>,
    %c234 = arith.constant 234 : index
    %c0_302 = arith.constant 0 : index
    %187 = tpu.strided_load %arg6[%c234, %c0_302] {strides = array<i32: 2, 1>} : memref<324x128xf32, #tpu.memory_space<vmem>>, vector<8x128xf32>
    %c40_303 = arith.constant 40 : index
    %c1536_304 = arith.constant 1536 : index
    %188 = vector.load %arg9[%c40_303, %c1536_304] : memref<64x2048xf32, #tpu.memory_space<vmem>>, vector<8x128xf32>
    tpu.vector_store %arg9[%c40_303, %c1536_304], %187 {strides = array<i32>} : memref<64x2048xf32, #tpu.memory_space<vmem>>, vector<8x128xf32>,
    %c235 = arith.constant 235 : index
    %c0_305 = arith.constant 0 : index
    %189 = tpu.strided_load %arg6[%c235, %c0_305] {strides = array<i32: 2, 1>} : memref<324x128xf32, #tpu.memory_space<vmem>>, vector<8x128xf32>
    %c40_306 = arith.constant 40 : index
    %c1664_307 = arith.constant 1664 : index
    %190 = vector.load %arg9[%c40_306, %c1664_307] : memref<64x2048xf32, #tpu.memory_space<vmem>>, vector<8x128xf32>
    tpu.vector_store %arg9[%c40_306, %c1664_307], %189 {strides = array<i32>} : memref<64x2048xf32, #tpu.memory_space<vmem>>, vector<8x128xf32>,
    %c236 = arith.constant 236 : index
    %c0_308 = arith.constant 0 : index
    %191 = tpu.strided_load %arg6[%c236, %c0_308] {strides = array<i32: 2, 1>} : memref<324x128xf32, #tpu.memory_space<vmem>>, vector<8x128xf32>
    %c40_309 = arith.constant 40 : index
    %c1792_310 = arith.constant 1792 : index
    %192 = vector.load %arg9[%c40_309, %c1792_310] : memref<64x2048xf32, #tpu.memory_space<vmem>>, vector<8x128xf32>
    tpu.vector_store %arg9[%c40_309, %c1792_310], %191 {strides = array<i32>} : memref<64x2048xf32, #tpu.memory_space<vmem>>, vector<8x128xf32>,
    %c237 = arith.constant 237 : index
    %c0_311 = arith.constant 0 : index
    %193 = tpu.strided_load %arg6[%c237, %c0_311] {strides = array<i32: 2, 1>} : memref<324x128xf32, #tpu.memory_space<vmem>>, vector<8x128xf32>
    %c40_312 = arith.constant 40 : index
    %c1920_313 = arith.constant 1920 : index
    %194 = vector.load %arg9[%c40_312, %c1920_313] : memref<64x2048xf32, #tpu.memory_space<vmem>>, vector<8x128xf32>
    tpu.vector_store %arg9[%c40_312, %c1920_313], %193 {strides = array<i32>} : memref<64x2048xf32, #tpu.memory_space<vmem>>, vector<8x128xf32>,
    %c216_314 = arith.constant 216 : index
    %c0_315 = arith.constant 0 : index
    %195 = tpu.strided_load %arg6[%c216_314, %c0_315] {strides = array<i32: 2, 1>} : memref<324x128xf32, #tpu.memory_space<vmem>>, vector<8x128xf32>
    %c48 = arith.constant 48 : index
    %c0_316 = arith.constant 0 : index
    %196 = vector.load %arg9[%c48, %c0_316] : memref<64x2048xf32, #tpu.memory_space<vmem>>, vector<8x128xf32>
    tpu.vector_store %arg9[%c48, %c0_316], %195 {strides = array<i32>} : memref<64x2048xf32, #tpu.memory_space<vmem>>, vector<8x128xf32>,
    %c217_317 = arith.constant 217 : index
    %c0_318 = arith.constant 0 : index
    %197 = tpu.strided_load %arg6[%c217_317, %c0_318] {strides = array<i32: 2, 1>} : memref<324x128xf32, #tpu.memory_space<vmem>>, vector<8x128xf32>
    %c48_319 = arith.constant 48 : index
    %c128_320 = arith.constant 128 : index
    %198 = vector.load %arg9[%c48_319, %c128_320] : memref<64x2048xf32, #tpu.memory_space<vmem>>, vector<8x128xf32>
    tpu.vector_store %arg9[%c48_319, %c128_320], %197 {strides = array<i32>} : memref<64x2048xf32, #tpu.memory_space<vmem>>, vector<8x128xf32>,
    %c218_321 = arith.constant 218 : index
    %c0_322 = arith.constant 0 : index
    %199 = tpu.strided_load %arg6[%c218_321, %c0_322] {strides = array<i32: 2, 1>} : memref<324x128xf32, #tpu.memory_space<vmem>>, vector<8x128xf32>
    %c48_323 = arith.constant 48 : index
    %c256_324 = arith.constant 256 : index
    %200 = vector.load %arg9[%c48_323, %c256_324] : memref<64x2048xf32, #tpu.memory_space<vmem>>, vector<8x128xf32>
    tpu.vector_store %arg9[%c48_323, %c256_324], %199 {strides = array<i32>} : memref<64x2048xf32, #tpu.memory_space<vmem>>, vector<8x128xf32>,
    %c219_325 = arith.constant 219 : index
    %c0_326 = arith.constant 0 : index
    %201 = tpu.strided_load %arg6[%c219_325, %c0_326] {strides = array<i32: 2, 1>} : memref<324x128xf32, #tpu.memory_space<vmem>>, vector<8x128xf32>
    %c48_327 = arith.constant 48 : index
    %c384_328 = arith.constant 384 : index
    %202 = vector.load %arg9[%c48_327, %c384_328] : memref<64x2048xf32, #tpu.memory_space<vmem>>, vector<8x128xf32>
    tpu.vector_store %arg9[%c48_327, %c384_328], %201 {strides = array<i32>} : memref<64x2048xf32, #tpu.memory_space<vmem>>, vector<8x128xf32>,
    %c234_329 = arith.constant 234 : index
    %c0_330 = arith.constant 0 : index
    %203 = tpu.strided_load %arg6[%c234_329, %c0_330] {strides = array<i32: 2, 1>} : memref<324x128xf32, #tpu.memory_space<vmem>>, vector<8x128xf32>
    %c48_331 = arith.constant 48 : index
    %c512_332 = arith.constant 512 : index
    %204 = vector.load %arg9[%c48_331, %c512_332] : memref<64x2048xf32, #tpu.memory_space<vmem>>, vector<8x128xf32>
    tpu.vector_store %arg9[%c48_331, %c512_332], %203 {strides = array<i32>} : memref<64x2048xf32, #tpu.memory_space<vmem>>, vector<8x128xf32>,
    %c235_333 = arith.constant 235 : index
    %c0_334 = arith.constant 0 : index
    %205 = tpu.strided_load %arg6[%c235_333, %c0_334] {strides = array<i32: 2, 1>} : memref<324x128xf32, #tpu.memory_space<vmem>>, vector<8x128xf32>
    %c48_335 = arith.constant 48 : index
    %c640_336 = arith.constant 640 : index
    %206 = vector.load %arg9[%c48_335, %c640_336] : memref<64x2048xf32, #tpu.memory_space<vmem>>, vector<8x128xf32>
    tpu.vector_store %arg9[%c48_335, %c640_336], %205 {strides = array<i32>} : memref<64x2048xf32, #tpu.memory_space<vmem>>, vector<8x128xf32>,
    %c236_337 = arith.constant 236 : index
    %c0_338 = arith.constant 0 : index
    %207 = tpu.strided_load %arg6[%c236_337, %c0_338] {strides = array<i32: 2, 1>} : memref<324x128xf32, #tpu.memory_space<vmem>>, vector<8x128xf32>
    %c48_339 = arith.constant 48 : index
    %c768_340 = arith.constant 768 : index
    %208 = vector.load %arg9[%c48_339, %c768_340] : memref<64x2048xf32, #tpu.memory_space<vmem>>, vector<8x128xf32>
    tpu.vector_store %arg9[%c48_339, %c768_340], %207 {strides = array<i32>} : memref<64x2048xf32, #tpu.memory_space<vmem>>, vector<8x128xf32>,
    %c237_341 = arith.constant 237 : index
    %c0_342 = arith.constant 0 : index
    %209 = tpu.strided_load %arg6[%c237_341, %c0_342] {strides = array<i32: 2, 1>} : memref<324x128xf32, #tpu.memory_space<vmem>>, vector<8x128xf32>
    %c48_343 = arith.constant 48 : index
    %c896_344 = arith.constant 896 : index
    %210 = vector.load %arg9[%c48_343, %c896_344] : memref<64x2048xf32, #tpu.memory_space<vmem>>, vector<8x128xf32>
    tpu.vector_store %arg9[%c48_343, %c896_344], %209 {strides = array<i32>} : memref<64x2048xf32, #tpu.memory_space<vmem>>, vector<8x128xf32>,
    %c252 = arith.constant 252 : index
    %c0_345 = arith.constant 0 : index
    %211 = tpu.strided_load %arg6[%c252, %c0_345] {strides = array<i32: 2, 1>} : memref<324x128xf32, #tpu.memory_space<vmem>>, vector<8x128xf32>
    %c48_346 = arith.constant 48 : index
    %c1024_347 = arith.constant 1024 : index
    %212 = vector.load %arg9[%c48_346, %c1024_347] : memref<64x2048xf32, #tpu.memory_space<vmem>>, vector<8x128xf32>
    tpu.vector_store %arg9[%c48_346, %c1024_347], %211 {strides = array<i32>} : memref<64x2048xf32, #tpu.memory_space<vmem>>, vector<8x128xf32>,
    %c253 = arith.constant 253 : index
    %c0_348 = arith.constant 0 : index
    %213 = tpu.strided_load %arg6[%c253, %c0_348] {strides = array<i32: 2, 1>} : memref<324x128xf32, #tpu.memory_space<vmem>>, vector<8x128xf32>
    %c48_349 = arith.constant 48 : index
    %c1152_350 = arith.constant 1152 : index
    %214 = vector.load %arg9[%c48_349, %c1152_350] : memref<64x2048xf32, #tpu.memory_space<vmem>>, vector<8x128xf32>
    tpu.vector_store %arg9[%c48_349, %c1152_350], %213 {strides = array<i32>} : memref<64x2048xf32, #tpu.memory_space<vmem>>, vector<8x128xf32>,
    %c254 = arith.constant 254 : index
    %c0_351 = arith.constant 0 : index
    %215 = tpu.strided_load %arg6[%c254, %c0_351] {strides = array<i32: 2, 1>} : memref<324x128xf32, #tpu.memory_space<vmem>>, vector<8x128xf32>
    %c48_352 = arith.constant 48 : index
    %c1280_353 = arith.constant 1280 : index
    %216 = vector.load %arg9[%c48_352, %c1280_353] : memref<64x2048xf32, #tpu.memory_space<vmem>>, vector<8x128xf32>
    tpu.vector_store %arg9[%c48_352, %c1280_353], %215 {strides = array<i32>} : memref<64x2048xf32, #tpu.memory_space<vmem>>, vector<8x128xf32>,
    %c255 = arith.constant 255 : index
    %c0_354 = arith.constant 0 : index
    %217 = tpu.strided_load %arg6[%c255, %c0_354] {strides = array<i32: 2, 1>} : memref<324x128xf32, #tpu.memory_space<vmem>>, vector<8x128xf32>
    %c48_355 = arith.constant 48 : index
    %c1408_356 = arith.constant 1408 : index
    %218 = vector.load %arg9[%c48_355, %c1408_356] : memref<64x2048xf32, #tpu.memory_space<vmem>>, vector<8x128xf32>
    tpu.vector_store %arg9[%c48_355, %c1408_356], %217 {strides = array<i32>} : memref<64x2048xf32, #tpu.memory_space<vmem>>, vector<8x128xf32>,
    %c270 = arith.constant 270 : index
    %c0_357 = arith.constant 0 : index
    %219 = tpu.strided_load %arg6[%c270, %c0_357] {strides = array<i32: 2, 1>} : memref<324x128xf32, #tpu.memory_space<vmem>>, vector<8x128xf32>
    %c48_358 = arith.constant 48 : index
    %c1536_359 = arith.constant 1536 : index
    %220 = vector.load %arg9[%c48_358, %c1536_359] : memref<64x2048xf32, #tpu.memory_space<vmem>>, vector<8x128xf32>
    tpu.vector_store %arg9[%c48_358, %c1536_359], %219 {strides = array<i32>} : memref<64x2048xf32, #tpu.memory_space<vmem>>, vector<8x128xf32>,
    %c271 = arith.constant 271 : index
    %c0_360 = arith.constant 0 : index
    %221 = tpu.strided_load %arg6[%c271, %c0_360] {strides = array<i32: 2, 1>} : memref<324x128xf32, #tpu.memory_space<vmem>>, vector<8x128xf32>
    %c48_361 = arith.constant 48 : index
    %c1664_362 = arith.constant 1664 : index
    %222 = vector.load %arg9[%c48_361, %c1664_362] : memref<64x2048xf32, #tpu.memory_space<vmem>>, vector<8x128xf32>
    tpu.vector_store %arg9[%c48_361, %c1664_362], %221 {strides = array<i32>} : memref<64x2048xf32, #tpu.memory_space<vmem>>, vector<8x128xf32>,
    %c272 = arith.constant 272 : index
    %c0_363 = arith.constant 0 : index
    %223 = tpu.strided_load %arg6[%c272, %c0_363] {strides = array<i32: 2, 1>} : memref<324x128xf32, #tpu.memory_space<vmem>>, vector<8x128xf32>
    %c48_364 = arith.constant 48 : index
    %c1792_365 = arith.constant 1792 : index
    %224 = vector.load %arg9[%c48_364, %c1792_365] : memref<64x2048xf32, #tpu.memory_space<vmem>>, vector<8x128xf32>
    tpu.vector_store %arg9[%c48_364, %c1792_365], %223 {strides = array<i32>} : memref<64x2048xf32, #tpu.memory_space<vmem>>, vector<8x128xf32>,
    %c273 = arith.constant 273 : index
    %c0_366 = arith.constant 0 : index
    %225 = tpu.strided_load %arg6[%c273, %c0_366] {strides = array<i32: 2, 1>} : memref<324x128xf32, #tpu.memory_space<vmem>>, vector<8x128xf32>
    %c48_367 = arith.constant 48 : index
    %c1920_368 = arith.constant 1920 : index
    %226 = vector.load %arg9[%c48_367, %c1920_368] : memref<64x2048xf32, #tpu.memory_space<vmem>>, vector<8x128xf32>
    tpu.vector_store %arg9[%c48_367, %c1920_368], %225 {strides = array<i32>} : memref<64x2048xf32, #tpu.memory_space<vmem>>, vector<8x128xf32>,
    %c252_369 = arith.constant 252 : index
    %c0_370 = arith.constant 0 : index
    %227 = tpu.strided_load %arg6[%c252_369, %c0_370] {strides = array<i32: 2, 1>} : memref<324x128xf32, #tpu.memory_space<vmem>>, vector<8x128xf32>
    %c56_371 = arith.constant 56 : index
    %c0_372 = arith.constant 0 : index
    %228 = vector.load %arg9[%c56_371, %c0_372] : memref<64x2048xf32, #tpu.memory_space<vmem>>, vector<8x128xf32>
    tpu.vector_store %arg9[%c56_371, %c0_372], %227 {strides = array<i32>} : memref<64x2048xf32, #tpu.memory_space<vmem>>, vector<8x128xf32>,
    %c253_373 = arith.constant 253 : index
    %c0_374 = arith.constant 0 : index
    %229 = tpu.strided_load %arg6[%c253_373, %c0_374] {strides = array<i32: 2, 1>} : memref<324x128xf32, #tpu.memory_space<vmem>>, vector<8x128xf32>
    %c56_375 = arith.constant 56 : index
    %c128_376 = arith.constant 128 : index
    %230 = vector.load %arg9[%c56_375, %c128_376] : memref<64x2048xf32, #tpu.memory_space<vmem>>, vector<8x128xf32>
    tpu.vector_store %arg9[%c56_375, %c128_376], %229 {strides = array<i32>} : memref<64x2048xf32, #tpu.memory_space<vmem>>, vector<8x128xf32>,
    %c254_377 = arith.constant 254 : index
    %c0_378 = arith.constant 0 : index
    %231 = tpu.strided_load %arg6[%c254_377, %c0_378] {strides = array<i32: 2, 1>} : memref<324x128xf32, #tpu.memory_space<vmem>>, vector<8x128xf32>
    %c56_379 = arith.constant 56 : index
    %c256_380 = arith.constant 256 : index
    %232 = vector.load %arg9[%c56_379, %c256_380] : memref<64x2048xf32, #tpu.memory_space<vmem>>, vector<8x128xf32>
    tpu.vector_store %arg9[%c56_379, %c256_380], %231 {strides = array<i32>} : memref<64x2048xf32, #tpu.memory_space<vmem>>, vector<8x128xf32>,
    %c255_381 = arith.constant 255 : index
    %c0_382 = arith.constant 0 : index
    %233 = tpu.strided_load %arg6[%c255_381, %c0_382] {strides = array<i32: 2, 1>} : memref<324x128xf32, #tpu.memory_space<vmem>>, vector<8x128xf32>
    %c56_383 = arith.constant 56 : index
    %c384_384 = arith.constant 384 : index
    %234 = vector.load %arg9[%c56_383, %c384_384] : memref<64x2048xf32, #tpu.memory_space<vmem>>, vector<8x128xf32>
    tpu.vector_store %arg9[%c56_383, %c384_384], %233 {strides = array<i32>} : memref<64x2048xf32, #tpu.memory_space<vmem>>, vector<8x128xf32>,
    %c270_385 = arith.constant 270 : index
    %c0_386 = arith.constant 0 : index
    %235 = tpu.strided_load %arg6[%c270_385, %c0_386] {strides = array<i32: 2, 1>} : memref<324x128xf32, #tpu.memory_space<vmem>>, vector<8x128xf32>
    %c56_387 = arith.constant 56 : index
    %c512_388 = arith.constant 512 : index
    %236 = vector.load %arg9[%c56_387, %c512_388] : memref<64x2048xf32, #tpu.memory_space<vmem>>, vector<8x128xf32>
    tpu.vector_store %arg9[%c56_387, %c512_388], %235 {strides = array<i32>} : memref<64x2048xf32, #tpu.memory_space<vmem>>, vector<8x128xf32>,
    %c271_389 = arith.constant 271 : index
    %c0_390 = arith.constant 0 : index
    %237 = tpu.strided_load %arg6[%c271_389, %c0_390] {strides = array<i32: 2, 1>} : memref<324x128xf32, #tpu.memory_space<vmem>>, vector<8x128xf32>
    %c56_391 = arith.constant 56 : index
    %c640_392 = arith.constant 640 : index
    %238 = vector.load %arg9[%c56_391, %c640_392] : memref<64x2048xf32, #tpu.memory_space<vmem>>, vector<8x128xf32>
    tpu.vector_store %arg9[%c56_391, %c640_392], %237 {strides = array<i32>} : memref<64x2048xf32, #tpu.memory_space<vmem>>, vector<8x128xf32>,
    %c272_393 = arith.constant 272 : index
    %c0_394 = arith.constant 0 : index
    %239 = tpu.strided_load %arg6[%c272_393, %c0_394] {strides = array<i32: 2, 1>} : memref<324x128xf32, #tpu.memory_space<vmem>>, vector<8x128xf32>
    %c56_395 = arith.constant 56 : index
    %c768_396 = arith.constant 768 : index
    %240 = vector.load %arg9[%c56_395, %c768_396] : memref<64x2048xf32, #tpu.memory_space<vmem>>, vector<8x128xf32>
    tpu.vector_store %arg9[%c56_395, %c768_396], %239 {strides = array<i32>} : memref<64x2048xf32, #tpu.memory_space<vmem>>, vector<8x128xf32>,
    %c273_397 = arith.constant 273 : index
    %c0_398 = arith.constant 0 : index
    %241 = tpu.strided_load %arg6[%c273_397, %c0_398] {strides = array<i32: 2, 1>} : memref<324x128xf32, #tpu.memory_space<vmem>>, vector<8x128xf32>
    %c56_399 = arith.constant 56 : index
    %c896_400 = arith.constant 896 : index
    %242 = vector.load %arg9[%c56_399, %c896_400] : memref<64x2048xf32, #tpu.memory_space<vmem>>, vector<8x128xf32>
    tpu.vector_store %arg9[%c56_399, %c896_400], %241 {strides = array<i32>} : memref<64x2048xf32, #tpu.memory_space<vmem>>, vector<8x128xf32>,
    %c288 = arith.constant 288 : index
    %c0_401 = arith.constant 0 : index
    %243 = tpu.strided_load %arg6[%c288, %c0_401] {strides = array<i32: 2, 1>} : memref<324x128xf32, #tpu.memory_space<vmem>>, vector<8x128xf32>
    %c56_402 = arith.constant 56 : index
    %c1024_403 = arith.constant 1024 : index
    %244 = vector.load %arg9[%c56_402, %c1024_403] : memref<64x2048xf32, #tpu.memory_space<vmem>>, vector<8x128xf32>
    tpu.vector_store %arg9[%c56_402, %c1024_403], %243 {strides = array<i32>} : memref<64x2048xf32, #tpu.memory_space<vmem>>, vector<8x128xf32>,
    %c289 = arith.constant 289 : index
    %c0_404 = arith.constant 0 : index
    %245 = tpu.strided_load %arg6[%c289, %c0_404] {strides = array<i32: 2, 1>} : memref<324x128xf32, #tpu.memory_space<vmem>>, vector<8x128xf32>
    %c56_405 = arith.constant 56 : index
    %c1152_406 = arith.constant 1152 : index
    %246 = vector.load %arg9[%c56_405, %c1152_406] : memref<64x2048xf32, #tpu.memory_space<vmem>>, vector<8x128xf32>
    tpu.vector_store %arg9[%c56_405, %c1152_406], %245 {strides = array<i32>} : memref<64x2048xf32, #tpu.memory_space<vmem>>, vector<8x128xf32>,
    %c290 = arith.constant 290 : index
    %c0_407 = arith.constant 0 : index
    %247 = tpu.strided_load %arg6[%c290, %c0_407] {strides = array<i32: 2, 1>} : memref<324x128xf32, #tpu.memory_space<vmem>>, vector<8x128xf32>
    %c56_408 = arith.constant 56 : index
    %c1280_409 = arith.constant 1280 : index
    %248 = vector.load %arg9[%c56_408, %c1280_409] : memref<64x2048xf32, #tpu.memory_space<vmem>>, vector<8x128xf32>
    tpu.vector_store %arg9[%c56_408, %c1280_409], %247 {strides = array<i32>} : memref<64x2048xf32, #tpu.memory_space<vmem>>, vector<8x128xf32>,
    %c291 = arith.constant 291 : index
    %c0_410 = arith.constant 0 : index
    %249 = tpu.strided_load %arg6[%c291, %c0_410] {strides = array<i32: 2, 1>} : memref<324x128xf32, #tpu.memory_space<vmem>>, vector<8x128xf32>
    %c56_411 = arith.constant 56 : index
    %c1408_412 = arith.constant 1408 : index
    %250 = vector.load %arg9[%c56_411, %c1408_412] : memref<64x2048xf32, #tpu.memory_space<vmem>>, vector<8x128xf32>
    tpu.vector_store %arg9[%c56_411, %c1408_412], %249 {strides = array<i32>} : memref<64x2048xf32, #tpu.memory_space<vmem>>, vector<8x128xf32>,
    %c306 = arith.constant 306 : index
    %c0_413 = arith.constant 0 : index
    %251 = tpu.strided_load %arg6[%c306, %c0_413] {strides = array<i32: 2, 1>} : memref<324x128xf32, #tpu.memory_space<vmem>>, vector<8x128xf32>
    %c56_414 = arith.constant 56 : index
    %c1536_415 = arith.constant 1536 : index
    %252 = vector.load %arg9[%c56_414, %c1536_415] : memref<64x2048xf32, #tpu.memory_space<vmem>>, vector<8x128xf32>
    tpu.vector_store %arg9[%c56_414, %c1536_415], %251 {strides = array<i32>} : memref<64x2048xf32, #tpu.memory_space<vmem>>, vector<8x128xf32>,
    %c307 = arith.constant 307 : index
    %c0_416 = arith.constant 0 : index
    %253 = tpu.strided_load %arg6[%c307, %c0_416] {strides = array<i32: 2, 1>} : memref<324x128xf32, #tpu.memory_space<vmem>>, vector<8x128xf32>
    %c56_417 = arith.constant 56 : index
    %c1664_418 = arith.constant 1664 : index
    %254 = vector.load %arg9[%c56_417, %c1664_418] : memref<64x2048xf32, #tpu.memory_space<vmem>>, vector<8x128xf32>
    tpu.vector_store %arg9[%c56_417, %c1664_418], %253 {strides = array<i32>} : memref<64x2048xf32, #tpu.memory_space<vmem>>, vector<8x128xf32>,
    %c308 = arith.constant 308 : index
    %c0_419 = arith.constant 0 : index
    %255 = tpu.strided_load %arg6[%c308, %c0_419] {strides = array<i32: 2, 1>} : memref<324x128xf32, #tpu.memory_space<vmem>>, vector<8x128xf32>
    %c56_420 = arith.constant 56 : index
    %c1792_421 = arith.constant 1792 : index
    %256 = vector.load %arg9[%c56_420, %c1792_421] : memref<64x2048xf32, #tpu.memory_space<vmem>>, vector<8x128xf32>
    tpu.vector_store %arg9[%c56_420, %c1792_421], %255 {strides = array<i32>} : memref<64x2048xf32, #tpu.memory_space<vmem>>, vector<8x128xf32>,
    %c309 = arith.constant 309 : index
    %c0_422 = arith.constant 0 : index
    %257 = tpu.strided_load %arg6[%c309, %c0_422] {strides = array<i32: 2, 1>} : memref<324x128xf32, #tpu.memory_space<vmem>>, vector<8x128xf32>
    %c56_423 = arith.constant 56 : index
    %c1920_424 = arith.constant 1920 : index
    %258 = vector.load %arg9[%c56_423, %c1920_424] : memref<64x2048xf32, #tpu.memory_space<vmem>>, vector<8x128xf32>
    tpu.vector_store %arg9[%c56_423, %c1920_424], %257 {strides = array<i32>} : memref<64x2048xf32, #tpu.memory_space<vmem>>, vector<8x128xf32>,
    %c0_425 = arith.constant 0 : index
    %c0_426 = arith.constant 0 : index
    %259 = vector.load %arg9[%c0_425, %c0_426] : memref<64x2048xf32, #tpu.memory_space<vmem>>, vector<64x2048xf32>
    %260 = arith.truncf %259 : vector<64x2048xf32> to vector<64x2048xbf16>
    %c0_427 = arith.constant 0 : index
    %c0_428 = arith.constant 0 : index
    %261 = vector.load %arg2[%c0_427, %c0_428] : memref<2048x128xbf16, #tpu.memory_space<vmem>>, vector<2048x128xbf16>
    %cst = arith.constant dense<0.000000e+00> : vector<64x128xf32>
    %262 = tpu.matmul %260, %261, %cst {dimension_numbers = #tpu.dot_dimension_numbers<[1], [0], [0], [1], [0, 0, 1, 1], [], []>} : vector<64x2048xbf16>, vector<2048x128xbf16>, vector<64x128xf32> -> vector<64x128xf32>
    %cst_429 = arith.constant 0.000000e+00 : f32
    %263 = vector.broadcast %cst_429 : f32 to vector<64x128xf32>
    %264 = arith.cmpf oge, %262, %263 : vector<64x128xf32>
    %cst_430 = arith.constant 2.000000e-01 : f32
    %265 = vector.broadcast %cst_430 : f32 to vector<64x128xf32>
    %266 = arith.mulf %265, %262 : vector<64x128xf32>
    %267 = arith.select %264, %262, %266 : vector<64x128xi1>, vector<64x128xf32>
    %c0_431 = arith.constant 0 : index
    %c0_432 = arith.constant 0 : index
    %268 = vector.load %arg12[%c0_431, %c0_432] : memref<64x128xf32, #tpu.memory_space<vmem>>, vector<64x128xf32>
    tpu.vector_store %arg12[%c0_431, %c0_432], %267 {strides = array<i32>} : memref<64x128xf32, #tpu.memory_space<vmem>>, vector<64x128xf32>,
    %cst_433 = arith.constant 0.000000e+00 : f32
    %269 = vector.broadcast %cst_433 : f32 to vector<100x128xf32>
    %c0_434 = arith.constant 0 : index
    %c0_435 = arith.constant 0 : index
    %270 = vector.load %arg7[%c0_434, %c0_435] : memref<100x128xf32, #tpu.memory_space<vmem>>, vector<100x128xf32>
    tpu.vector_store %arg7[%c0_434, %c0_435], %269 {strides = array<i32>} : memref<100x128xf32, #tpu.memory_space<vmem>>, vector<100x128xf32>,
    %c0_436 = arith.constant 0 : index
    %c0_437 = arith.constant 0 : index
    %271 = vector.load %arg12[%c0_436, %c0_437] : memref<64x128xf32, #tpu.memory_space<vmem>>, vector<8x128xf32>
    %c11 = arith.constant 11 : index
    %c0_438 = arith.constant 0 : index
    %272 = vector.load %arg7[%c11, %c0_438] : memref<100x128xf32, #tpu.memory_space<vmem>>, vector<8x128xf32>
    tpu.vector_store %arg7[%c11, %c0_438], %271 {strides = array<i32>} : memref<100x128xf32, #tpu.memory_space<vmem>>, vector<8x128xf32>,
    %c8_439 = arith.constant 8 : index
    %c0_440 = arith.constant 0 : index
    %273 = vector.load %arg12[%c8_439, %c0_440] : memref<64x128xf32, #tpu.memory_space<vmem>>, vector<8x128xf32>
    %c21_441 = arith.constant 21 : index
    %c0_442 = arith.constant 0 : index
    %274 = vector.load %arg7[%c21_441, %c0_442] : memref<100x128xf32, #tpu.memory_space<vmem>>, vector<8x128xf32>
    tpu.vector_store %arg7[%c21_441, %c0_442], %273 {strides = array<i32>} : memref<100x128xf32, #tpu.memory_space<vmem>>, vector<8x128xf32>,
    %c16_443 = arith.constant 16 : index
    %c0_444 = arith.constant 0 : index
    %275 = vector.load %arg12[%c16_443, %c0_444] : memref<64x128xf32, #tpu.memory_space<vmem>>, vector<8x128xf32>
    %c31 = arith.constant 31 : index
    %c0_445 = arith.constant 0 : index
    %276 = vector.load %arg7[%c31, %c0_445] : memref<100x128xf32, #tpu.memory_space<vmem>>, vector<8x128xf32>
    tpu.vector_store %arg7[%c31, %c0_445], %275 {strides = array<i32>} : memref<100x128xf32, #tpu.memory_space<vmem>>, vector<8x128xf32>,
    %c24_446 = arith.constant 24 : index
    %c0_447 = arith.constant 0 : index
    %277 = vector.load %arg12[%c24_446, %c0_447] : memref<64x128xf32, #tpu.memory_space<vmem>>, vector<8x128xf32>
    %c41 = arith.constant 41 : index
    %c0_448 = arith.constant 0 : index
    %278 = vector.load %arg7[%c41, %c0_448] : memref<100x128xf32, #tpu.memory_space<vmem>>, vector<8x128xf32>
    tpu.vector_store %arg7[%c41, %c0_448], %277 {strides = array<i32>} : memref<100x128xf32, #tpu.memory_space<vmem>>, vector<8x128xf32>,
    %c32_449 = arith.constant 32 : index
    %c0_450 = arith.constant 0 : index
    %279 = vector.load %arg12[%c32_449, %c0_450] : memref<64x128xf32, #tpu.memory_space<vmem>>, vector<8x128xf32>
    %c51 = arith.constant 51 : index
    %c0_451 = arith.constant 0 : index
    %280 = vector.load %arg7[%c51, %c0_451] : memref<100x128xf32, #tpu.memory_space<vmem>>, vector<8x128xf32>
    tpu.vector_store %arg7[%c51, %c0_451], %279 {strides = array<i32>} : memref<100x128xf32, #tpu.memory_space<vmem>>, vector<8x128xf32>,
    %c40_452 = arith.constant 40 : index
    %c0_453 = arith.constant 0 : index
    %281 = vector.load %arg12[%c40_452, %c0_453] : memref<64x128xf32, #tpu.memory_space<vmem>>, vector<8x128xf32>
    %c61 = arith.constant 61 : index
    %c0_454 = arith.constant 0 : index
    %282 = vector.load %arg7[%c61, %c0_454] : memref<100x128xf32, #tpu.memory_space<vmem>>, vector<8x128xf32>
    tpu.vector_store %arg7[%c61, %c0_454], %281 {strides = array<i32>} : memref<100x128xf32, #tpu.memory_space<vmem>>, vector<8x128xf32>,
    %c48_455 = arith.constant 48 : index
    %c0_456 = arith.constant 0 : index
    %283 = vector.load %arg12[%c48_455, %c0_456] : memref<64x128xf32, #tpu.memory_space<vmem>>, vector<8x128xf32>
    %c71 = arith.constant 71 : index
    %c0_457 = arith.constant 0 : index
    %284 = vector.load %arg7[%c71, %c0_457] : memref<100x128xf32, #tpu.memory_space<vmem>>, vector<8x128xf32>
    tpu.vector_store %arg7[%c71, %c0_457], %283 {strides = array<i32>} : memref<100x128xf32, #tpu.memory_space<vmem>>, vector<8x128xf32>,
    %c56_458 = arith.constant 56 : index
    %c0_459 = arith.constant 0 : index
    %285 = vector.load %arg12[%c56_458, %c0_459] : memref<64x128xf32, #tpu.memory_space<vmem>>, vector<8x128xf32>
    %c81 = arith.constant 81 : index
    %c0_460 = arith.constant 0 : index
    %286 = vector.load %arg7[%c81, %c0_460] : memref<100x128xf32, #tpu.memory_space<vmem>>, vector<8x128xf32>
    tpu.vector_store %arg7[%c81, %c0_460], %285 {strides = array<i32>} : memref<100x128xf32, #tpu.memory_space<vmem>>, vector<8x128xf32>,
    %c0_461 = arith.constant 0 : index
    %c0_462 = arith.constant 0 : index
    %287 = tpu.strided_load %arg7[%c0_461, %c0_462] {strides = array<i32: 2, 1>} : memref<100x128xf32, #tpu.memory_space<vmem>>, vector<4x128xf32>
    %c0_463 = arith.constant 0 : index
    %c0_464 = arith.constant 0 : index
    %288 = vector.load %arg10[%c0_463, %c0_464] : memref<16x2048xf32, #tpu.memory_space<vmem>>, vector<4x128xf32>
    tpu.vector_store %arg10[%c0_463, %c0_464], %287 {strides = array<i32>} : memref<16x2048xf32, #tpu.memory_space<vmem>>, vector<4x128xf32>,
    %c1_465 = arith.constant 1 : index
    %c0_466 = arith.constant 0 : index
    %289 = tpu.strided_load %arg7[%c1_465, %c0_466] {strides = array<i32: 2, 1>} : memref<100x128xf32, #tpu.memory_space<vmem>>, vector<4x128xf32>
    %c0_467 = arith.constant 0 : index
    %c128_468 = arith.constant 128 : index
    %290 = vector.load %arg10[%c0_467, %c128_468] : memref<16x2048xf32, #tpu.memory_space<vmem>>, vector<4x128xf32>
    tpu.vector_store %arg10[%c0_467, %c128_468], %289 {strides = array<i32>} : memref<16x2048xf32, #tpu.memory_space<vmem>>, vector<4x128xf32>,
    %c2_469 = arith.constant 2 : index
    %c0_470 = arith.constant 0 : index
    %291 = tpu.strided_load %arg7[%c2_469, %c0_470] {strides = array<i32: 2, 1>} : memref<100x128xf32, #tpu.memory_space<vmem>>, vector<4x128xf32>
    %c0_471 = arith.constant 0 : index
    %c256_472 = arith.constant 256 : index
    %292 = vector.load %arg10[%c0_471, %c256_472] : memref<16x2048xf32, #tpu.memory_space<vmem>>, vector<4x128xf32>
    tpu.vector_store %arg10[%c0_471, %c256_472], %291 {strides = array<i32>} : memref<16x2048xf32, #tpu.memory_space<vmem>>, vector<4x128xf32>,
    %c3_473 = arith.constant 3 : index
    %c0_474 = arith.constant 0 : index
    %293 = tpu.strided_load %arg7[%c3_473, %c0_474] {strides = array<i32: 2, 1>} : memref<100x128xf32, #tpu.memory_space<vmem>>, vector<4x128xf32>
    %c0_475 = arith.constant 0 : index
    %c384_476 = arith.constant 384 : index
    %294 = vector.load %arg10[%c0_475, %c384_476] : memref<16x2048xf32, #tpu.memory_space<vmem>>, vector<4x128xf32>
    tpu.vector_store %arg10[%c0_475, %c384_476], %293 {strides = array<i32>} : memref<16x2048xf32, #tpu.memory_space<vmem>>, vector<4x128xf32>,
    %c10 = arith.constant 10 : index
    %c0_477 = arith.constant 0 : index
    %295 = tpu.strided_load %arg7[%c10, %c0_477] {strides = array<i32: 2, 1>} : memref<100x128xf32, #tpu.memory_space<vmem>>, vector<4x128xf32>
    %c0_478 = arith.constant 0 : index
    %c512_479 = arith.constant 512 : index
    %296 = vector.load %arg10[%c0_478, %c512_479] : memref<16x2048xf32, #tpu.memory_space<vmem>>, vector<4x128xf32>
    tpu.vector_store %arg10[%c0_478, %c512_479], %295 {strides = array<i32>} : memref<16x2048xf32, #tpu.memory_space<vmem>>, vector<4x128xf32>,
    %c11_480 = arith.constant 11 : index
    %c0_481 = arith.constant 0 : index
    %297 = tpu.strided_load %arg7[%c11_480, %c0_481] {strides = array<i32: 2, 1>} : memref<100x128xf32, #tpu.memory_space<vmem>>, vector<4x128xf32>
    %c0_482 = arith.constant 0 : index
    %c640_483 = arith.constant 640 : index
    %298 = vector.load %arg10[%c0_482, %c640_483] : memref<16x2048xf32, #tpu.memory_space<vmem>>, vector<4x128xf32>
    tpu.vector_store %arg10[%c0_482, %c640_483], %297 {strides = array<i32>} : memref<16x2048xf32, #tpu.memory_space<vmem>>, vector<4x128xf32>,
    %c12 = arith.constant 12 : index
    %c0_484 = arith.constant 0 : index
    %299 = tpu.strided_load %arg7[%c12, %c0_484] {strides = array<i32: 2, 1>} : memref<100x128xf32, #tpu.memory_space<vmem>>, vector<4x128xf32>
    %c0_485 = arith.constant 0 : index
    %c768_486 = arith.constant 768 : index
    %300 = vector.load %arg10[%c0_485, %c768_486] : memref<16x2048xf32, #tpu.memory_space<vmem>>, vector<4x128xf32>
    tpu.vector_store %arg10[%c0_485, %c768_486], %299 {strides = array<i32>} : memref<16x2048xf32, #tpu.memory_space<vmem>>, vector<4x128xf32>,
    %c13 = arith.constant 13 : index
    %c0_487 = arith.constant 0 : index
    %301 = tpu.strided_load %arg7[%c13, %c0_487] {strides = array<i32: 2, 1>} : memref<100x128xf32, #tpu.memory_space<vmem>>, vector<4x128xf32>
    %c0_488 = arith.constant 0 : index
    %c896_489 = arith.constant 896 : index
    %302 = vector.load %arg10[%c0_488, %c896_489] : memref<16x2048xf32, #tpu.memory_space<vmem>>, vector<4x128xf32>
    tpu.vector_store %arg10[%c0_488, %c896_489], %301 {strides = array<i32>} : memref<16x2048xf32, #tpu.memory_space<vmem>>, vector<4x128xf32>,
    %c20_490 = arith.constant 20 : index
    %c0_491 = arith.constant 0 : index
    %303 = tpu.strided_load %arg7[%c20_490, %c0_491] {strides = array<i32: 2, 1>} : memref<100x128xf32, #tpu.memory_space<vmem>>, vector<4x128xf32>
    %c0_492 = arith.constant 0 : index
    %c1024_493 = arith.constant 1024 : index
    %304 = vector.load %arg10[%c0_492, %c1024_493] : memref<16x2048xf32, #tpu.memory_space<vmem>>, vector<4x128xf32>
    tpu.vector_store %arg10[%c0_492, %c1024_493], %303 {strides = array<i32>} : memref<16x2048xf32, #tpu.memory_space<vmem>>, vector<4x128xf32>,
    %c21_494 = arith.constant 21 : index
    %c0_495 = arith.constant 0 : index
    %305 = tpu.strided_load %arg7[%c21_494, %c0_495] {strides = array<i32: 2, 1>} : memref<100x128xf32, #tpu.memory_space<vmem>>, vector<4x128xf32>
    %c0_496 = arith.constant 0 : index
    %c1152_497 = arith.constant 1152 : index
    %306 = vector.load %arg10[%c0_496, %c1152_497] : memref<16x2048xf32, #tpu.memory_space<vmem>>, vector<4x128xf32>
    tpu.vector_store %arg10[%c0_496, %c1152_497], %305 {strides = array<i32>} : memref<16x2048xf32, #tpu.memory_space<vmem>>, vector<4x128xf32>,
    %c22 = arith.constant 22 : index
    %c0_498 = arith.constant 0 : index
    %307 = tpu.strided_load %arg7[%c22, %c0_498] {strides = array<i32: 2, 1>} : memref<100x128xf32, #tpu.memory_space<vmem>>, vector<4x128xf32>
    %c0_499 = arith.constant 0 : index
    %c1280_500 = arith.constant 1280 : index
    %308 = vector.load %arg10[%c0_499, %c1280_500] : memref<16x2048xf32, #tpu.memory_space<vmem>>, vector<4x128xf32>
    tpu.vector_store %arg10[%c0_499, %c1280_500], %307 {strides = array<i32>} : memref<16x2048xf32, #tpu.memory_space<vmem>>, vector<4x128xf32>,
    %c23 = arith.constant 23 : index
    %c0_501 = arith.constant 0 : index
    %309 = tpu.strided_load %arg7[%c23, %c0_501] {strides = array<i32: 2, 1>} : memref<100x128xf32, #tpu.memory_space<vmem>>, vector<4x128xf32>
    %c0_502 = arith.constant 0 : index
    %c1408_503 = arith.constant 1408 : index
    %310 = vector.load %arg10[%c0_502, %c1408_503] : memref<16x2048xf32, #tpu.memory_space<vmem>>, vector<4x128xf32>
    tpu.vector_store %arg10[%c0_502, %c1408_503], %309 {strides = array<i32>} : memref<16x2048xf32, #tpu.memory_space<vmem>>, vector<4x128xf32>,
    %c30 = arith.constant 30 : index
    %c0_504 = arith.constant 0 : index
    %311 = tpu.strided_load %arg7[%c30, %c0_504] {strides = array<i32: 2, 1>} : memref<100x128xf32, #tpu.memory_space<vmem>>, vector<4x128xf32>
    %c0_505 = arith.constant 0 : index
    %c1536_506 = arith.constant 1536 : index
    %312 = vector.load %arg10[%c0_505, %c1536_506] : memref<16x2048xf32, #tpu.memory_space<vmem>>, vector<4x128xf32>
    tpu.vector_store %arg10[%c0_505, %c1536_506], %311 {strides = array<i32>} : memref<16x2048xf32, #tpu.memory_space<vmem>>, vector<4x128xf32>,
    %c31_507 = arith.constant 31 : index
    %c0_508 = arith.constant 0 : index
    %313 = tpu.strided_load %arg7[%c31_507, %c0_508] {strides = array<i32: 2, 1>} : memref<100x128xf32, #tpu.memory_space<vmem>>, vector<4x128xf32>
    %c0_509 = arith.constant 0 : index
    %c1664_510 = arith.constant 1664 : index
    %314 = vector.load %arg10[%c0_509, %c1664_510] : memref<16x2048xf32, #tpu.memory_space<vmem>>, vector<4x128xf32>
    tpu.vector_store %arg10[%c0_509, %c1664_510], %313 {strides = array<i32>} : memref<16x2048xf32, #tpu.memory_space<vmem>>, vector<4x128xf32>,
    %c32_511 = arith.constant 32 : index
    %c0_512 = arith.constant 0 : index
    %315 = tpu.strided_load %arg7[%c32_511, %c0_512] {strides = array<i32: 2, 1>} : memref<100x128xf32, #tpu.memory_space<vmem>>, vector<4x128xf32>
    %c0_513 = arith.constant 0 : index
    %c1792_514 = arith.constant 1792 : index
    %316 = vector.load %arg10[%c0_513, %c1792_514] : memref<16x2048xf32, #tpu.memory_space<vmem>>, vector<4x128xf32>
    tpu.vector_store %arg10[%c0_513, %c1792_514], %315 {strides = array<i32>} : memref<16x2048xf32, #tpu.memory_space<vmem>>, vector<4x128xf32>,
    %c33 = arith.constant 33 : index
    %c0_515 = arith.constant 0 : index
    %317 = tpu.strided_load %arg7[%c33, %c0_515] {strides = array<i32: 2, 1>} : memref<100x128xf32, #tpu.memory_space<vmem>>, vector<4x128xf32>
    %c0_516 = arith.constant 0 : index
    %c1920_517 = arith.constant 1920 : index
    %318 = vector.load %arg10[%c0_516, %c1920_517] : memref<16x2048xf32, #tpu.memory_space<vmem>>, vector<4x128xf32>
    tpu.vector_store %arg10[%c0_516, %c1920_517], %317 {strides = array<i32>} : memref<16x2048xf32, #tpu.memory_space<vmem>>, vector<4x128xf32>,
    %c20_518 = arith.constant 20 : index
    %c0_519 = arith.constant 0 : index
    %319 = tpu.strided_load %arg7[%c20_518, %c0_519] {strides = array<i32: 2, 1>} : memref<100x128xf32, #tpu.memory_space<vmem>>, vector<4x128xf32>
    %c4 = arith.constant 4 : index
    %c0_520 = arith.constant 0 : index
    %320 = vector.load %arg10[%c4, %c0_520] : memref<16x2048xf32, #tpu.memory_space<vmem>>, vector<4x128xf32>
    tpu.vector_store %arg10[%c4, %c0_520], %319 {strides = array<i32>} : memref<16x2048xf32, #tpu.memory_space<vmem>>, vector<4x128xf32>,
    %c21_521 = arith.constant 21 : index
    %c0_522 = arith.constant 0 : index
    %321 = tpu.strided_load %arg7[%c21_521, %c0_522] {strides = array<i32: 2, 1>} : memref<100x128xf32, #tpu.memory_space<vmem>>, vector<4x128xf32>
    %c4_523 = arith.constant 4 : index
    %c128_524 = arith.constant 128 : index
    %322 = vector.load %arg10[%c4_523, %c128_524] : memref<16x2048xf32, #tpu.memory_space<vmem>>, vector<4x128xf32>
    tpu.vector_store %arg10[%c4_523, %c128_524], %321 {strides = array<i32>} : memref<16x2048xf32, #tpu.memory_space<vmem>>, vector<4x128xf32>,
    %c22_525 = arith.constant 22 : index
    %c0_526 = arith.constant 0 : index
    %323 = tpu.strided_load %arg7[%c22_525, %c0_526] {strides = array<i32: 2, 1>} : memref<100x128xf32, #tpu.memory_space<vmem>>, vector<4x128xf32>
    %c4_527 = arith.constant 4 : index
    %c256_528 = arith.constant 256 : index
    %324 = vector.load %arg10[%c4_527, %c256_528] : memref<16x2048xf32, #tpu.memory_space<vmem>>, vector<4x128xf32>
    tpu.vector_store %arg10[%c4_527, %c256_528], %323 {strides = array<i32>} : memref<16x2048xf32, #tpu.memory_space<vmem>>, vector<4x128xf32>,
    %c23_529 = arith.constant 23 : index
    %c0_530 = arith.constant 0 : index
    %325 = tpu.strided_load %arg7[%c23_529, %c0_530] {strides = array<i32: 2, 1>} : memref<100x128xf32, #tpu.memory_space<vmem>>, vector<4x128xf32>
    %c4_531 = arith.constant 4 : index
    %c384_532 = arith.constant 384 : index
    %326 = vector.load %arg10[%c4_531, %c384_532] : memref<16x2048xf32, #tpu.memory_space<vmem>>, vector<4x128xf32>
    tpu.vector_store %arg10[%c4_531, %c384_532], %325 {strides = array<i32>} : memref<16x2048xf32, #tpu.memory_space<vmem>>, vector<4x128xf32>,
    %c30_533 = arith.constant 30 : index
    %c0_534 = arith.constant 0 : index
    %327 = tpu.strided_load %arg7[%c30_533, %c0_534] {strides = array<i32: 2, 1>} : memref<100x128xf32, #tpu.memory_space<vmem>>, vector<4x128xf32>
    %c4_535 = arith.constant 4 : index
    %c512_536 = arith.constant 512 : index
    %328 = vector.load %arg10[%c4_535, %c512_536] : memref<16x2048xf32, #tpu.memory_space<vmem>>, vector<4x128xf32>
    tpu.vector_store %arg10[%c4_535, %c512_536], %327 {strides = array<i32>} : memref<16x2048xf32, #tpu.memory_space<vmem>>, vector<4x128xf32>,
    %c31_537 = arith.constant 31 : index
    %c0_538 = arith.constant 0 : index
    %329 = tpu.strided_load %arg7[%c31_537, %c0_538] {strides = array<i32: 2, 1>} : memref<100x128xf32, #tpu.memory_space<vmem>>, vector<4x128xf32>
    %c4_539 = arith.constant 4 : index
    %c640_540 = arith.constant 640 : index
    %330 = vector.load %arg10[%c4_539, %c640_540] : memref<16x2048xf32, #tpu.memory_space<vmem>>, vector<4x128xf32>
    tpu.vector_store %arg10[%c4_539, %c640_540], %329 {strides = array<i32>} : memref<16x2048xf32, #tpu.memory_space<vmem>>, vector<4x128xf32>,
    %c32_541 = arith.constant 32 : index
    %c0_542 = arith.constant 0 : index
    %331 = tpu.strided_load %arg7[%c32_541, %c0_542] {strides = array<i32: 2, 1>} : memref<100x128xf32, #tpu.memory_space<vmem>>, vector<4x128xf32>
    %c4_543 = arith.constant 4 : index
    %c768_544 = arith.constant 768 : index
    %332 = vector.load %arg10[%c4_543, %c768_544] : memref<16x2048xf32, #tpu.memory_space<vmem>>, vector<4x128xf32>
    tpu.vector_store %arg10[%c4_543, %c768_544], %331 {strides = array<i32>} : memref<16x2048xf32, #tpu.memory_space<vmem>>, vector<4x128xf32>,
    %c33_545 = arith.constant 33 : index
    %c0_546 = arith.constant 0 : index
    %333 = tpu.strided_load %arg7[%c33_545, %c0_546] {strides = array<i32: 2, 1>} : memref<100x128xf32, #tpu.memory_space<vmem>>, vector<4x128xf32>
    %c4_547 = arith.constant 4 : index
    %c896_548 = arith.constant 896 : index
    %334 = vector.load %arg10[%c4_547, %c896_548] : memref<16x2048xf32, #tpu.memory_space<vmem>>, vector<4x128xf32>
    tpu.vector_store %arg10[%c4_547, %c896_548], %333 {strides = array<i32>} : memref<16x2048xf32, #tpu.memory_space<vmem>>, vector<4x128xf32>,
    %c40_549 = arith.constant 40 : index
    %c0_550 = arith.constant 0 : index
    %335 = tpu.strided_load %arg7[%c40_549, %c0_550] {strides = array<i32: 2, 1>} : memref<100x128xf32, #tpu.memory_space<vmem>>, vector<4x128xf32>
    %c4_551 = arith.constant 4 : index
    %c1024_552 = arith.constant 1024 : index
    %336 = vector.load %arg10[%c4_551, %c1024_552] : memref<16x2048xf32, #tpu.memory_space<vmem>>, vector<4x128xf32>
    tpu.vector_store %arg10[%c4_551, %c1024_552], %335 {strides = array<i32>} : memref<16x2048xf32, #tpu.memory_space<vmem>>, vector<4x128xf32>,
    %c41_553 = arith.constant 41 : index
    %c0_554 = arith.constant 0 : index
    %337 = tpu.strided_load %arg7[%c41_553, %c0_554] {strides = array<i32: 2, 1>} : memref<100x128xf32, #tpu.memory_space<vmem>>, vector<4x128xf32>
    %c4_555 = arith.constant 4 : index
    %c1152_556 = arith.constant 1152 : index
    %338 = vector.load %arg10[%c4_555, %c1152_556] : memref<16x2048xf32, #tpu.memory_space<vmem>>, vector<4x128xf32>
    tpu.vector_store %arg10[%c4_555, %c1152_556], %337 {strides = array<i32>} : memref<16x2048xf32, #tpu.memory_space<vmem>>, vector<4x128xf32>,
    %c42 = arith.constant 42 : index
    %c0_557 = arith.constant 0 : index
    %339 = tpu.strided_load %arg7[%c42, %c0_557] {strides = array<i32: 2, 1>} : memref<100x128xf32, #tpu.memory_space<vmem>>, vector<4x128xf32>
    %c4_558 = arith.constant 4 : index
    %c1280_559 = arith.constant 1280 : index
    %340 = vector.load %arg10[%c4_558, %c1280_559] : memref<16x2048xf32, #tpu.memory_space<vmem>>, vector<4x128xf32>
    tpu.vector_store %arg10[%c4_558, %c1280_559], %339 {strides = array<i32>} : memref<16x2048xf32, #tpu.memory_space<vmem>>, vector<4x128xf32>,
    %c43 = arith.constant 43 : index
    %c0_560 = arith.constant 0 : index
    %341 = tpu.strided_load %arg7[%c43, %c0_560] {strides = array<i32: 2, 1>} : memref<100x128xf32, #tpu.memory_space<vmem>>, vector<4x128xf32>
    %c4_561 = arith.constant 4 : index
    %c1408_562 = arith.constant 1408 : index
    %342 = vector.load %arg10[%c4_561, %c1408_562] : memref<16x2048xf32, #tpu.memory_space<vmem>>, vector<4x128xf32>
    tpu.vector_store %arg10[%c4_561, %c1408_562], %341 {strides = array<i32>} : memref<16x2048xf32, #tpu.memory_space<vmem>>, vector<4x128xf32>,
    %c50 = arith.constant 50 : index
    %c0_563 = arith.constant 0 : index
    %343 = tpu.strided_load %arg7[%c50, %c0_563] {strides = array<i32: 2, 1>} : memref<100x128xf32, #tpu.memory_space<vmem>>, vector<4x128xf32>
    %c4_564 = arith.constant 4 : index
    %c1536_565 = arith.constant 1536 : index
    %344 = vector.load %arg10[%c4_564, %c1536_565] : memref<16x2048xf32, #tpu.memory_space<vmem>>, vector<4x128xf32>
    tpu.vector_store %arg10[%c4_564, %c1536_565], %343 {strides = array<i32>} : memref<16x2048xf32, #tpu.memory_space<vmem>>, vector<4x128xf32>,
    %c51_566 = arith.constant 51 : index
    %c0_567 = arith.constant 0 : index
    %345 = tpu.strided_load %arg7[%c51_566, %c0_567] {strides = array<i32: 2, 1>} : memref<100x128xf32, #tpu.memory_space<vmem>>, vector<4x128xf32>
    %c4_568 = arith.constant 4 : index
    %c1664_569 = arith.constant 1664 : index
    %346 = vector.load %arg10[%c4_568, %c1664_569] : memref<16x2048xf32, #tpu.memory_space<vmem>>, vector<4x128xf32>
    tpu.vector_store %arg10[%c4_568, %c1664_569], %345 {strides = array<i32>} : memref<16x2048xf32, #tpu.memory_space<vmem>>, vector<4x128xf32>,
    %c52 = arith.constant 52 : index
    %c0_570 = arith.constant 0 : index
    %347 = tpu.strided_load %arg7[%c52, %c0_570] {strides = array<i32: 2, 1>} : memref<100x128xf32, #tpu.memory_space<vmem>>, vector<4x128xf32>
    %c4_571 = arith.constant 4 : index
    %c1792_572 = arith.constant 1792 : index
    %348 = vector.load %arg10[%c4_571, %c1792_572] : memref<16x2048xf32, #tpu.memory_space<vmem>>, vector<4x128xf32>
    tpu.vector_store %arg10[%c4_571, %c1792_572], %347 {strides = array<i32>} : memref<16x2048xf32, #tpu.memory_space<vmem>>, vector<4x128xf32>,
    %c53 = arith.constant 53 : index
    %c0_573 = arith.constant 0 : index
    %349 = tpu.strided_load %arg7[%c53, %c0_573] {strides = array<i32: 2, 1>} : memref<100x128xf32, #tpu.memory_space<vmem>>, vector<4x128xf32>
    %c4_574 = arith.constant 4 : index
    %c1920_575 = arith.constant 1920 : index
    %350 = vector.load %arg10[%c4_574, %c1920_575] : memref<16x2048xf32, #tpu.memory_space<vmem>>, vector<4x128xf32>
    tpu.vector_store %arg10[%c4_574, %c1920_575], %349 {strides = array<i32>} : memref<16x2048xf32, #tpu.memory_space<vmem>>, vector<4x128xf32>,
    %c40_576 = arith.constant 40 : index
    %c0_577 = arith.constant 0 : index
    %351 = tpu.strided_load %arg7[%c40_576, %c0_577] {strides = array<i32: 2, 1>} : memref<100x128xf32, #tpu.memory_space<vmem>>, vector<4x128xf32>
    %c8_578 = arith.constant 8 : index
    %c0_579 = arith.constant 0 : index
    %352 = vector.load %arg10[%c8_578, %c0_579] : memref<16x2048xf32, #tpu.memory_space<vmem>>, vector<4x128xf32>
    tpu.vector_store %arg10[%c8_578, %c0_579], %351 {strides = array<i32>} : memref<16x2048xf32, #tpu.memory_space<vmem>>, vector<4x128xf32>,
    %c41_580 = arith.constant 41 : index
    %c0_581 = arith.constant 0 : index
    %353 = tpu.strided_load %arg7[%c41_580, %c0_581] {strides = array<i32: 2, 1>} : memref<100x128xf32, #tpu.memory_space<vmem>>, vector<4x128xf32>
    %c8_582 = arith.constant 8 : index
    %c128_583 = arith.constant 128 : index
    %354 = vector.load %arg10[%c8_582, %c128_583] : memref<16x2048xf32, #tpu.memory_space<vmem>>, vector<4x128xf32>
    tpu.vector_store %arg10[%c8_582, %c128_583], %353 {strides = array<i32>} : memref<16x2048xf32, #tpu.memory_space<vmem>>, vector<4x128xf32>,
    %c42_584 = arith.constant 42 : index
    %c0_585 = arith.constant 0 : index
    %355 = tpu.strided_load %arg7[%c42_584, %c0_585] {strides = array<i32: 2, 1>} : memref<100x128xf32, #tpu.memory_space<vmem>>, vector<4x128xf32>
    %c8_586 = arith.constant 8 : index
    %c256_587 = arith.constant 256 : index
    %356 = vector.load %arg10[%c8_586, %c256_587] : memref<16x2048xf32, #tpu.memory_space<vmem>>, vector<4x128xf32>
    tpu.vector_store %arg10[%c8_586, %c256_587], %355 {strides = array<i32>} : memref<16x2048xf32, #tpu.memory_space<vmem>>, vector<4x128xf32>,
    %c43_588 = arith.constant 43 : index
    %c0_589 = arith.constant 0 : index
    %357 = tpu.strided_load %arg7[%c43_588, %c0_589] {strides = array<i32: 2, 1>} : memref<100x128xf32, #tpu.memory_space<vmem>>, vector<4x128xf32>
    %c8_590 = arith.constant 8 : index
    %c384_591 = arith.constant 384 : index
    %358 = vector.load %arg10[%c8_590, %c384_591] : memref<16x2048xf32, #tpu.memory_space<vmem>>, vector<4x128xf32>
    tpu.vector_store %arg10[%c8_590, %c384_591], %357 {strides = array<i32>} : memref<16x2048xf32, #tpu.memory_space<vmem>>, vector<4x128xf32>,
    %c50_592 = arith.constant 50 : index
    %c0_593 = arith.constant 0 : index
    %359 = tpu.strided_load %arg7[%c50_592, %c0_593] {strides = array<i32: 2, 1>} : memref<100x128xf32, #tpu.memory_space<vmem>>, vector<4x128xf32>
    %c8_594 = arith.constant 8 : index
    %c512_595 = arith.constant 512 : index
    %360 = vector.load %arg10[%c8_594, %c512_595] : memref<16x2048xf32, #tpu.memory_space<vmem>>, vector<4x128xf32>
    tpu.vector_store %arg10[%c8_594, %c512_595], %359 {strides = array<i32>} : memref<16x2048xf32, #tpu.memory_space<vmem>>, vector<4x128xf32>,
    %c51_596 = arith.constant 51 : index
    %c0_597 = arith.constant 0 : index
    %361 = tpu.strided_load %arg7[%c51_596, %c0_597] {strides = array<i32: 2, 1>} : memref<100x128xf32, #tpu.memory_space<vmem>>, vector<4x128xf32>
    %c8_598 = arith.constant 8 : index
    %c640_599 = arith.constant 640 : index
    %362 = vector.load %arg10[%c8_598, %c640_599] : memref<16x2048xf32, #tpu.memory_space<vmem>>, vector<4x128xf32>
    tpu.vector_store %arg10[%c8_598, %c640_599], %361 {strides = array<i32>} : memref<16x2048xf32, #tpu.memory_space<vmem>>, vector<4x128xf32>,
    %c52_600 = arith.constant 52 : index
    %c0_601 = arith.constant 0 : index
    %363 = tpu.strided_load %arg7[%c52_600, %c0_601] {strides = array<i32: 2, 1>} : memref<100x128xf32, #tpu.memory_space<vmem>>, vector<4x128xf32>
    %c8_602 = arith.constant 8 : index
    %c768_603 = arith.constant 768 : index
    %364 = vector.load %arg10[%c8_602, %c768_603] : memref<16x2048xf32, #tpu.memory_space<vmem>>, vector<4x128xf32>
    tpu.vector_store %arg10[%c8_602, %c768_603], %363 {strides = array<i32>} : memref<16x2048xf32, #tpu.memory_space<vmem>>, vector<4x128xf32>,
    %c53_604 = arith.constant 53 : index
    %c0_605 = arith.constant 0 : index
    %365 = tpu.strided_load %arg7[%c53_604, %c0_605] {strides = array<i32: 2, 1>} : memref<100x128xf32, #tpu.memory_space<vmem>>, vector<4x128xf32>
    %c8_606 = arith.constant 8 : index
    %c896_607 = arith.constant 896 : index
    %366 = vector.load %arg10[%c8_606, %c896_607] : memref<16x2048xf32, #tpu.memory_space<vmem>>, vector<4x128xf32>
    tpu.vector_store %arg10[%c8_606, %c896_607], %365 {strides = array<i32>} : memref<16x2048xf32, #tpu.memory_space<vmem>>, vector<4x128xf32>,
    %c60 = arith.constant 60 : index
    %c0_608 = arith.constant 0 : index
    %367 = tpu.strided_load %arg7[%c60, %c0_608] {strides = array<i32: 2, 1>} : memref<100x128xf32, #tpu.memory_space<vmem>>, vector<4x128xf32>
    %c8_609 = arith.constant 8 : index
    %c1024_610 = arith.constant 1024 : index
    %368 = vector.load %arg10[%c8_609, %c1024_610] : memref<16x2048xf32, #tpu.memory_space<vmem>>, vector<4x128xf32>
    tpu.vector_store %arg10[%c8_609, %c1024_610], %367 {strides = array<i32>} : memref<16x2048xf32, #tpu.memory_space<vmem>>, vector<4x128xf32>,
    %c61_611 = arith.constant 61 : index
    %c0_612 = arith.constant 0 : index
    %369 = tpu.strided_load %arg7[%c61_611, %c0_612] {strides = array<i32: 2, 1>} : memref<100x128xf32, #tpu.memory_space<vmem>>, vector<4x128xf32>
    %c8_613 = arith.constant 8 : index
    %c1152_614 = arith.constant 1152 : index
    %370 = vector.load %arg10[%c8_613, %c1152_614] : memref<16x2048xf32, #tpu.memory_space<vmem>>, vector<4x128xf32>
    tpu.vector_store %arg10[%c8_613, %c1152_614], %369 {strides = array<i32>} : memref<16x2048xf32, #tpu.memory_space<vmem>>, vector<4x128xf32>,
    %c62 = arith.constant 62 : index
    %c0_615 = arith.constant 0 : index
    %371 = tpu.strided_load %arg7[%c62, %c0_615] {strides = array<i32: 2, 1>} : memref<100x128xf32, #tpu.memory_space<vmem>>, vector<4x128xf32>
    %c8_616 = arith.constant 8 : index
    %c1280_617 = arith.constant 1280 : index
    %372 = vector.load %arg10[%c8_616, %c1280_617] : memref<16x2048xf32, #tpu.memory_space<vmem>>, vector<4x128xf32>
    tpu.vector_store %arg10[%c8_616, %c1280_617], %371 {strides = array<i32>} : memref<16x2048xf32, #tpu.memory_space<vmem>>, vector<4x128xf32>,
    %c63 = arith.constant 63 : index
    %c0_618 = arith.constant 0 : index
    %373 = tpu.strided_load %arg7[%c63, %c0_618] {strides = array<i32: 2, 1>} : memref<100x128xf32, #tpu.memory_space<vmem>>, vector<4x128xf32>
    %c8_619 = arith.constant 8 : index
    %c1408_620 = arith.constant 1408 : index
    %374 = vector.load %arg10[%c8_619, %c1408_620] : memref<16x2048xf32, #tpu.memory_space<vmem>>, vector<4x128xf32>
    tpu.vector_store %arg10[%c8_619, %c1408_620], %373 {strides = array<i32>} : memref<16x2048xf32, #tpu.memory_space<vmem>>, vector<4x128xf32>,
    %c70 = arith.constant 70 : index
    %c0_621 = arith.constant 0 : index
    %375 = tpu.strided_load %arg7[%c70, %c0_621] {strides = array<i32: 2, 1>} : memref<100x128xf32, #tpu.memory_space<vmem>>, vector<4x128xf32>
    %c8_622 = arith.constant 8 : index
    %c1536_623 = arith.constant 1536 : index
    %376 = vector.load %arg10[%c8_622, %c1536_623] : memref<16x2048xf32, #tpu.memory_space<vmem>>, vector<4x128xf32>
    tpu.vector_store %arg10[%c8_622, %c1536_623], %375 {strides = array<i32>} : memref<16x2048xf32, #tpu.memory_space<vmem>>, vector<4x128xf32>,
    %c71_624 = arith.constant 71 : index
    %c0_625 = arith.constant 0 : index
    %377 = tpu.strided_load %arg7[%c71_624, %c0_625] {strides = array<i32: 2, 1>} : memref<100x128xf32, #tpu.memory_space<vmem>>, vector<4x128xf32>
    %c8_626 = arith.constant 8 : index
    %c1664_627 = arith.constant 1664 : index
    %378 = vector.load %arg10[%c8_626, %c1664_627] : memref<16x2048xf32, #tpu.memory_space<vmem>>, vector<4x128xf32>
    tpu.vector_store %arg10[%c8_626, %c1664_627], %377 {strides = array<i32>} : memref<16x2048xf32, #tpu.memory_space<vmem>>, vector<4x128xf32>,
    %c72_628 = arith.constant 72 : index
    %c0_629 = arith.constant 0 : index
    %379 = tpu.strided_load %arg7[%c72_628, %c0_629] {strides = array<i32: 2, 1>} : memref<100x128xf32, #tpu.memory_space<vmem>>, vector<4x128xf32>
    %c8_630 = arith.constant 8 : index
    %c1792_631 = arith.constant 1792 : index
    %380 = vector.load %arg10[%c8_630, %c1792_631] : memref<16x2048xf32, #tpu.memory_space<vmem>>, vector<4x128xf32>
    tpu.vector_store %arg10[%c8_630, %c1792_631], %379 {strides = array<i32>} : memref<16x2048xf32, #tpu.memory_space<vmem>>, vector<4x128xf32>,
    %c73_632 = arith.constant 73 : index
    %c0_633 = arith.constant 0 : index
    %381 = tpu.strided_load %arg7[%c73_632, %c0_633] {strides = array<i32: 2, 1>} : memref<100x128xf32, #tpu.memory_space<vmem>>, vector<4x128xf32>
    %c8_634 = arith.constant 8 : index
    %c1920_635 = arith.constant 1920 : index
    %382 = vector.load %arg10[%c8_634, %c1920_635] : memref<16x2048xf32, #tpu.memory_space<vmem>>, vector<4x128xf32>
    tpu.vector_store %arg10[%c8_634, %c1920_635], %381 {strides = array<i32>} : memref<16x2048xf32, #tpu.memory_space<vmem>>, vector<4x128xf32>,
    %c60_636 = arith.constant 60 : index
    %c0_637 = arith.constant 0 : index
    %383 = tpu.strided_load %arg7[%c60_636, %c0_637] {strides = array<i32: 2, 1>} : memref<100x128xf32, #tpu.memory_space<vmem>>, vector<4x128xf32>
    %c12_638 = arith.constant 12 : index
    %c0_639 = arith.constant 0 : index
    %384 = vector.load %arg10[%c12_638, %c0_639] : memref<16x2048xf32, #tpu.memory_space<vmem>>, vector<4x128xf32>
    tpu.vector_store %arg10[%c12_638, %c0_639], %383 {strides = array<i32>} : memref<16x2048xf32, #tpu.memory_space<vmem>>, vector<4x128xf32>,
    %c61_640 = arith.constant 61 : index
    %c0_641 = arith.constant 0 : index
    %385 = tpu.strided_load %arg7[%c61_640, %c0_641] {strides = array<i32: 2, 1>} : memref<100x128xf32, #tpu.memory_space<vmem>>, vector<4x128xf32>
    %c12_642 = arith.constant 12 : index
    %c128_643 = arith.constant 128 : index
    %386 = vector.load %arg10[%c12_642, %c128_643] : memref<16x2048xf32, #tpu.memory_space<vmem>>, vector<4x128xf32>
    tpu.vector_store %arg10[%c12_642, %c128_643], %385 {strides = array<i32>} : memref<16x2048xf32, #tpu.memory_space<vmem>>, vector<4x128xf32>,
    %c62_644 = arith.constant 62 : index
    %c0_645 = arith.constant 0 : index
    %387 = tpu.strided_load %arg7[%c62_644, %c0_645] {strides = array<i32: 2, 1>} : memref<100x128xf32, #tpu.memory_space<vmem>>, vector<4x128xf32>
    %c12_646 = arith.constant 12 : index
    %c256_647 = arith.constant 256 : index
    %388 = vector.load %arg10[%c12_646, %c256_647] : memref<16x2048xf32, #tpu.memory_space<vmem>>, vector<4x128xf32>
    tpu.vector_store %arg10[%c12_646, %c256_647], %387 {strides = array<i32>} : memref<16x2048xf32, #tpu.memory_space<vmem>>, vector<4x128xf32>,
    %c63_648 = arith.constant 63 : index
    %c0_649 = arith.constant 0 : index
    %389 = tpu.strided_load %arg7[%c63_648, %c0_649] {strides = array<i32: 2, 1>} : memref<100x128xf32, #tpu.memory_space<vmem>>, vector<4x128xf32>
    %c12_650 = arith.constant 12 : index
    %c384_651 = arith.constant 384 : index
    %390 = vector.load %arg10[%c12_650, %c384_651] : memref<16x2048xf32, #tpu.memory_space<vmem>>, vector<4x128xf32>
    tpu.vector_store %arg10[%c12_650, %c384_651], %389 {strides = array<i32>} : memref<16x2048xf32, #tpu.memory_space<vmem>>, vector<4x128xf32>,
    %c70_652 = arith.constant 70 : index
    %c0_653 = arith.constant 0 : index
    %391 = tpu.strided_load %arg7[%c70_652, %c0_653] {strides = array<i32: 2, 1>} : memref<100x128xf32, #tpu.memory_space<vmem>>, vector<4x128xf32>
    %c12_654 = arith.constant 12 : index
    %c512_655 = arith.constant 512 : index
    %392 = vector.load %arg10[%c12_654, %c512_655] : memref<16x2048xf32, #tpu.memory_space<vmem>>, vector<4x128xf32>
    tpu.vector_store %arg10[%c12_654, %c512_655], %391 {strides = array<i32>} : memref<16x2048xf32, #tpu.memory_space<vmem>>, vector<4x128xf32>,
    %c71_656 = arith.constant 71 : index
    %c0_657 = arith.constant 0 : index
    %393 = tpu.strided_load %arg7[%c71_656, %c0_657] {strides = array<i32: 2, 1>} : memref<100x128xf32, #tpu.memory_space<vmem>>, vector<4x128xf32>
    %c12_658 = arith.constant 12 : index
    %c640_659 = arith.constant 640 : index
    %394 = vector.load %arg10[%c12_658, %c640_659] : memref<16x2048xf32, #tpu.memory_space<vmem>>, vector<4x128xf32>
    tpu.vector_store %arg10[%c12_658, %c640_659], %393 {strides = array<i32>} : memref<16x2048xf32, #tpu.memory_space<vmem>>, vector<4x128xf32>,
    %c72_660 = arith.constant 72 : index
    %c0_661 = arith.constant 0 : index
    %395 = tpu.strided_load %arg7[%c72_660, %c0_661] {strides = array<i32: 2, 1>} : memref<100x128xf32, #tpu.memory_space<vmem>>, vector<4x128xf32>
    %c12_662 = arith.constant 12 : index
    %c768_663 = arith.constant 768 : index
    %396 = vector.load %arg10[%c12_662, %c768_663] : memref<16x2048xf32, #tpu.memory_space<vmem>>, vector<4x128xf32>
    tpu.vector_store %arg10[%c12_662, %c768_663], %395 {strides = array<i32>} : memref<16x2048xf32, #tpu.memory_space<vmem>>, vector<4x128xf32>,
    %c73_664 = arith.constant 73 : index
    %c0_665 = arith.constant 0 : index
    %397 = tpu.strided_load %arg7[%c73_664, %c0_665] {strides = array<i32: 2, 1>} : memref<100x128xf32, #tpu.memory_space<vmem>>, vector<4x128xf32>
    %c12_666 = arith.constant 12 : index
    %c896_667 = arith.constant 896 : index
    %398 = vector.load %arg10[%c12_666, %c896_667] : memref<16x2048xf32, #tpu.memory_space<vmem>>, vector<4x128xf32>
    tpu.vector_store %arg10[%c12_666, %c896_667], %397 {strides = array<i32>} : memref<16x2048xf32, #tpu.memory_space<vmem>>, vector<4x128xf32>,
    %c80 = arith.constant 80 : index
    %c0_668 = arith.constant 0 : index
    %399 = tpu.strided_load %arg7[%c80, %c0_668] {strides = array<i32: 2, 1>} : memref<100x128xf32, #tpu.memory_space<vmem>>, vector<4x128xf32>
    %c12_669 = arith.constant 12 : index
    %c1024_670 = arith.constant 1024 : index
    %400 = vector.load %arg10[%c12_669, %c1024_670] : memref<16x2048xf32, #tpu.memory_space<vmem>>, vector<4x128xf32>
    tpu.vector_store %arg10[%c12_669, %c1024_670], %399 {strides = array<i32>} : memref<16x2048xf32, #tpu.memory_space<vmem>>, vector<4x128xf32>,
    %c81_671 = arith.constant 81 : index
    %c0_672 = arith.constant 0 : index
    %401 = tpu.strided_load %arg7[%c81_671, %c0_672] {strides = array<i32: 2, 1>} : memref<100x128xf32, #tpu.memory_space<vmem>>, vector<4x128xf32>
    %c12_673 = arith.constant 12 : index
    %c1152_674 = arith.constant 1152 : index
    %402 = vector.load %arg10[%c12_673, %c1152_674] : memref<16x2048xf32, #tpu.memory_space<vmem>>, vector<4x128xf32>
    tpu.vector_store %arg10[%c12_673, %c1152_674], %401 {strides = array<i32>} : memref<16x2048xf32, #tpu.memory_space<vmem>>, vector<4x128xf32>,
    %c82 = arith.constant 82 : index
    %c0_675 = arith.constant 0 : index
    %403 = tpu.strided_load %arg7[%c82, %c0_675] {strides = array<i32: 2, 1>} : memref<100x128xf32, #tpu.memory_space<vmem>>, vector<4x128xf32>
    %c12_676 = arith.constant 12 : index
    %c1280_677 = arith.constant 1280 : index
    %404 = vector.load %arg10[%c12_676, %c1280_677] : memref<16x2048xf32, #tpu.memory_space<vmem>>, vector<4x128xf32>
    tpu.vector_store %arg10[%c12_676, %c1280_677], %403 {strides = array<i32>} : memref<16x2048xf32, #tpu.memory_space<vmem>>, vector<4x128xf32>,
    %c83 = arith.constant 83 : index
    %c0_678 = arith.constant 0 : index
    %405 = tpu.strided_load %arg7[%c83, %c0_678] {strides = array<i32: 2, 1>} : memref<100x128xf32, #tpu.memory_space<vmem>>, vector<4x128xf32>
    %c12_679 = arith.constant 12 : index
    %c1408_680 = arith.constant 1408 : index
    %406 = vector.load %arg10[%c12_679, %c1408_680] : memref<16x2048xf32, #tpu.memory_space<vmem>>, vector<4x128xf32>
    tpu.vector_store %arg10[%c12_679, %c1408_680], %405 {strides = array<i32>} : memref<16x2048xf32, #tpu.memory_space<vmem>>, vector<4x128xf32>,
    %c90_681 = arith.constant 90 : index
    %c0_682 = arith.constant 0 : index
    %407 = tpu.strided_load %arg7[%c90_681, %c0_682] {strides = array<i32: 2, 1>} : memref<100x128xf32, #tpu.memory_space<vmem>>, vector<4x128xf32>
    %c12_683 = arith.constant 12 : index
    %c1536_684 = arith.constant 1536 : index
    %408 = vector.load %arg10[%c12_683, %c1536_684] : memref<16x2048xf32, #tpu.memory_space<vmem>>, vector<4x128xf32>
    tpu.vector_store %arg10[%c12_683, %c1536_684], %407 {strides = array<i32>} : memref<16x2048xf32, #tpu.memory_space<vmem>>, vector<4x128xf32>,
    %c91_685 = arith.constant 91 : index
    %c0_686 = arith.constant 0 : index
    %409 = tpu.strided_load %arg7[%c91_685, %c0_686] {strides = array<i32: 2, 1>} : memref<100x128xf32, #tpu.memory_space<vmem>>, vector<4x128xf32>
    %c12_687 = arith.constant 12 : index
    %c1664_688 = arith.constant 1664 : index
    %410 = vector.load %arg10[%c12_687, %c1664_688] : memref<16x2048xf32, #tpu.memory_space<vmem>>, vector<4x128xf32>
    tpu.vector_store %arg10[%c12_687, %c1664_688], %409 {strides = array<i32>} : memref<16x2048xf32, #tpu.memory_space<vmem>>, vector<4x128xf32>,
    %c92_689 = arith.constant 92 : index
    %c0_690 = arith.constant 0 : index
    %411 = tpu.strided_load %arg7[%c92_689, %c0_690] {strides = array<i32: 2, 1>} : memref<100x128xf32, #tpu.memory_space<vmem>>, vector<4x128xf32>
    %c12_691 = arith.constant 12 : index
    %c1792_692 = arith.constant 1792 : index
    %412 = vector.load %arg10[%c12_691, %c1792_692] : memref<16x2048xf32, #tpu.memory_space<vmem>>, vector<4x128xf32>
    tpu.vector_store %arg10[%c12_691, %c1792_692], %411 {strides = array<i32>} : memref<16x2048xf32, #tpu.memory_space<vmem>>, vector<4x128xf32>,
    %c93_693 = arith.constant 93 : index
    %c0_694 = arith.constant 0 : index
    %413 = tpu.strided_load %arg7[%c93_693, %c0_694] {strides = array<i32: 2, 1>} : memref<100x128xf32, #tpu.memory_space<vmem>>, vector<4x128xf32>
    %c12_695 = arith.constant 12 : index
    %c1920_696 = arith.constant 1920 : index
    %414 = vector.load %arg10[%c12_695, %c1920_696] : memref<16x2048xf32, #tpu.memory_space<vmem>>, vector<4x128xf32>
    tpu.vector_store %arg10[%c12_695, %c1920_696], %413 {strides = array<i32>} : memref<16x2048xf32, #tpu.memory_space<vmem>>, vector<4x128xf32>,
    %c0_697 = arith.constant 0 : index
    %c0_698 = arith.constant 0 : index
    %415 = vector.load %arg10[%c0_697, %c0_698] : memref<16x2048xf32, #tpu.memory_space<vmem>>, vector<16x2048xf32>
    %416 = arith.truncf %415 : vector<16x2048xf32> to vector<16x2048xbf16>
    %c0_699 = arith.constant 0 : index
    %c0_700 = arith.constant 0 : index
    %417 = vector.load %arg3[%c0_699, %c0_700] : memref<2048x128xbf16, #tpu.memory_space<vmem>>, vector<2048x128xbf16>
    %cst_701 = arith.constant dense<0.000000e+00> : vector<16x128xf32>
    %418 = tpu.matmul %416, %417, %cst_701 {dimension_numbers = #tpu.dot_dimension_numbers<[1], [0], [0], [1], [0, 0, 1, 1], [], []>} : vector<16x2048xbf16>, vector<2048x128xbf16>, vector<16x128xf32> -> vector<16x128xf32>
    %cst_702 = arith.constant 0.000000e+00 : f32
    %419 = vector.broadcast %cst_702 : f32 to vector<16x128xf32>
    %420 = arith.cmpf oge, %418, %419 : vector<16x128xf32>
    %cst_703 = arith.constant 2.000000e-01 : f32
    %421 = vector.broadcast %cst_703 : f32 to vector<16x128xf32>
    %422 = arith.mulf %421, %418 : vector<16x128xf32>
    %423 = arith.select %420, %418, %422 : vector<16x128xi1>, vector<16x128xf32>
    %c0_704 = arith.constant 0 : index
    %c0_705 = arith.constant 0 : index
    %424 = vector.load %arg13[%c0_704, %c0_705] : memref<16x128xf32, #tpu.memory_space<vmem>>, vector<16x128xf32>
    tpu.vector_store %arg13[%c0_704, %c0_705], %423 {strides = array<i32>} : memref<16x128xf32, #tpu.memory_space<vmem>>, vector<16x128xf32>,
    %cst_706 = arith.constant 0.000000e+00 : f32
    %425 = vector.broadcast %cst_706 : f32 to vector<16x128xf32>
    %c0_707 = arith.constant 0 : index
    %c0_708 = arith.constant 0 : index
    %426 = vector.load %arg8[%c0_707, %c0_708] : memref<16x128xf32, #tpu.memory_space<vmem>>, vector<16x128xf32>
    tpu.vector_store %arg8[%c0_707, %c0_708], %425 {strides = array<i32>} : memref<16x128xf32, #tpu.memory_space<vmem>>, vector<16x128xf32>,
    %c0_709 = arith.constant 0 : index
    %c0_710 = arith.constant 0 : index
    %427 = vector.load %arg13[%c0_709, %c0_710] : memref<16x128xf32, #tpu.memory_space<vmem>>, vector<4x128xf32>
    %c0_711 = arith.constant 0 : index
    %c0_712 = arith.constant 0 : index
    %428 = vector.load %arg8[%c0_711, %c0_712] : memref<16x128xf32, #tpu.memory_space<vmem>>, vector<4x128xf32>
    tpu.vector_store %arg8[%c0_711, %c0_712], %427 {strides = array<i32>} : memref<16x128xf32, #tpu.memory_space<vmem>>, vector<4x128xf32>,
    %c4_713 = arith.constant 4 : index
    %c0_714 = arith.constant 0 : index
    %429 = vector.load %arg13[%c4_713, %c0_714] : memref<16x128xf32, #tpu.memory_space<vmem>>, vector<4x128xf32>
    %c4_715 = arith.constant 4 : index
    %c0_716 = arith.constant 0 : index
    %430 = vector.load %arg8[%c4_715, %c0_716] : memref<16x128xf32, #tpu.memory_space<vmem>>, vector<4x128xf32>
    tpu.vector_store %arg8[%c4_715, %c0_716], %429 {strides = array<i32>} : memref<16x128xf32, #tpu.memory_space<vmem>>, vector<4x128xf32>,
    %c8_717 = arith.constant 8 : index
    %c0_718 = arith.constant 0 : index
    %431 = vector.load %arg13[%c8_717, %c0_718] : memref<16x128xf32, #tpu.memory_space<vmem>>, vector<4x128xf32>
    %c8_719 = arith.constant 8 : index
    %c0_720 = arith.constant 0 : index
    %432 = vector.load %arg8[%c8_719, %c0_720] : memref<16x128xf32, #tpu.memory_space<vmem>>, vector<4x128xf32>
    tpu.vector_store %arg8[%c8_719, %c0_720], %431 {strides = array<i32>} : memref<16x128xf32, #tpu.memory_space<vmem>>, vector<4x128xf32>,
    %c12_721 = arith.constant 12 : index
    %c0_722 = arith.constant 0 : index
    %433 = vector.load %arg13[%c12_721, %c0_722] : memref<16x128xf32, #tpu.memory_space<vmem>>, vector<4x128xf32>
    %c12_723 = arith.constant 12 : index
    %c0_724 = arith.constant 0 : index
    %434 = vector.load %arg8[%c12_723, %c0_724] : memref<16x128xf32, #tpu.memory_space<vmem>>, vector<4x128xf32>
    tpu.vector_store %arg8[%c12_723, %c0_724], %433 {strides = array<i32>} : memref<16x128xf32, #tpu.memory_space<vmem>>, vector<4x128xf32>,
    %cst_725 = arith.constant 0.000000e+00 : f32
    %435 = vector.broadcast %cst_725 : f32 to vector<8x2048xf32>
    %c0_726 = arith.constant 0 : index
    %c0_727 = arith.constant 0 : index
    %436 = vector.load %arg11[%c0_726, %c0_727] : memref<8x2048xf32, #tpu.memory_space<vmem>>, vector<8x2048xf32>
    tpu.vector_store %arg11[%c0_726, %c0_727], %435 {strides = array<i32>} : memref<8x2048xf32, #tpu.memory_space<vmem>>, vector<8x2048xf32>,
    %c0_728 = arith.constant 0 : index
    %c0_729 = arith.constant 0 : index
    %437 = vector.load %arg8[%c0_728, %c0_729] : memref<16x128xf32, #tpu.memory_space<vmem>>, vector<1x128xf32>
    %c0_730 = arith.constant 0 : index
    %c0_731 = arith.constant 0 : index
    %438 = vector.load %arg11[%c0_730, %c0_731] : memref<8x2048xf32, #tpu.memory_space<vmem>>, vector<1x128xf32>
    tpu.vector_store %arg11[%c0_730, %c0_731], %437 {strides = array<i32>} : memref<8x2048xf32, #tpu.memory_space<vmem>>, vector<1x128xf32>,
    %c1_732 = arith.constant 1 : index
    %c0_733 = arith.constant 0 : index
    %439 = vector.load %arg8[%c1_732, %c0_733] : memref<16x128xf32, #tpu.memory_space<vmem>>, vector<1x128xf32>
    %c0_734 = arith.constant 0 : index
    %c128_735 = arith.constant 128 : index
    %440 = vector.load %arg11[%c0_734, %c128_735] : memref<8x2048xf32, #tpu.memory_space<vmem>>, vector<1x128xf32>
    tpu.vector_store %arg11[%c0_734, %c128_735], %439 {strides = array<i32>} : memref<8x2048xf32, #tpu.memory_space<vmem>>, vector<1x128xf32>,
    %c2_736 = arith.constant 2 : index
    %c0_737 = arith.constant 0 : index
    %441 = vector.load %arg8[%c2_736, %c0_737] : memref<16x128xf32, #tpu.memory_space<vmem>>, vector<1x128xf32>
    %c0_738 = arith.constant 0 : index
    %c256_739 = arith.constant 256 : index
    %442 = vector.load %arg11[%c0_738, %c256_739] : memref<8x2048xf32, #tpu.memory_space<vmem>>, vector<1x128xf32>
    tpu.vector_store %arg11[%c0_738, %c256_739], %441 {strides = array<i32>} : memref<8x2048xf32, #tpu.memory_space<vmem>>, vector<1x128xf32>,
    %c3_740 = arith.constant 3 : index
    %c0_741 = arith.constant 0 : index
    %443 = vector.load %arg8[%c3_740, %c0_741] : memref<16x128xf32, #tpu.memory_space<vmem>>, vector<1x128xf32>
    %c0_742 = arith.constant 0 : index
    %c384_743 = arith.constant 384 : index
    %444 = vector.load %arg11[%c0_742, %c384_743] : memref<8x2048xf32, #tpu.memory_space<vmem>>, vector<1x128xf32>
    tpu.vector_store %arg11[%c0_742, %c384_743], %443 {strides = array<i32>} : memref<8x2048xf32, #tpu.memory_space<vmem>>, vector<1x128xf32>,
    %c4_744 = arith.constant 4 : index
    %c0_745 = arith.constant 0 : index
    %445 = vector.load %arg8[%c4_744, %c0_745] : memref<16x128xf32, #tpu.memory_space<vmem>>, vector<1x128xf32>
    %c0_746 = arith.constant 0 : index
    %c512_747 = arith.constant 512 : index
    %446 = vector.load %arg11[%c0_746, %c512_747] : memref<8x2048xf32, #tpu.memory_space<vmem>>, vector<1x128xf32>
    tpu.vector_store %arg11[%c0_746, %c512_747], %445 {strides = array<i32>} : memref<8x2048xf32, #tpu.memory_space<vmem>>, vector<1x128xf32>,
    %c5 = arith.constant 5 : index
    %c0_748 = arith.constant 0 : index
    %447 = vector.load %arg8[%c5, %c0_748] : memref<16x128xf32, #tpu.memory_space<vmem>>, vector<1x128xf32>
    %c0_749 = arith.constant 0 : index
    %c640_750 = arith.constant 640 : index
    %448 = vector.load %arg11[%c0_749, %c640_750] : memref<8x2048xf32, #tpu.memory_space<vmem>>, vector<1x128xf32>
    tpu.vector_store %arg11[%c0_749, %c640_750], %447 {strides = array<i32>} : memref<8x2048xf32, #tpu.memory_space<vmem>>, vector<1x128xf32>,
    %c6 = arith.constant 6 : index
    %c0_751 = arith.constant 0 : index
    %449 = vector.load %arg8[%c6, %c0_751] : memref<16x128xf32, #tpu.memory_space<vmem>>, vector<1x128xf32>
    %c0_752 = arith.constant 0 : index
    %c768_753 = arith.constant 768 : index
    %450 = vector.load %arg11[%c0_752, %c768_753] : memref<8x2048xf32, #tpu.memory_space<vmem>>, vector<1x128xf32>
    tpu.vector_store %arg11[%c0_752, %c768_753], %449 {strides = array<i32>} : memref<8x2048xf32, #tpu.memory_space<vmem>>, vector<1x128xf32>,
    %c7 = arith.constant 7 : index
    %c0_754 = arith.constant 0 : index
    %451 = vector.load %arg8[%c7, %c0_754] : memref<16x128xf32, #tpu.memory_space<vmem>>, vector<1x128xf32>
    %c0_755 = arith.constant 0 : index
    %c896_756 = arith.constant 896 : index
    %452 = vector.load %arg11[%c0_755, %c896_756] : memref<8x2048xf32, #tpu.memory_space<vmem>>, vector<1x128xf32>
    tpu.vector_store %arg11[%c0_755, %c896_756], %451 {strides = array<i32>} : memref<8x2048xf32, #tpu.memory_space<vmem>>, vector<1x128xf32>,
    %c8_757 = arith.constant 8 : index
    %c0_758 = arith.constant 0 : index
    %453 = vector.load %arg8[%c8_757, %c0_758] : memref<16x128xf32, #tpu.memory_space<vmem>>, vector<1x128xf32>
    %c0_759 = arith.constant 0 : index
    %c1024_760 = arith.constant 1024 : index
    %454 = vector.load %arg11[%c0_759, %c1024_760] : memref<8x2048xf32, #tpu.memory_space<vmem>>, vector<1x128xf32>
    tpu.vector_store %arg11[%c0_759, %c1024_760], %453 {strides = array<i32>} : memref<8x2048xf32, #tpu.memory_space<vmem>>, vector<1x128xf32>,
    %c9 = arith.constant 9 : index
    %c0_761 = arith.constant 0 : index
    %455 = vector.load %arg8[%c9, %c0_761] : memref<16x128xf32, #tpu.memory_space<vmem>>, vector<1x128xf32>
    %c0_762 = arith.constant 0 : index
    %c1152_763 = arith.constant 1152 : index
    %456 = vector.load %arg11[%c0_762, %c1152_763] : memref<8x2048xf32, #tpu.memory_space<vmem>>, vector<1x128xf32>
    tpu.vector_store %arg11[%c0_762, %c1152_763], %455 {strides = array<i32>} : memref<8x2048xf32, #tpu.memory_space<vmem>>, vector<1x128xf32>,
    %c10_764 = arith.constant 10 : index
    %c0_765 = arith.constant 0 : index
    %457 = vector.load %arg8[%c10_764, %c0_765] : memref<16x128xf32, #tpu.memory_space<vmem>>, vector<1x128xf32>
    %c0_766 = arith.constant 0 : index
    %c1280_767 = arith.constant 1280 : index
    %458 = vector.load %arg11[%c0_766, %c1280_767] : memref<8x2048xf32, #tpu.memory_space<vmem>>, vector<1x128xf32>
    tpu.vector_store %arg11[%c0_766, %c1280_767], %457 {strides = array<i32>} : memref<8x2048xf32, #tpu.memory_space<vmem>>, vector<1x128xf32>,
    %c11_768 = arith.constant 11 : index
    %c0_769 = arith.constant 0 : index
    %459 = vector.load %arg8[%c11_768, %c0_769] : memref<16x128xf32, #tpu.memory_space<vmem>>, vector<1x128xf32>
    %c0_770 = arith.constant 0 : index
    %c1408_771 = arith.constant 1408 : index
    %460 = vector.load %arg11[%c0_770, %c1408_771] : memref<8x2048xf32, #tpu.memory_space<vmem>>, vector<1x128xf32>
    tpu.vector_store %arg11[%c0_770, %c1408_771], %459 {strides = array<i32>} : memref<8x2048xf32, #tpu.memory_space<vmem>>, vector<1x128xf32>,
    %c12_772 = arith.constant 12 : index
    %c0_773 = arith.constant 0 : index
    %461 = vector.load %arg8[%c12_772, %c0_773] : memref<16x128xf32, #tpu.memory_space<vmem>>, vector<1x128xf32>
    %c0_774 = arith.constant 0 : index
    %c1536_775 = arith.constant 1536 : index
    %462 = vector.load %arg11[%c0_774, %c1536_775] : memref<8x2048xf32, #tpu.memory_space<vmem>>, vector<1x128xf32>
    tpu.vector_store %arg11[%c0_774, %c1536_775], %461 {strides = array<i32>} : memref<8x2048xf32, #tpu.memory_space<vmem>>, vector<1x128xf32>,
    %c13_776 = arith.constant 13 : index
    %c0_777 = arith.constant 0 : index
    %463 = vector.load %arg8[%c13_776, %c0_777] : memref<16x128xf32, #tpu.memory_space<vmem>>, vector<1x128xf32>
    %c0_778 = arith.constant 0 : index
    %c1664_779 = arith.constant 1664 : index
    %464 = vector.load %arg11[%c0_778, %c1664_779] : memref<8x2048xf32, #tpu.memory_space<vmem>>, vector<1x128xf32>
    tpu.vector_store %arg11[%c0_778, %c1664_779], %463 {strides = array<i32>} : memref<8x2048xf32, #tpu.memory_space<vmem>>, vector<1x128xf32>,
    %c14 = arith.constant 14 : index
    %c0_780 = arith.constant 0 : index
    %465 = vector.load %arg8[%c14, %c0_780] : memref<16x128xf32, #tpu.memory_space<vmem>>, vector<1x128xf32>
    %c0_781 = arith.constant 0 : index
    %c1792_782 = arith.constant 1792 : index
    %466 = vector.load %arg11[%c0_781, %c1792_782] : memref<8x2048xf32, #tpu.memory_space<vmem>>, vector<1x128xf32>
    tpu.vector_store %arg11[%c0_781, %c1792_782], %465 {strides = array<i32>} : memref<8x2048xf32, #tpu.memory_space<vmem>>, vector<1x128xf32>,
    %c15 = arith.constant 15 : index
    %c0_783 = arith.constant 0 : index
    %467 = vector.load %arg8[%c15, %c0_783] : memref<16x128xf32, #tpu.memory_space<vmem>>, vector<1x128xf32>
    %c0_784 = arith.constant 0 : index
    %c1920_785 = arith.constant 1920 : index
    %468 = vector.load %arg11[%c0_784, %c1920_785] : memref<8x2048xf32, #tpu.memory_space<vmem>>, vector<1x128xf32>
    tpu.vector_store %arg11[%c0_784, %c1920_785], %467 {strides = array<i32>} : memref<8x2048xf32, #tpu.memory_space<vmem>>, vector<1x128xf32>,
    %c0_786 = arith.constant 0 : index
    %c0_787 = arith.constant 0 : index
    %469 = vector.load %arg11[%c0_786, %c0_787] : memref<8x2048xf32, #tpu.memory_space<vmem>>, vector<8x2048xf32>
    %470 = arith.truncf %469 : vector<8x2048xf32> to vector<8x2048xbf16>
    %c0_788 = arith.constant 0 : index
    %c0_789 = arith.constant 0 : index
    %471 = vector.load %arg4[%c0_788, %c0_789] : memref<2048x128xbf16, #tpu.memory_space<vmem>>, vector<2048x128xbf16>
    %cst_790 = arith.constant dense<0.000000e+00> : vector<8x128xf32>
    %472 = tpu.matmul %470, %471, %cst_790 {dimension_numbers = #tpu.dot_dimension_numbers<[1], [0], [0], [1], [0, 0, 1, 1], [], []>} : vector<8x2048xbf16>, vector<2048x128xbf16>, vector<8x128xf32> -> vector<8x128xf32>
    %c0_791 = arith.constant 0 : index
    %c0_792 = arith.constant 0 : index
    %c0_793 = arith.constant 0 : index
    %473 = vector.load %arg5[%c0_791, %c0_792, %c0_793] : memref<1x8x128xf32, #tpu.memory_space<vmem>>, vector<1x8x128xf32>
    %474 = vector.shape_cast %473 : vector<1x8x128xf32> to vector<8x128xf32>
    %475 = vector.shape_cast %472 : vector<8x128xf32> to vector<1x8x128xf32>
    tpu.vector_store %arg5[%c0_791, %c0_792, %c0_793], %475 {strides = array<i32>} : memref<1x8x128xf32, #tpu.memory_space<vmem>>, vector<1x8x128xf32>,
    return
  }
  func.func @transform_0(%arg0: i32) -> (i32, i32, i32) {
    %c0_i32 = arith.constant 0 : i32
    %c0_i32_0 = arith.constant 0 : i32
    %c0_i32_1 = arith.constant 0 : i32
    return %arg0, %c0_i32, %c0_i32_0 : i32, i32, i32
  }
  func.func @transform_1(%arg0: i32) -> (i32, i32) {
    %c0_i32 = arith.constant 0 : i32
    %c0_i32_0 = arith.constant 0 : i32
    %c0_i32_1 = arith.constant 0 : i32
    return %c0_i32, %c0_i32_0 : i32, i32
  }
  func.func @transform_2(%arg0: i32) -> (i32, i32) {
    %c0_i32 = arith.constant 0 : i32
    %c0_i32_0 = arith.constant 0 : i32
    %c0_i32_1 = arith.constant 0 : i32
    return %c0_i32, %c0_i32_0 : i32, i32
  }
  func.func @transform_3(%arg0: i32) -> (i32, i32) {
    %c0_i32 = arith.constant 0 : i32
    %c0_i32_0 = arith.constant 0 : i32
    %c0_i32_1 = arith.constant 0 : i32
    return %c0_i32, %c0_i32_0 : i32, i32
  }
  func.func @transform_4(%arg0: i32) -> (i32, i32, i32) {
    %c0_i32 = arith.constant 0 : i32
    %c0_i32_0 = arith.constant 0 : i32
    %c0_i32_1 = arith.constant 0 : i32
    return %arg0, %c0_i32, %c0_i32_0 : i32, i32, i32
  }
}

</mosaic_0001>

<bundles_post_ra>
// kernel: tpu_custom_call.1
= control target key start
LH: loop header
LB: loop body
LE: loop exit
PB: predicated region body
PF: predicated region fallthrough
CT: control target
= control target key end

     0   :  { %9 = vsyncpa [#allocation11], 0  ;;  %s7976_s0 = inlined_call_operand.vmem [shape: f32[2,324,128], index: 0, kind: input, shape index: {}]   ;;  %s7977_s1 = inlined_call_operand.vmem [shape: bf16[2048,128], index: 1, kind: input, shape index: {}]   ;;  %s7978_s2 = inlined_call_operand.hbm [shape: bf16[2048,128], index: 2, kind: input, shape index: {}]   ;;  %s7979_s3 = inlined_call_operand.hbm [shape: bf16[2048,128], index: 3, kind: input, shape index: {}]   ;;  %s7980_s4 = inlined_call_operand.hbm [shape: f32[2,8,128], index: 4, kind: output, shape index: {}]  }
   0x1   :  { %10 = vsyncpa [#allocation14], 0 }
   0x2   :  { %11 = vsyncpa [#allocation12], 0 }
   0x3   :  { %13 = vsyncpa [#allocation12 + $0x1], 0  ;;  %s7311_s15 = smov 0   ;;  %s7313_s16 = smov 0  }
   0x4   :  { %s7315_s17 = smov 0   ;;  %s7317_s18 = smov 0  }
   0x5 LB: > { %s7332_s19 = sadd.s32 4294967295, %s7278_s18   ;;  %s5634_s20 = sadd.s32 4294967294, %s7278_s18   ;;  %s7278_s18 = sphi %s7317_s18, %s7998_s18   ;;  %s7274_s17 = sphi %s7315_s17, %s7997_s17   ;;  %s7270_s16 = sphi %s7313_s16, %s7996_s16   ;;  %s7266_s15 = sphi %s7311_s15, %s7995_s15  }
   0x6   : > { %s7336_s21 = sadd.s32 1, %s7278_s18   ;;  %s115_s22 = sadd.s32 1, %s7274_s17 }
   0x7   : > { %s112_s23 = ssub.s32 %s7278_s18, %s7336_s21  ;;  %p125_p0 = scmp.ne.s32.totalorder %s7274_s17, %s7270_s16 }
   0x8   : > { %p113_p1 = scmp.eq.s32.totalorder %s112_s23, 0  ;;  %p126_p2 = scmp.eq.s32.totalorder %s7332_s19, 1 }
   0x9   : > { %p131_p3 = scmp.ne.s32.totalorder %s7270_s16, %s7266_s15  ;;  %p132_p4 = scmp.eq.s32.totalorder %s5634_s20, 1 }
   0xa   : > { %s7347_s24 = scalar_select %p113_p1, %s7274_s17, %s115_s22  }
   0xb   : > { %p7349_p5 = por %p126_p2, %p125_p0  ;;  %p7353_p6 = por %p132_p4, %p131_p3 }
   0xc   : > { %p5635_p7 = scmp.ge.s32.totalorder %s7278_s18, 1  ;;  %p139_p8 = scmp.lt.s32.totalorder %s7278_s18, 3 }
   0xd   : > { %s7984_s25 = scalar_select %p7349_p5, 1, 0 }
   0xe   : > { %s7985_s26 = scalar_select %p7353_p6, 1, 0 }
   0xf   : > { %p7981_p9 = scmp.eq.s32.totalorder %s7332_s19, 0  ;;  %p7360_p10 = pnand %p5635_p7, %p139_p8 }
  0x10   : > { %s7280_s28 = smov [#allocation10]   ;;  %s7281_s5 = smov [#allocation13]  }
  0x11   : > { %s7986_s27 = scalar_select %p7360_p10, 1, 0 }
  0x12   : > { %s154_s29 = sshll.u32 %s7280_s28, 4  ;;  %p6715_p11 = pneg %p7360_p10  ;;  %s155_s29 = int_to_ptr.vmem [resolvable:$true] %s154_s29 }
  0x13   : > { %s167_s6 = sshll.u32 %s7281_s5, 4  ;;  %s7152_s9 = scalar_lea.hbm %s7978_s2, 16384  ;;  %s7372_s6 = int_to_ptr.vmem [resolvable:$true] %s167_s6 }
  0x14   : > { %p7368_p12 = pnand %p7981_p9, %p6715_p11  ;;  %p7153_p13 = scmp.ne.s32.totalorder %s7978_s2, %s7152_s9 }
  0x15   : > { %p7159_p3 = scmp.lt.u32.totalorder %s7152_s9, %s7978_s2 }
  0x16   : > { %p7154_p0 = pneg %p7368_p12 }
  0x18   : > { %p7155_p1 = pnand %p7154_p0, %p7153_p13 }
  0x1a   : > { %p7156_p2 = pneg %p7155_p1 }
  0x1c   : > { %p7161_p4 = pnand %p7159_p3, %p7156_p2 }
  0x1e   : > { %7164 = shalt.err (!%p7161_p4)
}
  0x1f   : > { %s7165_s14 = scalar_lea.vmem %s155_s29, 16384  ;;  %p7173_p9 = scmp.lt.s32.totalorder %s155_s29, %s155_s29 }
  0x20   : > { %p7166_p7 = scmp.ne.s32.totalorder %s155_s29, %s7165_s14  ;;  %p7174_p6 = scmp.lt.s32.totalorder %s7165_s14, %s7165_s14 }
  0x22   : > { %p7168_p8 = pnand %p7166_p7, %p7154_p0  ;;  %p7175_p5 = por %p7174_p6, %p7173_p9 }
  0x24   : > { %p7169_p11 = pneg %p7168_p8 }
  0x26   : > { %p7176_p10 = pnand %p7175_p5, %p7169_p11 }
  0x28   : > { %7179 = shalt.err (!%p7176_p10)
}
  0x29   : > { %s7282_s20 = smov 64   ;;  %s7283_s22 = smov 4  }
  0x2a   : > { %6718 = dma.hbm_to_vmem [thread:$0]  (!%p7368_p12), %s7978_s2, 16384, %s155_s29, [#allocation11], %s7282_s20, %s7282_s20, %s7283_s22  }
  0x2b   : > { %s7180_s8 = scalar_lea.hbm %s7979_s3, 16384 }
  0x2c   : > { %p7181_p13 = scmp.ne.s32.totalorder %s7979_s3, %s7180_s8  ;;  %p7187_p9 = scmp.lt.u32.totalorder %s7180_s8, %s7979_s3 }
  0x2e   : > { %p7183_p5 = pnand %p7181_p13, %p7154_p0 }
  0x30   : > { %p7184_p6 = pneg %p7183_p5 }
  0x32   : > { %p7189_p10 = pnand %p7187_p9, %p7184_p6 }
  0x34   : > { %7192 = shalt.err (!%p7189_p10)
}
  0x35   : > { %s7193_s29 = scalar_lea.vmem %s7372_s6, 16384  ;;  %p7201_p4 = scmp.lt.s32.totalorder %s7372_s6, %s7372_s6 }
  0x36   : > { %p7194_p1 = scmp.ne.s32.totalorder %s7372_s6, %s7193_s29  ;;  %p7202_p7 = scmp.lt.s32.totalorder %s7193_s29, %s7193_s29 }
  0x38   : > { %p7196_p2 = pnand %p7194_p1, %p7154_p0  ;;  %p7203_p8 = por %p7202_p7, %p7201_p4 }
  0x3a   : > { %p7197_p3 = pneg %p7196_p2 }
  0x3c   : > { %p7204_p11 = pnand %p7203_p8, %p7197_p3 }
  0x3e   : > { %7207 = shalt.err (!%p7204_p11)
}
  0x3f   : > { %6721 = dma.hbm_to_vmem [thread:$0]  (!%p7368_p12), %s7979_s3, 16384, %s7372_s6, [#allocation14], %s7282_s20, %s7282_s20, %s7283_s22  }
  0x40   : > { %p7988_p13 = scmp.ne.s32.totalorder %s7986_s27, 0 }
  0x41   : > { %p7989_p5 = scmp.eq.s32.totalorder (!%p7988_p13), %s7332_s19, 0 }
  0x42   : > { %191 = sbr.rel (%p7988_p13) target bundleno = 1153 (0x481), region = 36 }
  0x49   : > { %7253 = dma.done.wait (%p7989_p5), [#allocation11], 16384   ;;  %p7990_p0 = pmov %p7989_p5 }
  0x4b   : > { %7255 = vsyncadd (%p7990_p0), [#allocation11], 4294950912  ;;  %p7991_p6 = pmov %p7990_p0 }
  0x4c   : > { %p7992_p9 = pmov %p7990_p0 }
  0x4d   : > { %7257 = dma.done.wait (%p7991_p6), [#allocation14], 16384  }
  0x4e   : > { %7259 = vsyncadd (%p7992_p9), [#allocation14], 4294950912  ;;  %v6768_v0 = vld [vmem:[%s7977_s1 + $0x40] sm:$0xff]   ;;  %v6772_v4 = vld [vmem:[%s7977_s1 + $0x48] sm:$0xff]   ;;  %p221_p12 = scmp.lt.s32.totalorder %s7332_s19, 1  ;;  %p7993_p1 = scmp.ne.s32.totalorder %s7984_s25, 0 }
  0x4f   : > { %v6769_v1 = vld [vmem:[%s7977_s1 + $0xc0] sm:$0xff]   ;;  %6032 = vmatprep.subr.bf16.mxu0 %v6768_v0  ;;  %v6773_v5 = vld [vmem:[%s7977_s1 + $0xc8] sm:$0xff]   ;;  %v6776_v8 = vld [vmem:[%s7977_s1 + $0x50] sm:$0xff]  }
  0x50   : > { %v6770_v2 = vld [vmem:[%s7977_s1] sm:$0xff]   ;;  %6072 = vmatprep.subr.bf16.mxu1 %v6769_v1  ;;  %v6774_v6 = vld [vmem:[%s7977_s1 + $0x8] sm:$0xff]   ;;  %v6777_v9 = vld [vmem:[%s7977_s1 + $0xd0] sm:$0xff]   ;;  %s222_s9 = scalar_select %p221_p12, %s7332_s19, 1 }
  0x51   : > { %v6771_v3 = vld [vmem:[%s7977_s1 + $0x80] sm:$0xff]   ;;  %6033 = vmatpush3.bf16.msra.mxu0 %v6770_v2  ;;  %v6775_v7 = vld [vmem:[%s7977_s1 + $0x88] sm:$0xff]   ;;  %v6778_v10 = vld [vmem:[%s7977_s1 + $0x10] sm:$0xff]  }
  0x52   : > { %6073 = vmatpush3.bf16.msra.mxu1 %v6771_v3  ;;  %6034 = vmatprep.subr.bf16.mxu0 %v6772_v4  ;;  %v6779_v11 = vld [vmem:[%s7977_s1 + $0x90] sm:$0xff]   ;;  %v6780_v12 = vld [vmem:[%s7977_s1 + $0x58] sm:$0xff]   ;;  %v6784_v16 = vld [vmem:[%s7977_s1 + $0x60] sm:$0xff]   ;;  %s6704_s6 = smul.u32 328, %s222_s9 }
  0x53   : > { %6074 = vmatprep.subr.bf16.mxu1 %v6773_v5  ;;  %v6781_v13 = vld [vmem:[%s7977_s1 + $0xd8] sm:$0xff]   ;;  %v6785_v17 = vld [vmem:[%s7977_s1 + $0xe0] sm:$0xff]   ;;  %v6788_v20 = vld [vmem:[%s7977_s1 + $0x68] sm:$0xff]  }
  0x54   : > { %v6782_v14 = vld [vmem:[%s7977_s1 + $0x18] sm:$0xff]   ;;  %v6786_v18 = vld [vmem:[%s7977_s1 + $0x20] sm:$0xff]   ;;  %v6789_v21 = vld [vmem:[%s7977_s1 + $0xe8] sm:$0xff]   ;;  %s7526_s12 = scalar_lea.vmem %s7976_s0, %s6704_s6  ;;  %s6029_s6 = sshll.u32 %s7332_s19, 7 }
  0x55   : > { %6035 = vmatpush3.bf16.msra.mxu0 %v6774_v6  ;;  %v6783_v15 = vld [vmem:[%s7977_s1 + $0x98] sm:$0xff]   ;;  %v6787_v19 = vld [vmem:[%s7977_s1 + $0xa0] sm:$0xff]   ;;  %v6790_v22 = vld [vmem:[%s7977_s1 + $0x28] sm:$0xff]   ;;  %s7934_s5 = scalar_lea.hbm %s7980_s4, %s6029_s6  ;;  %s7285_s19 = smov [#allocation15]  }
  0x56   : > { %6075 = vmatpush3.bf16.msra.mxu1 %v6775_v7  ;;  %6036 = vmatprep.subr.bf16.mxu0 %v6776_v8  ;;  %v6791_v23 = vld [vmem:[%s7977_s1 + $0xa8] sm:$0xff]   ;;  %v6792_v24 = vld [vmem:[%s7977_s1 + $0x70] sm:$0xff]   ;;  %v6796_v28 = vld [vmem:[%s7977_s1 + $0x78] sm:$0xff]   ;;  %s7212_s10 = sshll.u32 %s7285_s19, 4  ;;  %s7213_s10 = int_to_ptr.vmem [resolvable:$false] %s7212_s10 }
  0x57   : > { %6076 = vmatprep.subr.bf16.mxu1 %v6777_v9  ;;  %v6793_v25 = vld [vmem:[%s7977_s1 + $0xf0] sm:$0xff]   ;;  %v6797_v29 = vld [vmem:[%s7977_s1 + $0xf8] sm:$0xff]   ;;  %v227_v32 = vld [vmem:[%s7526_s12] sm:$0xff]  ;;  %s7214_s9 = scalar_lea.vmem %s7213_s10, 256 }
  0x58   : > { %v6794_v26 = vld [vmem:[%s7977_s1 + $0x30] sm:$0xff]   ;;  %v6798_v30 = vld [vmem:[%s7977_s1 + $0x38] sm:$0xff]   ;;  %v228_v33 = vld [vmem:[%s7526_s12 + $0x8] sm:$0xff]  ;;  %268 = vst [vmem:[#allocation2] sm:$0xff] %v227_v32 }
  0x59   : > { %6037 = vmatpush3.bf16.msra.mxu0 %v6778_v10  ;;  %v6795_v27 = vld [vmem:[%s7977_s1 + $0xb0] sm:$0xff]   ;;  %v6799_v31 = vld [vmem:[%s7977_s1 + $0xb8] sm:$0xff]   ;;  %v231_v34 = vld [vmem:[%s7526_s12 + $0x20] sm:$0xff]  ;;  %269 = vst [vmem:[#allocation2 + $0x8] sm:$0xff] %v228_v33 }
  0x5a   : > { %6077 = vmatpush3.bf16.msra.mxu1 %v6779_v11  ;;  %6038 = vmatprep.subr.bf16.mxu0 %v6780_v12  ;;  %v232_v35 = vld [vmem:[%s7526_s12 + $0x28] sm:$0xff]  ;;  %v233_v36 = vld [vmem:[%s7526_s12 + $0x30] sm:$0xff]  ;;  %272 = vst [vmem:[#allocation2 + $0x20] sm:$0xff] %v231_v34  ;;  %v6800_v38 = vld [vmem:[%s7977_s1 + $0x140] sm:$0xff]  }
  0x5b   : > { %6078 = vmatprep.subr.bf16.mxu1 %v6781_v13  ;;  %v229_v37 = vld [vmem:[%s7526_s12 + $0x10] sm:$0xff]  ;;  %273 = vst [vmem:[#allocation2 + $0x28] sm:$0xff] %v232_v35  ;;  %274 = vst [vmem:[#allocation2 + $0x30] sm:$0xff] %v233_v36  ;;  %v6801_v39 = vld [vmem:[%s7977_s1 + $0x1c0] sm:$0xff]  }
  0x5c   : > { %270 = vst [vmem:[#allocation2 + $0x10] sm:$0xff] %v229_v37  ;;  %v6802_v42 = vld [vmem:[%s7977_s1 + $0x100] sm:$0xff]   ;;  %v6804_v47 = vld [vmem:[%s7977_s1 + $0x148] sm:$0xff]   ;;  %v237_v59 = vld [vmem:[%s7526_s12 + $0x50] sm:$0xff] }
  0x5d   : > { %6039 = vmatpush3.bf16.msra.mxu0 %v6782_v14  ;;  %v6803_v43 = vld [vmem:[%s7977_s1 + $0x180] sm:$0xff]   ;;  %v6805_v55 = vld [vmem:[%s7977_s1 + $0x1c8] sm:$0xff]   ;;  %v241_v61 = vld [vmem:[%s7526_s12 + $0x70] sm:$0xff]  ;;  %278 = vst [vmem:[#allocation2 + $0x50] sm:$0xff] %v237_v59 }
  0x5e   : > { %6079 = vmatpush3.bf16.msra.mxu1 %v6783_v15  ;;  %6040 = vmatprep.subr.bf16.mxu0 %v6784_v16  ;;  %v6806_v56 = vld [vmem:[%s7977_s1 + $0x108] sm:$0xff]   ;;  %v242_v62 = vld [vmem:[%s7526_s12 + $0x78] sm:$0xff]  ;;  %282 = vst [vmem:[#allocation2 + $0x70] sm:$0xff] %v241_v61  ;;  %v6808_v0 = vld [vmem:[%s7977_s1 + $0x150] sm:$0xff]  }
  0x5f   : > { %6080 = vmatprep.subr.bf16.mxu1 %v6785_v17  ;;  %v6807_v57 = vld [vmem:[%s7977_s1 + $0x188] sm:$0xff]   ;;  %v238_v63 = vld [vmem:[%s7526_s12 + $0x58] sm:$0xff]  ;;  %283 = vst [vmem:[#allocation2 + $0x78] sm:$0xff] %v242_v62  ;;  %v6809_v1 = vld [vmem:[%s7977_s1 + $0x1d0] sm:$0xff]  }
  0x60   : > { %v312_v40 = vld [vmem:[#allocation2 + $0x1] ss:$2 sm:$0xff]  ;;  %v309_v41 = vld [vmem:[#allocation2] ss:$2 sm:$0xff]  ;;  %v236_v58 = vld [vmem:[%s7526_s12 + $0x48] sm:$0xff]  ;;  %279 = vst [vmem:[#allocation2 + $0x58] sm:$0xff] %v238_v63 }
  0x61   : > { %6041 = vmatpush3.bf16.msra.mxu0 %v6786_v18  ;;  %v240_v60 = vld [vmem:[%s7526_s12 + $0x68] sm:$0xff]  ;;  %277 = vst [vmem:[#allocation2 + $0x48] sm:$0xff] %v236_v58  ;;  %v6810_v2 = vld [vmem:[%s7977_s1 + $0x110] sm:$0xff]   ;;  %v6812_v4 = vld [vmem:[%s7977_s1 + $0x158] sm:$0xff]  }
  0x62   : > { %6081 = vmatpush3.bf16.msra.mxu1 %v6787_v19  ;;  %6042 = vmatprep.subr.bf16.mxu0 %v6788_v20  ;;  %v358_v44 = vld [vmem:[#allocation2 + $0x25] ss:$2 sm:$0xff]  ;;  %v356_v50 = vld [vmem:[#allocation2 + $0x24] ss:$2 sm:$0xff]  ;;  %281 = vst [vmem:[#allocation2 + $0x68] sm:$0xff] %v240_v60  ;;  %v6821_v33 = vld [vmem:[%s7977_s1 + $0x1e8] sm:$0xff]  }
  0x63   : > { %6082 = vmatprep.subr.bf16.mxu1 %v6789_v21  ;;  %v318_v45 = vld [vmem:[#allocation2 + $0x3] ss:$2 sm:$0xff]  ;;  %v765_v48 = vpack.c.bf16 %v358_v44, %v312_v40  ;;  %v315_v51 = vld [vmem:[#allocation2 + $0x2] ss:$2 sm:$0xff]  ;;  %v764_v53 = vpack.c.bf16 %v356_v50, %v309_v41  ;;  %v6822_v44 = vld [vmem:[%s7977_s1 + $0x128] sm:$0xff]  }
  0x64   : > { %v362_v46 = vld [vmem:[#allocation2 + $0x27] ss:$2 sm:$0xff]  ;;  %v360_v52 = vld [vmem:[#allocation2 + $0x26] ss:$2 sm:$0xff]  ;;  %v260_v50 = vld [vmem:[%s7526_s12 + $0x108] sm:$0xff] }
  0x65   : > { %6043 = vmatpush3.bf16.msra.mxu0 %v6790_v22  ;;  %v767_v49 = vpack.c.bf16 %v362_v46, %v318_v45  ;;  %v766_v54 = vpack.c.bf16 %v360_v52, %v315_v51  ;;  %1884 = vmatprep.mubr.bf16.mxu0 %v765_v48  ;;  %v6811_v3 = vld [vmem:[%s7977_s1 + $0x190] sm:$0xff]   ;;  %v6813_v5 = vld [vmem:[%s7977_s1 + $0x1d8] sm:$0xff]   ;;  %v6823_v45 = vld [vmem:[%s7977_s1 + $0x1a8] sm:$0xff]   ;;  %301 = vst [vmem:[#allocation2 + $0x108] sm:$0xff] %v260_v50 }
  0x66   : > { %6083 = vmatpush3.bf16.msra.mxu1 %v6791_v23  ;;  %6044 = vmatprep.subr.bf16.mxu0 %v6792_v24  ;;  %v6814_v18 = vld [vmem:[%s7977_s1 + $0x118] sm:$0xff]   ;;  %v245_v20 = vld [vmem:[%s7526_s12 + $0x90] sm:$0xff]  ;;  %v251_v24 = vld [vmem:[%s7526_s12 + $0xc0] sm:$0xff] }
  0x67   : > { %6084 = vmatprep.subr.bf16.mxu1 %v6793_v25  ;;  %1949 = vmatprep.mubr.bf16.mxu1 %v767_v49  ;;  %v6815_v19 = vld [vmem:[%s7977_s1 + $0x198] sm:$0xff]   ;;  %v249_v22 = vld [vmem:[%s7526_s12 + $0xb0] sm:$0xff]  ;;  %286 = vst [vmem:[#allocation2 + $0x90] sm:$0xff] %v245_v20  ;;  %292 = vst [vmem:[#allocation2 + $0xc0] sm:$0xff] %v251_v24 }
  0x68   : > { %v398_v6 = vld [vmem:[#allocation2 + $0x49] ss:$2 sm:$0xff]  ;;  %v396_v7 = vld [vmem:[#allocation2 + $0x48] ss:$2 sm:$0xff]  ;;  %290 = vst [vmem:[#allocation2 + $0xb0] sm:$0xff] %v249_v22  ;;  %v256_v51 = vld [vmem:[%s7526_s12 + $0xe8] sm:$0xff] }
  0x69   : > { %6045 = vmatpush3.bf16.msra.mxu0 %v6794_v26  ;;  %v438_v8 = vld [vmem:[#allocation2 + $0x6d] ss:$2 sm:$0xff]  ;;  %v436_v13 = vld [vmem:[#allocation2 + $0x6c] ss:$2 sm:$0xff]  ;;  %297 = vst [vmem:[#allocation2 + $0xe8] sm:$0xff] %v256_v51  ;;  %v6824_v52 = vld [vmem:[%s7977_s1 + $0x170] sm:$0xff]  }
  0x6a   : > { %6085 = vmatpush3.bf16.msra.mxu1 %v6795_v27  ;;  %6046 = vmatprep.subr.bf16.mxu0 %v6796_v28  ;;  %v402_v9 = vld [vmem:[#allocation2 + $0x4b] ss:$2 sm:$0xff]  ;;  %v781_v11 = vpack.c.bf16 %v438_v8, %v398_v6  ;;  %v400_v14 = vld [vmem:[#allocation2 + $0x4a] ss:$2 sm:$0xff]  ;;  %v780_v16 = vpack.c.bf16 %v436_v13, %v396_v7 }
  0x6b   : > { %6086 = vmatprep.subr.bf16.mxu1 %v6797_v29  ;;  %v442_v10 = vld [vmem:[#allocation2 + $0x6f] ss:$2 sm:$0xff]  ;;  %v440_v15 = vld [vmem:[#allocation2 + $0x6e] ss:$2 sm:$0xff] }
  0x6c   : > { %v783_v12 = vpack.c.bf16 %v442_v10, %v402_v9  ;;  %v782_v17 = vpack.c.bf16 %v440_v15, %v400_v14  ;;  %v246_v21 = vld [vmem:[%s7526_s12 + $0x98] sm:$0xff]  ;;  %v247_v25 = vld [vmem:[%s7526_s12 + $0xa0] sm:$0xff] }
  0x6d   : > { %6047 = vmatpush3.bf16.msra.mxu0 %v6798_v30  ;;  %v250_v23 = vld [vmem:[%s7526_s12 + $0xb8] sm:$0xff]  ;;  %287 = vst [vmem:[#allocation2 + $0x98] sm:$0xff] %v246_v21  ;;  %288 = vst [vmem:[#allocation2 + $0xa0] sm:$0xff] %v247_v25  ;;  %v6816_v26 = vld [vmem:[%s7977_s1 + $0x160] sm:$0xff]  }
  0x6e   : > { %6087 = vmatpush3.bf16.msra.mxu1 %v6799_v31  ;;  %6112 = vmatprep.subr.bf16.mxu0 %v6800_v38  ;;  %291 = vst [vmem:[#allocation2 + $0xb8] sm:$0xff] %v250_v23  ;;  %v6817_v27 = vld [vmem:[%s7977_s1 + $0x1e0] sm:$0xff]   ;;  %v6820_v30 = vld [vmem:[%s7977_s1 + $0x168] sm:$0xff]   ;;  %v254_v46 = vld [vmem:[%s7526_s12 + $0xd8] sm:$0xff] }
  0x6f   : > { %6152 = vmatprep.subr.bf16.mxu1 %v6801_v39  ;;  %v6818_v28 = vld [vmem:[%s7977_s1 + $0x120] sm:$0xff]   ;;  %v258_v48 = vld [vmem:[%s7526_s12 + $0xf8] sm:$0xff]  ;;  %295 = vst [vmem:[#allocation2 + $0xd8] sm:$0xff] %v254_v46  ;;  %v6836_v21 = vld [vmem:[%s7977_s1 + $0x248] sm:$0xff]  }
  0x70   : > { %1885 = vmatmul.mubr.bf16.vlgmr.msra.gmra.mrb[0].mxu0 %v764_v53  ;;  %v6819_v29 = vld [vmem:[%s7977_s1 + $0x1a0] sm:$0xff]   ;;  %299 = vst [vmem:[#allocation2 + $0xf8] sm:$0xff] %v258_v48  ;;  %v6825_v53 = vld [vmem:[%s7977_s1 + $0x1f0] sm:$0xff]   ;;  %v6830_v6 = vld [vmem:[%s7977_s1 + $0x138] sm:$0xff]  }
  0x71   : > { %1950 = vmatmul.mubr.bf16.vlgmr.msra.gmra.mrb[0].mxu1 %v766_v54  ;;  %6113 = vmatpush3.bf16.msra.mxu0 %v6802_v42  ;;  %v259_v49 = vld [vmem:[%s7526_s12 + $0x100] sm:$0xff]  ;;  %v6826_v54 = vld [vmem:[%s7977_s1 + $0x130] sm:$0xff]   ;;  %v6831_v7 = vld [vmem:[%s7977_s1 + $0x1b8] sm:$0xff]  }
  0x72   : > { %6153 = vmatpush3.bf16.msra.mxu1 %v6803_v43  ;;  %6114 = vmatprep.subr.bf16.mxu0 %v6804_v47  ;;  %v255_v47 = vld [vmem:[%s7526_s12 + $0xe0] sm:$0xff]  ;;  %300 = vst [vmem:[#allocation2 + $0x100] sm:$0xff] %v259_v49  ;;  %v230_v8 = vld [vmem:[%s7526_s12 + $0x18] sm:$0xff] }
  0x73   : > { %6154 = vmatprep.subr.bf16.mxu1 %v6805_v55  ;;  %1892 = vmatprep.mubr.bf16.mxu0 %v781_v11  ;;  %296 = vst [vmem:[#allocation2 + $0xe0] sm:$0xff] %v255_v47  ;;  %v6827_v55 = vld [vmem:[%s7977_s1 + $0x1b0] sm:$0xff]   ;;  %v234_v9 = vld [vmem:[%s7526_s12 + $0x38] sm:$0xff]  ;;  %v235_v10 = vld [vmem:[%s7526_s12 + $0x40] sm:$0xff] }
  0x74   : > { %1957 = vmatprep.mubr.bf16.mxu1 %v783_v12  ;;  %v478_v31 = vld [vmem:[#allocation2 + $0x91] ss:$2 sm:$0xff]  ;;  %v476_v32 = vld [vmem:[#allocation2 + $0x90] ss:$2 sm:$0xff]  ;;  %271 = vst [vmem:[#allocation2 + $0x18] sm:$0xff] %v230_v8  ;;  %275 = vst [vmem:[#allocation2 + $0x38] sm:$0xff] %v234_v9 }
  0x75   : > { %6115 = vmatpush3.bf16.msra.mxu0 %v6806_v56  ;;  %v518_v34 = vld [vmem:[#allocation2 + $0xb5] ss:$2 sm:$0xff]  ;;  %v516_v36 = vld [vmem:[#allocation2 + $0xb4] ss:$2 sm:$0xff]  ;;  %v6828_v56 = vld [vmem:[%s7977_s1 + $0x178] sm:$0xff]   ;;  %276 = vst [vmem:[#allocation2 + $0x40] sm:$0xff] %v235_v10 }
  0x76   : > { %6155 = vmatpush3.bf16.msra.mxu1 %v6807_v57  ;;  %6116 = vmatprep.subr.bf16.mxu0 %v6808_v0  ;;  %v522_v35 = vld [vmem:[#allocation2 + $0xb7] ss:$2 sm:$0xff]  ;;  %v797_v37 = vpack.c.bf16 %v518_v34, %v478_v31  ;;  %v796_v39 = vpack.c.bf16 %v516_v36, %v476_v32  ;;  %v480_v40 = vld [vmem:[#allocation2 + $0x92] ss:$2 sm:$0xff]  ;;  %v6829_v57 = vld [vmem:[%s7977_s1 + $0x1f8] sm:$0xff]  }
  0x77   : > { %6156 = vmatprep.subr.bf16.mxu1 %v6809_v1  ;;  %v482_v38 = vld [vmem:[#allocation2 + $0x93] ss:$2 sm:$0xff]  ;;  %v520_v41 = vld [vmem:[#allocation2 + $0xb6] ss:$2 sm:$0xff]  ;;  %v6846_v51 = vld [vmem:[%s7977_s1 + $0x218] sm:$0xff]  }
  0x78   : > { %1893 = vmatmul.mubr.bf16.gmra.mrb[4].mxu0 %v780_v16  ;;  %v799_v42 = vpack.c.bf16 %v522_v35, %v482_v38  ;;  %v798_v43 = vpack.c.bf16 %v520_v41, %v480_v40  ;;  %v6832_v11 = vld [vmem:[%s7977_s1 + $0x240] sm:$0xff]   ;;  %v6840_v34 = vld [vmem:[%s7977_s1 + $0x250] sm:$0xff]   ;;  %v6844_v38 = vld [vmem:[%s7977_s1 + $0x258] sm:$0xff]  }
  0x79   : > { %6117 = vmatpush3.bf16.msra.mxu0 %v6810_v2  ;;  %1958 = vmatmul.mubr.bf16.gmra.mrb[4].mxu1 %v782_v17  ;;  %v598_v60 = vld [vmem:[#allocation2 + $0xfd] ss:$2 sm:$0xff]  ;;  %v596_v1 = vld [vmem:[#allocation2 + $0xfc] ss:$2 sm:$0xff]  ;;  %v6833_v12 = vld [vmem:[%s7977_s1 + $0x2c0] sm:$0xff]  }
  0x7a   : > { %6157 = vmatpush3.bf16.msra.mxu1 %v6811_v3  ;;  %6118 = vmatprep.subr.bf16.mxu0 %v6812_v4  ;;  %v558_v58 = vld [vmem:[#allocation2 + $0xd9] ss:$2 sm:$0xff]  ;;  %v556_v59 = vld [vmem:[#allocation2 + $0xd8] ss:$2 sm:$0xff]  ;;  %v6834_v16 = vld [vmem:[%s7977_s1 + $0x200] sm:$0xff]  }
  0x7b   : > { %6158 = vmatprep.subr.bf16.mxu1 %v6813_v5  ;;  %1900 = vmatprep.mubr.bf16.mxu0 %v797_v37  ;;  %v562_v61 = vld [vmem:[#allocation2 + $0xdb] ss:$2 sm:$0xff]  ;;  %v813_v63 = vpack.c.bf16 %v598_v60, %v558_v58  ;;  %v560_v2 = vld [vmem:[#allocation2 + $0xda] ss:$2 sm:$0xff]  ;;  %v812_v4 = vpack.c.bf16 %v596_v1, %v556_v59  ;;  %v6835_v17 = vld [vmem:[%s7977_s1 + $0x280] sm:$0xff]  }
  0x7c   : > { %1965 = vmatprep.mubr.bf16.mxu1 %v799_v42  ;;  %v602_v62 = vld [vmem:[#allocation2 + $0xff] ss:$2 sm:$0xff]  ;;  %v600_v3 = vld [vmem:[#allocation2 + $0xfe] ss:$2 sm:$0xff]  ;;  %v239_v31 = vld [vmem:[%s7526_s12 + $0x60] sm:$0xff] }
  0x7d   : > { %6119 = vmatpush3.bf16.msra.mxu0 %v6814_v18  ;;  %v815_v0 = vpack.c.bf16 %v602_v62, %v562_v61  ;;  %v814_v5 = vpack.c.bf16 %v600_v3, %v560_v2  ;;  %v324_v13 = vld [vmem:[#allocation2 + $0x13] ss:$2 sm:$0xff]  ;;  %v321_v15 = vld [vmem:[#allocation2 + $0x12] ss:$2 sm:$0xff]  ;;  %280 = vst [vmem:[#allocation2 + $0x60] sm:$0xff] %v239_v31 }
  0x7e   : > { %6159 = vmatpush3.bf16.msra.mxu1 %v6815_v19  ;;  %6120 = vmatprep.subr.bf16.mxu0 %v6816_v26  ;;  %v330_v14 = vld [vmem:[#allocation2 + $0x15] ss:$2 sm:$0xff]  ;;  %v364_v20 = vld [vmem:[#allocation2 + $0x36] ss:$2 sm:$0xff] }
  0x7f   : > { %6160 = vmatprep.subr.bf16.mxu1 %v6817_v27  ;;  %v366_v18 = vld [vmem:[#allocation2 + $0x37] ss:$2 sm:$0xff]  ;;  %v768_v24 = vpack.c.bf16 %v364_v20, %v321_v15  ;;  %v327_v25 = vld [vmem:[#allocation2 + $0x14] ss:$2 sm:$0xff]  ;;  %v262_v15 = vld [vmem:[%s7526_s12 + $0x118] sm:$0xff] }
  0x80   : > { %1901 = vmatmul.mubr.bf16.gmra.mrb[8].mxu0 %v796_v39  ;;  %v370_v19 = vld [vmem:[#allocation2 + $0x39] ss:$2 sm:$0xff]  ;;  %v769_v22 = vpack.c.bf16 %v366_v18, %v324_v13  ;;  %v368_v26 = vld [vmem:[#allocation2 + $0x38] ss:$2 sm:$0xff]  ;;  %v243_v32 = vld [vmem:[%s7526_s12 + $0x80] sm:$0xff]  ;;  %303 = vst [vmem:[#allocation2 + $0x118] sm:$0xff] %v262_v15 }
  0x81   : > { %6121 = vmatpush3.bf16.msra.mxu0 %v6818_v28  ;;  %1966 = vmatmul.mubr.bf16.gmra.mrb[8].mxu1 %v798_v43  ;;  %v771_v23 = vpack.c.bf16 %v370_v19, %v330_v14  ;;  %v770_v27 = vpack.c.bf16 %v368_v26, %v327_v25  ;;  %v6837_v28 = vld [vmem:[%s7977_s1 + $0x2c8] sm:$0xff]   ;;  %284 = vst [vmem:[#allocation2 + $0x80] sm:$0xff] %v243_v32  ;;  %v6841_v35 = vld [vmem:[%s7977_s1 + $0x2d0] sm:$0xff]   ;;  %v6845_v39 = vld [vmem:[%s7977_s1 + $0x2d8] sm:$0xff]  }
  0x82   : > { %6161 = vmatpush3.bf16.msra.mxu1 %v6819_v29  ;;  %6122 = vmatprep.subr.bf16.mxu0 %v6820_v30  ;;  %v6838_v29 = vld [vmem:[%s7977_s1 + $0x208] sm:$0xff]   ;;  %v6842_v36 = vld [vmem:[%s7977_s1 + $0x210] sm:$0xff]   ;;  %v6849_v58 = vld [vmem:[%s7977_s1 + $0x2e0] sm:$0xff]  }
  0x83   : > { %6162 = vmatprep.subr.bf16.mxu1 %v6821_v33  ;;  %1908 = vmatprep.mubr.bf16.mxu0 %v813_v63  ;;  %v6839_v30 = vld [vmem:[%s7977_s1 + $0x288] sm:$0xff]   ;;  %v6843_v37 = vld [vmem:[%s7977_s1 + $0x290] sm:$0xff]   ;;  %v6850_v59 = vld [vmem:[%s7977_s1 + $0x220] sm:$0xff]  }
  0x84   : > { %1973 = vmatprep.mubr.bf16.mxu1 %v815_v0  ;;  %v244_v33 = vld [vmem:[%s7526_s12 + $0x88] sm:$0xff]  ;;  %v6851_v60 = vld [vmem:[%s7977_s1 + $0x2a0] sm:$0xff]   ;;  %v257_v13 = vld [vmem:[%s7526_s12 + $0xf0] sm:$0xff] }
  0x85   : > { %6123 = vmatpush3.bf16.msra.mxu0 %v6822_v44  ;;  %285 = vst [vmem:[#allocation2 + $0x88] sm:$0xff] %v244_v33  ;;  %v406_v40 = vld [vmem:[#allocation2 + $0x5b] ss:$2 sm:$0xff]  ;;  %v404_v42 = vld [vmem:[#allocation2 + $0x5a] ss:$2 sm:$0xff]  ;;  %298 = vst [vmem:[#allocation2 + $0xf0] sm:$0xff] %v257_v13 }
  0x86   : > { %6163 = vmatpush3.bf16.msra.mxu1 %v6823_v45  ;;  %6124 = vmatprep.subr.bf16.mxu0 %v6824_v52  ;;  %v410_v41 = vld [vmem:[#allocation2 + $0x5d] ss:$2 sm:$0xff]  ;;  %v408_v49 = vld [vmem:[#allocation2 + $0x5c] ss:$2 sm:$0xff] }
  0x87   : > { %6164 = vmatprep.subr.bf16.mxu1 %v6825_v53  ;;  %v6847_v53 = vld [vmem:[%s7977_s1 + $0x298] sm:$0xff]   ;;  %v6852_v61 = vld [vmem:[%s7977_s1 + $0x268] sm:$0xff]   ;;  %v261_v14 = vld [vmem:[%s7526_s12 + $0x110] sm:$0xff] }
  0x88   : > { %1909 = vmatmul.mubr.bf16.gmra.mrb[12].mxu0 %v812_v4  ;;  %v6853_v62 = vld [vmem:[%s7977_s1 + $0x2e8] sm:$0xff]   ;;  %302 = vst [vmem:[#allocation2 + $0x110] sm:$0xff] %v261_v14  ;;  %v6858_v18 = vld [vmem:[%s7977_s1 + $0x230] sm:$0xff]   ;;  %v6860_v20 = vld [vmem:[%s7977_s1 + $0x278] sm:$0xff]  }
  0x89   : > { %6125 = vmatpush3.bf16.msra.mxu0 %v6826_v54  ;;  %1974 = vmatmul.mubr.bf16.gmra.mrb[12].mxu1 %v814_v5  ;;  %v248_v54 = vld [vmem:[%s7526_s12 + $0xa8] sm:$0xff]  ;;  %v6859_v19 = vld [vmem:[%s7977_s1 + $0x2b0] sm:$0xff]  }
  0x8a   : > { %6165 = vmatpush3.bf16.msra.mxu1 %v6827_v55  ;;  %6126 = vmatprep.subr.bf16.mxu0 %v6828_v56  ;;  %v252_v55 = vld [vmem:[%s7526_s12 + $0xc8] sm:$0xff]  ;;  %v253_v56 = vld [vmem:[%s7526_s12 + $0xd0] sm:$0xff]  ;;  %289 = vst [vmem:[#allocation2 + $0xa8] sm:$0xff] %v248_v54 }
  0x8b   : > { %6166 = vmatprep.subr.bf16.mxu1 %v6829_v57  ;;  %2014 = vmatprep.mubr.bf16.mxu0 %v769_v22  ;;  %293 = vst [vmem:[#allocation2 + $0xc8] sm:$0xff] %v252_v55  ;;  %294 = vst [vmem:[#allocation2 + $0xd0] sm:$0xff] %v253_v56  ;;  %v6848_v57 = vld [vmem:[%s7977_s1 + $0x260] sm:$0xff]   ;;  %v6854_v63 = vld [vmem:[%s7977_s1 + $0x228] sm:$0xff]  }
  0x8c   : > { %2079 = vmatprep.mubr.bf16.mxu1 %v771_v23  ;;  %v446_v43 = vld [vmem:[#allocation2 + $0x7f] ss:$2 sm:$0xff]  ;;  %v444_v45 = vld [vmem:[#allocation2 + $0x7e] ss:$2 sm:$0xff] }
  0x8d   : > { %6127 = vmatpush3.bf16.msra.mxu0 %v6830_v6  ;;  %v450_v44 = vld [vmem:[#allocation2 + $0x81] ss:$2 sm:$0xff]  ;;  %v785_v46 = vpack.c.bf16 %v446_v43, %v406_v40  ;;  %v784_v48 = vpack.c.bf16 %v444_v45, %v404_v42  ;;  %v448_v50 = vld [vmem:[#allocation2 + $0x80] ss:$2 sm:$0xff]  ;;  %v6870_v54 = vld [vmem:[%s7977_s1 + $0x308] sm:$0xff]  }
  0x8e   : > { %6167 = vmatpush3.bf16.msra.mxu1 %v6831_v7  ;;  %6192 = vmatprep.subr.bf16.mxu0 %v6832_v11  ;;  %v787_v47 = vpack.c.bf16 %v450_v44, %v410_v41  ;;  %v786_v52 = vpack.c.bf16 %v448_v50, %v408_v49  ;;  %v566_v22 = vld [vmem:[#allocation2 + $0xeb] ss:$2 sm:$0xff]  ;;  %v568_v31 = vld [vmem:[#allocation2 + $0xec] ss:$2 sm:$0xff]  ;;  %v542_v15 = vld [vmem:[#allocation2 + $0xdb] ss:$2 sm:$0xff] }
  0x8f   : > { %6232 = vmatprep.subr.bf16.mxu1 %v6833_v12  ;;  %v6855_v12 = vld [vmem:[%s7977_s1 + $0x2a8] sm:$0xff]   ;;  %v333_v41 = vld [vmem:[#allocation2 + $0x24] ss:$2 sm:$0xff] }
  0x90   : > { %2015 = vmatmul.mubr.bf16.vlgmr.msra.gmra.mrb[16].mxu0 %v768_v24  ;;  %v570_v23 = vld [vmem:[#allocation2 + $0xed] ss:$2 sm:$0xff]  ;;  %v564_v24 = vld [vmem:[#allocation2 + $0xea] ss:$2 sm:$0xff] }
  0x91   : > { %2080 = vmatmul.mubr.bf16.vlgmr.msra.gmra.mrb[16].mxu1 %v770_v27  ;;  %6193 = vmatpush3.bf16.msra.mxu0 %v6834_v16  ;;  %v486_v0 = vld [vmem:[#allocation2 + $0xa3] ss:$2 sm:$0xff]  ;;  %v484_v5 = vld [vmem:[#allocation2 + $0xa2] ss:$2 sm:$0xff]  ;;  %v6871_v55 = vld [vmem:[%s7977_s1 + $0x388] sm:$0xff]  }
  0x92   : > { %6233 = vmatpush3.bf16.msra.mxu1 %v6835_v17  ;;  %6194 = vmatprep.subr.bf16.mxu0 %v6836_v21  ;;  %v526_v1 = vld [vmem:[#allocation2 + $0xc7] ss:$2 sm:$0xff]  ;;  %v524_v6 = vld [vmem:[#allocation2 + $0xc6] ss:$2 sm:$0xff]  ;;  %v502_v14 = vld [vmem:[#allocation2 + $0xb7] ss:$2 sm:$0xff] }
  0x93   : > { %6234 = vmatprep.subr.bf16.mxu1 %v6837_v28  ;;  %2022 = vmatprep.mubr.bf16.mxu0 %v785_v46  ;;  %v490_v2 = vld [vmem:[#allocation2 + $0xa5] ss:$2 sm:$0xff]  ;;  %v801_v3 = vpack.c.bf16 %v526_v1, %v486_v0  ;;  %v800_v8 = vpack.c.bf16 %v524_v6, %v484_v5  ;;  %v488_v9 = vld [vmem:[#allocation2 + $0xa4] ss:$2 sm:$0xff] }
  0x94   : > { %2087 = vmatprep.mubr.bf16.mxu1 %v787_v47  ;;  %v530_v4 = vld [vmem:[#allocation2 + $0xc9] ss:$2 sm:$0xff]  ;;  %v528_v10 = vld [vmem:[#allocation2 + $0xc8] ss:$2 sm:$0xff]  ;;  %v6856_v16 = vld [vmem:[%s7977_s1 + $0x270] sm:$0xff]  }
  0x95   : > { %6195 = vmatpush3.bf16.msra.mxu0 %v6838_v29  ;;  %v803_v7 = vpack.c.bf16 %v530_v4, %v490_v2  ;;  %v802_v11 = vpack.c.bf16 %v528_v10, %v488_v9  ;;  %v6857_v17 = vld [vmem:[%s7977_s1 + $0x2f0] sm:$0xff]   ;;  %v6861_v21 = vld [vmem:[%s7977_s1 + $0x2f8] sm:$0xff]   ;;  %v610_v26 = vld [vmem:[#allocation2 + $0x111] ss:$2 sm:$0xff] }
  0x96   : > { %6235 = vmatpush3.bf16.msra.mxu1 %v6839_v30  ;;  %6196 = vmatprep.subr.bf16.mxu0 %v6840_v34  ;;  %v606_v25 = vld [vmem:[#allocation2 + $0x10f] ss:$2 sm:$0xff]  ;;  %v604_v27 = vld [vmem:[#allocation2 + $0x10e] ss:$2 sm:$0xff]  ;;  %v819_v29 = vpack.c.bf16 %v610_v26, %v570_v23  ;;  %v6872_v4 = vld [vmem:[%s7977_s1 + $0x350] sm:$0xff]  }
  0x97   : > { %6236 = vmatprep.subr.bf16.mxu1 %v6841_v35  ;;  %v817_v28 = vpack.c.bf16 %v606_v25, %v566_v22  ;;  %v816_v30 = vpack.c.bf16 %v604_v27, %v564_v24  ;;  %v608_v32 = vld [vmem:[#allocation2 + $0x110] ss:$2 sm:$0xff]  ;;  %v6862_v34 = vld [vmem:[%s7977_s1 + $0x238] sm:$0xff]   ;;  %v6873_v5 = vld [vmem:[%s7977_s1 + $0x3d0] sm:$0xff]  }
  0x98   : > { %2023 = vmatmul.mubr.bf16.gmra.mrb[20].mxu0 %v784_v48  ;;  %v818_v33 = vpack.c.bf16 %v608_v32, %v568_v31  ;;  %v6863_v35 = vld [vmem:[%s7977_s1 + $0x2b8] sm:$0xff]   ;;  %v6864_v46 = vld [vmem:[%s7977_s1 + $0x340] sm:$0xff]   ;;  %v6874_v6 = vld [vmem:[%s7977_s1 + $0x310] sm:$0xff]  }
  0x99   : > { %6197 = vmatpush3.bf16.msra.mxu0 %v6842_v36  ;;  %2088 = vmatmul.mubr.bf16.gmra.mrb[20].mxu1 %v786_v52  ;;  %v336_v36 = vld [vmem:[#allocation2 + $0x25] ss:$2 sm:$0xff]  ;;  %v373_v43 = vld [vmem:[#allocation2 + $0x48] ss:$2 sm:$0xff]  ;;  %v6868_v52 = vld [vmem:[%s7977_s1 + $0x348] sm:$0xff]  }
  0x9a   : > { %6237 = vmatpush3.bf16.msra.mxu1 %v6843_v37  ;;  %6198 = vmatprep.subr.bf16.mxu0 %v6844_v38  ;;  %v376_v37 = vld [vmem:[#allocation2 + $0x49] ss:$2 sm:$0xff]  ;;  %v339_v44 = vld [vmem:[#allocation2 + $0x26] ss:$2 sm:$0xff]  ;;  %v772_v48 = vpack.c.bf16 %v373_v43, %v333_v41  ;;  %v536_v13 = vld [vmem:[#allocation2 + $0xd9] ss:$2 sm:$0xff] }
  0x9b   : > { %6238 = vmatprep.subr.bf16.mxu1 %v6845_v39  ;;  %2030 = vmatprep.mubr.bf16.mxu0 %v801_v3  ;;  %v773_v38 = vpack.c.bf16 %v376_v37, %v336_v36  ;;  %v342_v39 = vld [vmem:[#allocation2 + $0x27] ss:$2 sm:$0xff]  ;;  %v379_v45 = vld [vmem:[#allocation2 + $0x4a] ss:$2 sm:$0xff]  ;;  %v539_v22 = vld [vmem:[#allocation2 + $0xda] ss:$2 sm:$0xff] }
  0x9c   : > { %2095 = vmatprep.mubr.bf16.mxu1 %v803_v7  ;;  %v382_v40 = vld [vmem:[#allocation2 + $0x4b] ss:$2 sm:$0xff]  ;;  %v774_v49 = vpack.c.bf16 %v379_v45, %v339_v44  ;;  %v419_v1 = vld [vmem:[#allocation2 + $0x6e] ss:$2 sm:$0xff]  ;;  %v6875_v7 = vld [vmem:[%s7977_s1 + $0x390] sm:$0xff]  }
  0x9d   : > { %6199 = vmatpush3.bf16.msra.mxu0 %v6846_v51  ;;  %v775_v42 = vpack.c.bf16 %v382_v40, %v342_v39  ;;  %v6865_v47 = vld [vmem:[%s7977_s1 + $0x3c0] sm:$0xff]   ;;  %v6877_v9 = vld [vmem:[%s7977_s1 + $0x3d8] sm:$0xff]   ;;  %v6887_v31 = vld [vmem:[%s7977_s1 + $0x3a8] sm:$0xff]  }
  0x9e   : > { %6239 = vmatpush3.bf16.msra.mxu1 %v6847_v53  ;;  %6200 = vmatprep.subr.bf16.mxu0 %v6848_v57  ;;  %v6866_v50 = vld [vmem:[%s7977_s1 + $0x300] sm:$0xff]   ;;  %v6869_v53 = vld [vmem:[%s7977_s1 + $0x3c8] sm:$0xff]   ;;  %v6878_v10 = vld [vmem:[%s7977_s1 + $0x318] sm:$0xff]  }
  0x9f   : > { %6240 = vmatprep.subr.bf16.mxu1 %v6849_v58  ;;  %v6867_v51 = vld [vmem:[%s7977_s1 + $0x380] sm:$0xff]   ;;  %v576_v36 = vld [vmem:[#allocation2 + $0xfd] ss:$2 sm:$0xff]  ;;  %v573_v37 = vld [vmem:[#allocation2 + $0xfc] ss:$2 sm:$0xff] }
  0xa0   : > { %2031 = vmatmul.mubr.bf16.gmra.mrb[24].mxu0 %v800_v8  ;;  %v416_v56 = vld [vmem:[#allocation2 + $0x6d] ss:$2 sm:$0xff]  ;;  %v459_v2 = vld [vmem:[#allocation2 + $0x92] ss:$2 sm:$0xff] }
  0xa1   : > { %6201 = vmatpush3.bf16.msra.mxu0 %v6850_v59  ;;  %2096 = vmatmul.mubr.bf16.gmra.mrb[24].mxu1 %v802_v11  ;;  %v456_v57 = vld [vmem:[#allocation2 + $0x91] ss:$2 sm:$0xff]  ;;  %v790_v3 = vpack.c.bf16 %v459_v2, %v419_v1  ;;  %v6876_v8 = vld [vmem:[%s7977_s1 + $0x358] sm:$0xff]   ;;  %v6890_v41 = vld [vmem:[%s7977_s1 + $0x330] sm:$0xff]  }
  0xa2   : > { %6241 = vmatpush3.bf16.msra.mxu1 %v6851_v60  ;;  %6202 = vmatprep.subr.bf16.mxu0 %v6852_v61  ;;  %v422_v58 = vld [vmem:[#allocation2 + $0x6f] ss:$2 sm:$0xff]  ;;  %v789_v59 = vpack.c.bf16 %v456_v57, %v416_v56  ;;  %v413_v61 = vld [vmem:[#allocation2 + $0x6c] ss:$2 sm:$0xff]  ;;  %v582_v39 = vld [vmem:[#allocation2 + $0xff] ss:$2 sm:$0xff] }
  0xa3   : > { %6242 = vmatprep.subr.bf16.mxu1 %v6853_v62  ;;  %2038 = vmatprep.mubr.bf16.mxu0 %v817_v28  ;;  %v462_v60 = vld [vmem:[#allocation2 + $0x93] ss:$2 sm:$0xff]  ;;  %v453_v62 = vld [vmem:[#allocation2 + $0x90] ss:$2 sm:$0xff]  ;;  %v6879_v11 = vld [vmem:[%s7977_s1 + $0x398] sm:$0xff]  }
  0xa4   : > { %2103 = vmatprep.mubr.bf16.mxu1 %v819_v29  ;;  %v788_v0 = vpack.c.bf16 %v453_v62, %v413_v61  ;;  %v6880_v24 = vld [vmem:[%s7977_s1 + $0x360] sm:$0xff]   ;;  %v6884_v28 = vld [vmem:[%s7977_s1 + $0x368] sm:$0xff]   ;;  %v6892_v43 = vld [vmem:[%s7977_s1 + $0x378] sm:$0xff]  }
  0xa5   : > { %6203 = vmatpush3.bf16.msra.mxu0 %v6854_v63  ;;  %v791_v63 = vpack.c.bf16 %v462_v60, %v422_v58  ;;  %v6881_v25 = vld [vmem:[%s7977_s1 + $0x3e0] sm:$0xff]   ;;  %v6885_v29 = vld [vmem:[%s7977_s1 + $0x3e8] sm:$0xff]  }
  0xa6   : > { %6243 = vmatpush3.bf16.msra.mxu1 %v6855_v12  ;;  %6204 = vmatprep.subr.bf16.mxu0 %v6856_v16  ;;  %v496_v12 = vld [vmem:[#allocation2 + $0xb5] ss:$2 sm:$0xff]  ;;  %v579_v40 = vld [vmem:[#allocation2 + $0xfe] ss:$2 sm:$0xff] }
  0xa7   : > { %6244 = vmatprep.subr.bf16.mxu1 %v6857_v17  ;;  %v805_v16 = vpack.c.bf16 %v536_v13, %v496_v12  ;;  %v807_v17 = vpack.c.bf16 %v542_v15, %v502_v14  ;;  %v6882_v26 = vld [vmem:[%s7977_s1 + $0x320] sm:$0xff]   ;;  %v388_v56 = vld [vmem:[#allocation2 + $0x5b] ss:$2 sm:$0xff]  ;;  %v385_v61 = vld [vmem:[#allocation2 + $0x5a] ss:$2 sm:$0xff] }
  0xa8   : > { %2039 = vmatmul.mubr.bf16.gmra.mrb[28].mxu0 %v816_v30  ;;  %v6883_v27 = vld [vmem:[%s7977_s1 + $0x3a0] sm:$0xff]   ;;  %v6886_v30 = vld [vmem:[%s7977_s1 + $0x328] sm:$0xff]   ;;  %v266_v14 = vld [vmem:[%s7526_s12 + $0x138] sm:$0xff] }
  0xa9   : > { %6205 = vmatpush3.bf16.msra.mxu0 %v6858_v18  ;;  %2104 = vmatmul.mubr.bf16.gmra.mrb[28].mxu1 %v818_v33  ;;  %v493_v18 = vld [vmem:[#allocation2 + $0xb4] ss:$2 sm:$0xff]  ;;  %v354_v57 = vld [vmem:[#allocation2 + $0x39] ss:$2 sm:$0xff]  ;;  %v471_v12 = vld [vmem:[#allocation2 + $0xa4] ss:$2 sm:$0xff] }
  0xaa   : > { %6245 = vmatpush3.bf16.msra.mxu1 %v6859_v19  ;;  %6206 = vmatprep.subr.bf16.mxu0 %v6860_v20  ;;  %v533_v19 = vld [vmem:[#allocation2 + $0xd8] ss:$2 sm:$0xff]  ;;  %v263_v32 = vld [vmem:[%s7526_s12 + $0x120] sm:$0xff]  ;;  %v428_v1 = vld [vmem:[#allocation2 + $0x7f] ss:$2 sm:$0xff]  ;;  %307 = vst [vmem:[#allocation2 + $0x138] sm:$0xff] %v266_v14 }
  0xab   : > { %6246 = vmatprep.subr.bf16.mxu1 %v6861_v21  ;;  %2144 = vmatprep.mubr.bf16.mxu0 %v773_v38  ;;  %v499_v20 = vld [vmem:[#allocation2 + $0xb6] ss:$2 sm:$0xff]  ;;  %v804_v21 = vpack.c.bf16 %v533_v19, %v493_v18  ;;  %304 = vst [vmem:[#allocation2 + $0x120] sm:$0xff] %v263_v32  ;;  %v468_v2 = vld [vmem:[#allocation2 + $0xa3] ss:$2 sm:$0xff] }
  0xac   : > { %2209 = vmatprep.mubr.bf16.mxu1 %v775_v42  ;;  %v806_v23 = vpack.c.bf16 %v539_v22, %v499_v20  ;;  %v264_v33 = vld [vmem:[%s7526_s12 + $0x128] sm:$0xff]  ;;  %v6889_v38 = vld [vmem:[%s7977_s1 + $0x3f0] sm:$0xff]   ;;  %v267_v15 = vld [vmem:[%s7526_s12 + $0x140] sm:$0xf] }
  0xad   : > { %6207 = vmatpush3.bf16.msra.mxu0 %v6862_v34  ;;  %305 = vst [vmem:[#allocation2 + $0x128] sm:$0xff] %v264_v33  ;;  %v265_v34 = vld [vmem:[%s7526_s12 + $0x130] sm:$0xff]  ;;  %v554_v18 = vld [vmem:[#allocation2 + $0xed] ss:$2 sm:$0xff]  ;;  %308 = vst [vmem:[#allocation2 + $0x140] sm:$0xf] %v267_v15 }
  0xae   : > { %6247 = vmatpush3.bf16.msra.mxu1 %v6863_v35  ;;  %6272 = vmatprep.subr.bf16.mxu0 %v6864_v46  ;;  %306 = vst [vmem:[#allocation2 + $0x130] sm:$0xff] %v265_v34  ;;  %v6888_v35 = vld [vmem:[%s7977_s1 + $0x370] sm:$0xff]   ;;  %s218_s12 = sand.u32 1, %s7270_s16  }
  0xaf   : > { %6312 = vmatprep.subr.bf16.mxu1 %v6865_v47  ;;  %v6891_v42 = vld [vmem:[%s7977_s1 + $0x3b0] sm:$0xff]   ;;  %s5642_s23 = sshll.u32 %s218_s12, 3  ;;  %s5540_s7 = scalar_lea.sflag [#allocation12], %s218_s12 }
  0xb0   : > { %2145 = vmatmul.mubr.bf16.vlgmr.msra.gmra.mrb[32].mxu0 %v772_v48  ;;  %v345_v60 = vld [vmem:[#allocation2 + $0x36] ss:$2 sm:$0xff]  ;;  %v508_v13 = vld [vmem:[#allocation2 + $0xc7] ss:$2 sm:$0xff]  ;;  %s220_s20 = scalar_lea.vmem [#allocation15], %s5642_s23 }
  0xb1   : > { %2210 = vmatmul.mubr.bf16.vlgmr.msra.gmra.mrb[32].mxu1 %v774_v49  ;;  %6273 = vmatpush3.bf16.msra.mxu0 %v6866_v50  ;;  %v6893_v50 = vld [vmem:[%s7977_s1 + $0x3f8] sm:$0xff]   ;;  %s5553_s27 = sshll.u32 %s220_s20, 4  ;;  %s7936_s27 = int_to_ptr.vmem [resolvable:$true] %s5553_s27 }
  0xb2   : > { %6313 = vmatpush3.bf16.msra.mxu1 %v6867_v51  ;;  %6274 = vmatprep.subr.bf16.mxu0 %v6868_v52  ;;  %s7208_s8 = scalar_lea.vmem %s7936_s27, 128  ;;  %p7215_p4 = scmp.lt.s32.totalorder %s7936_s27, %s7213_s10 }
  0xb3   : > { %6314 = vmatprep.subr.bf16.mxu1 %v6869_v53  ;;  %2152 = vmatprep.mubr.bf16.mxu0 %v789_v59  ;;  %v6894_v53 = vld [vmem:[%s7977_s1 + $0x338] sm:$0xff]   ;;  %p7209_p10 = scmp.ne.s32.totalorder %s7936_s27, %s7208_s8  ;;  %p7216_p7 = scmp.lt.s32.totalorder %s7214_s9, %s7208_s8 }
  0xb4   : > { %2217 = vmatprep.mubr.bf16.mxu1 %v791_v63  ;;  %v616_v44 = vld [vmem:[#allocation2 + $0x121] ss:$2 sm:$0xff]  ;;  %v613_v45 = vld [vmem:[#allocation2 + $0x120] ss:$2 sm:$0xff] }
  0xb5   : > { %6275 = vmatpush3.bf16.msra.mxu0 %v6870_v54  ;;  %v821_v46 = vpack.c.bf16 %v616_v44, %v576_v36  ;;  %v622_v47 = vld [vmem:[#allocation2 + $0x123] ss:$2 sm:$0xff]  ;;  %v820_v48 = vpack.c.bf16 %v613_v45, %v573_v37  ;;  %v619_v49 = vld [vmem:[#allocation2 + $0x122] ss:$2 sm:$0xff]  ;;  %v625_v36 = vld [vmem:[#allocation2 + $0x132] ss:$2 sm:$0xff]  ;;  %p7210_p2 = pnand %p7209_p10, %p7993_p1  ;;  %p7217_p8 = por %p7216_p7, %p7215_p4 }
  0xb6   : > { %6315 = vmatpush3.bf16.msra.mxu1 %v6871_v55  ;;  %6276 = vmatprep.subr.bf16.mxu0 %v6872_v4  ;;  %v823_v51 = vpack.c.bf16 %v622_v47, %v582_v39  ;;  %v822_v52 = vpack.c.bf16 %v619_v49, %v579_v40  ;;  %v6895_v54 = vld [vmem:[%s7977_s1 + $0x3b8] sm:$0xff]   ;;  %v348_v55 = vld [vmem:[#allocation2 + $0x37] ss:$2 sm:$0xff]  ;;  %v351_v63 = vld [vmem:[#allocation2 + $0x38] ss:$2 sm:$0xff] }
  0xb7   : > { %6316 = vmatprep.subr.bf16.mxu1 %v6873_v5  ;;  %v777_v58 = vpack.c.bf16 %v388_v56, %v348_v55  ;;  %v394_v59 = vld [vmem:[#allocation2 + $0x5d] ss:$2 sm:$0xff]  ;;  %v776_v5 = vpack.c.bf16 %v385_v61, %v345_v60  ;;  %v591_v37 = vld [vmem:[#allocation2 + $0x110] ss:$2 sm:$0xff]  ;;  %p7211_p3 = pneg %p7210_p2 }
  0xb8   : > { %2153 = vmatmul.mubr.bf16.gmra.mrb[36].mxu0 %v788_v0  ;;  %v779_v62 = vpack.c.bf16 %v394_v59, %v354_v57  ;;  %v391_v0 = vld [vmem:[#allocation2 + $0x5c] ss:$2 sm:$0xff]  ;;  %v474_v4 = vld [vmem:[#allocation2 + $0xa5] ss:$2 sm:$0xff] }
  0xb9   : > { %2218 = vmatmul.mubr.bf16.gmra.mrb[36].mxu1 %v790_v3  ;;  %6277 = vmatpush3.bf16.msra.mxu0 %v6874_v6  ;;  %v434_v3 = vld [vmem:[#allocation2 + $0x81] ss:$2 sm:$0xff]  ;;  %v778_v6 = vpack.c.bf16 %v391_v0, %v351_v63  ;;  %p7218_p11 = pnand %p7217_p8, %p7211_p3 }
  0xba   : > { %6317 = vmatpush3.bf16.msra.mxu1 %v6875_v7  ;;  %6278 = vmatprep.subr.bf16.mxu0 %v6876_v8  ;;  %v793_v7 = vpack.c.bf16 %v468_v2, %v428_v1  ;;  %v795_v8 = vpack.c.bf16 %v474_v4, %v434_v3 }
  0xbb   : > { %6318 = vmatprep.subr.bf16.mxu1 %v6877_v9  ;;  %2160 = vmatprep.mubr.bf16.mxu0 %v805_v16  ;;  %v425_v9 = vld [vmem:[#allocation2 + $0x7e] ss:$2 sm:$0xff]  ;;  %v548_v16 = vld [vmem:[#allocation2 + $0xeb] ss:$2 sm:$0xff] }
  0xbc   : > { %2225 = vmatprep.mubr.bf16.mxu1 %v807_v17  ;;  %v514_v17 = vld [vmem:[#allocation2 + $0xc9] ss:$2 sm:$0xff] }
  0xbd   : > { %6279 = vmatpush3.bf16.msra.mxu0 %v6878_v10  ;;  %v465_v10 = vld [vmem:[#allocation2 + $0xa2] ss:$2 sm:$0xff]  ;;  %v811_v22 = vpack.c.bf16 %v554_v18, %v514_v17 }
  0xbe   : > { %6319 = vmatpush3.bf16.msra.mxu1 %v6879_v11  ;;  %6280 = vmatprep.subr.bf16.mxu0 %v6880_v24  ;;  %v431_v11 = vld [vmem:[#allocation2 + $0x80] ss:$2 sm:$0xff]  ;;  %v792_v19 = vpack.c.bf16 %v465_v10, %v425_v9  ;;  %v6898_v9 = vld [vmem:[#allocation10] sm:$0xff]  }
  0xbf   : > { %6320 = vmatprep.subr.bf16.mxu1 %v6881_v25  ;;  %v794_v20 = vpack.c.bf16 %v471_v12, %v431_v11  ;;  %v545_v24 = vld [vmem:[#allocation2 + $0xea] ss:$2 sm:$0xff] }
  0xc0   : > { %2161 = vmatmul.mubr.bf16.gmra.mrb[40].mxu0 %v804_v21  ;;  %v809_v21 = vpack.c.bf16 %v548_v16, %v508_v13  ;;  %v511_v25 = vld [vmem:[#allocation2 + $0xc8] ss:$2 sm:$0xff] }
  0xc1   : > { %2226 = vmatmul.mubr.bf16.gmra.mrb[40].mxu1 %v806_v23  ;;  %6281 = vmatpush3.bf16.msra.mxu0 %v6882_v26  ;;  %v505_v23 = vld [vmem:[#allocation2 + $0xc6] ss:$2 sm:$0xff] }
  0xc2   : > { %6321 = vmatpush3.bf16.msra.mxu1 %v6883_v27  ;;  %6282 = vmatprep.subr.bf16.mxu0 %v6884_v28  ;;  %v551_v26 = vld [vmem:[#allocation2 + $0xec] ss:$2 sm:$0xff]  ;;  %v588_v27 = vld [vmem:[#allocation2 + $0x10f] ss:$2 sm:$0xff] }
  0xc3   : > { %6322 = vmatprep.subr.bf16.mxu1 %v6885_v29  ;;  %2168 = vmatprep.mubr.bf16.mxu0 %v821_v46  ;;  %v628_v28 = vld [vmem:[#allocation2 + $0x133] ss:$2 sm:$0xff]  ;;  %v810_v32 = vpack.c.bf16 %v551_v26, %v511_v25 }
  0xc4   : > { %2233 = vmatprep.mubr.bf16.mxu1 %v823_v51  ;;  %v594_v29 = vld [vmem:[#allocation2 + $0x111] ss:$2 sm:$0xff]  ;;  %v825_v33 = vpack.c.bf16 %v628_v28, %v588_v27 }
  0xc5   : > { %6283 = vmatpush3.bf16.msra.mxu0 %v6886_v30  ;;  %v634_v30 = vld [vmem:[#allocation2 + $0x135] ss:$2 sm:$0xff] }
  0xc6   : > { %6323 = vmatpush3.bf16.msra.mxu1 %v6887_v31  ;;  %6284 = vmatprep.subr.bf16.mxu0 %v6888_v35  ;;  %v808_v31 = vpack.c.bf16 %v545_v24, %v505_v23  ;;  %v827_v34 = vpack.c.bf16 %v634_v30, %v594_v29  ;;  %v585_v35 = vld [vmem:[#allocation2 + $0x10e] ss:$2 sm:$0xff]  ;;  %v6904_v30 = vld [vmem:[#allocation10 + $0x50] sm:$0xff]  }
  0xc7   : > { %6324 = vmatprep.subr.bf16.mxu1 %v6889_v38  ;;  %v631_v38 = vld [vmem:[#allocation2 + $0x134] ss:$2 sm:$0xff]  ;;  %v824_v39 = vpack.c.bf16 %v625_v36, %v585_v35  ;;  %v6908_v36 = vld [vmem:[#allocation10 + $0x58] sm:$0xff]  }
  0xc8   : > { %2169 = vmatmul.mubr.bf16.gmra.mrb[44].mxu0 %v820_v48  ;;  %v826_v40 = vpack.c.bf16 %v631_v38, %v591_v37  ;;  %v6899_v10 = vld [vmem:[#allocation10 + $0x80] sm:$0xff]   ;;  %v6902_v25 = vld [vmem:[#allocation10 + $0x8] sm:$0xff]   ;;  %v6909_v37 = vld [vmem:[#allocation10 + $0xd8] sm:$0xff]  }
  0xc9   : > { %6285 = vmatpush3.bf16.msra.mxu0 %v6890_v41  ;;  %2234 = vmatmul.mubr.bf16.gmra.mrb[44].mxu1 %v822_v52  ;;  %v6903_v26 = vld [vmem:[#allocation10 + $0x88] sm:$0xff]  }
  0xca   : > { %6325 = vmatpush3.bf16.msra.mxu1 %v6891_v42  ;;  %6286 = vmatprep.subr.bf16.mxu0 %v6892_v43 }
  0xcb   : > { %6326 = vmatprep.subr.bf16.mxu1 %v6893_v50  ;;  %2274 = vmatprep.mubr.bf16.mxu0 %v777_v58 }
  0xcc   : > { %2339 = vmatprep.mubr.bf16.mxu1 %v779_v62 }
  0xcd   : > { %6287 = vmatpush3.bf16.msra.mxu0 %v6894_v53 }
  0xce   : > { %6327 = vmatpush3.bf16.msra.mxu1 %v6895_v54 }
  0xd0   : > { %2275 = vmatmul.mubr.bf16.vlgmr.msra.gmra.mrb[48].mxu0 %v776_v5  ;;  %v7284_v5 = vmov 0.0  }
  0xd1   : > { %2340 = vmatmul.mubr.bf16.vlgmr.msra.gmra.mrb[48].mxu1 %v778_v6  ;;  %2282 = vmatprep.mubr.bf16.mxu0 %v793_v7  ;;  %2405 = vst [vmem:[#allocation3 + $0x8] sm:$0xff] %v7284_v5  ;;  %2406 = vst [vmem:[#allocation3 + $0x10] sm:$0xff] %v7284_v5  ;;  %v6896_v6 = vld [vmem:[#allocation10 + $0x40] sm:$0xff]  }
  0xd2   : > { %2347 = vmatprep.mubr.bf16.mxu1 %v795_v8  ;;  %2404 = vst [vmem:[#allocation3] sm:$0xff] %v7284_v5  ;;  %2407 = vst [vmem:[#allocation3 + $0x18] sm:$0xff] %v7284_v5  ;;  %v6897_v7 = vld [vmem:[#allocation10 + $0xc0] sm:$0xff]   ;;  %6352 = vmatprep.subr.bf16.mxu0 %v6896_v6  ;;  %v6924_v6 = vld [vmem:[#allocation10 + $0x78] sm:$0xff]  }
  0xd3   : > { %2408 = vst [vmem:[#allocation3 + $0x20] sm:$0xff] %v7284_v5  ;;  %2409 = vst [vmem:[#allocation3 + $0x28] sm:$0xff] %v7284_v5  ;;  %6374 = vmatprep.subr.bf16.mxu1 %v6897_v7  ;;  %6353 = vmatpush3.bf16.msra.mxu0 %v6898_v9  ;;  %v6925_v7 = vld [vmem:[#allocation10 + $0xf8] sm:$0xff]  }
  0xd4   : > { %2410 = vst [vmem:[#allocation3 + $0x30] sm:$0xff] %v7284_v5  ;;  %2411 = vst [vmem:[#allocation3 + $0x38] sm:$0xff] %v7284_v5  ;;  %6375 = vmatpush3.bf16.msra.mxu1 %v6899_v10  ;;  %v6926_v10 = vld [vmem:[#allocation10 + $0x38] sm:$0xff]  }
  0xd5   : > { %2412 = vst [vmem:[#allocation3 + $0x40] sm:$0xff] %v7284_v5  ;;  %2413 = vst [vmem:[#allocation3 + $0x48] sm:$0xff] %v7284_v5 }
  0xd6   : > { %2414 = vst [vmem:[#allocation3 + $0x50] sm:$0xff] %v7284_v5  ;;  %2415 = vst [vmem:[#allocation3 + $0x58] sm:$0xff] %v7284_v5 }
  0xd7   : > { %2416 = vst [vmem:[#allocation3 + $0x60] sm:$0xf] %v7284_v5  ;;  %4104 = vst [vmem:[#allocation4] sm:$0xff] %v7284_v5 }
  0xd8   : > { %2283 = vmatmul.mubr.bf16.gmra.mrb[52].mxu0 %v792_v19  ;;  %4105 = vst [vmem:[#allocation4 + $0x8] sm:$0xff] %v7284_v5  ;;  %4114 = vst [vmem:[#allocation7] sm:$0xff] %v7284_v5 }
  0xd9   : > { %2348 = vmatmul.mubr.bf16.gmra.mrb[52].mxu1 %v794_v20  ;;  %2290 = vmatprep.mubr.bf16.mxu0 %v809_v21  ;;  %4115 = vst [vmem:[#allocation7 + $0x8] sm:$0xff] %v7284_v5  ;;  %4116 = vst [vmem:[#allocation7 + $0x10] sm:$0xff] %v7284_v5  ;;  %v6900_v21 = vld [vmem:[#allocation10 + $0x48] sm:$0xff]   ;;  %v2436_v28 = vld [vmem:[#allocation3 + $0x1] ss:$2 sm:$0xf] }
  0xda   : > { %2355 = vmatprep.mubr.bf16.mxu1 %v811_v22  ;;  %4117 = vst [vmem:[#allocation7 + $0x18] sm:$0xff] %v7284_v5  ;;  %4118 = vst [vmem:[#allocation7 + $0x20] sm:$0xff] %v7284_v5  ;;  %v6901_v22 = vld [vmem:[#allocation10 + $0xc8] sm:$0xff]   ;;  %6354 = vmatprep.subr.bf16.mxu0 %v6900_v21  ;;  %v2442_v29 = vld [vmem:[#allocation3 + $0x3] ss:$2 sm:$0xf] }
  0xdb   : > { %4119 = vst [vmem:[#allocation7 + $0x28] sm:$0xff] %v7284_v5  ;;  %4120 = vst [vmem:[#allocation7 + $0x30] sm:$0xff] %v7284_v5  ;;  %6376 = vmatprep.subr.bf16.mxu1 %v6901_v22  ;;  %6355 = vmatpush3.bf16.msra.mxu0 %v6902_v25  ;;  %v2439_v35 = vld [vmem:[#allocation3 + $0x2] ss:$2 sm:$0xf] }
  0xdc   : > { %4121 = vst [vmem:[#allocation7 + $0x38] sm:$0xff] %v7284_v5  ;;  %4122 = vst [vmem:[#allocation7 + $0x40] sm:$0xff] %v7284_v5  ;;  %6377 = vmatpush3.bf16.msra.mxu1 %v6903_v26  ;;  %6356 = vmatprep.subr.bf16.mxu0 %v6904_v30  ;;  %v6928_v26 = vld [vmem:[#allocation10 + $0x140] sm:$0xff]  }
  0xdd   : > { %4123 = vst [vmem:[#allocation7 + $0x48] sm:$0xff] %v7284_v5  ;;  %4124 = vst [vmem:[#allocation7 + $0x50] sm:$0xff] %v7284_v5 }
  0xde   : > { %4125 = vst [vmem:[#allocation7 + $0x58] sm:$0xff] %v7284_v5  ;;  %4126 = vst [vmem:[#allocation7 + $0x60] sm:$0xff] %v7284_v5 }
  0xdf   : > { %4127 = vst [vmem:[#allocation7 + $0x68] sm:$0xff] %v7284_v5  ;;  %4128 = vst [vmem:[#allocation7 + $0x70] sm:$0xff] %v7284_v5 }
  0xe0   : > { %2291 = vmatmul.mubr.bf16.gmra.mrb[56].mxu0 %v808_v31  ;;  %4129 = vst [vmem:[#allocation7 + $0x78] sm:$0xff] %v7284_v5  ;;  %v6905_v31 = vld [vmem:[#allocation10 + $0xd0] sm:$0xff]   ;;  %2437 = vst [vmem:[#allocation6 + $0x8] sm:$0xf] %v2436_v28  ;;  %v6929_v28 = vld [vmem:[#allocation10 + $0x1c0] sm:$0xff]  }
  0xe1   : > { %2356 = vmatmul.mubr.bf16.gmra.mrb[56].mxu1 %v810_v32  ;;  %2298 = vmatprep.mubr.bf16.mxu0 %v825_v33  ;;  %2443 = vst [vmem:[#allocation6 + $0x18] sm:$0xf] %v2442_v29  ;;  %v2433_v32 = vld [vmem:[#allocation3] ss:$2 sm:$0xf]  ;;  %v6906_v33 = vld [vmem:[#allocation10 + $0x10] sm:$0xff]  }
  0xe2   : > { %2363 = vmatprep.mubr.bf16.mxu1 %v827_v34  ;;  %v6907_v34 = vld [vmem:[#allocation10 + $0x90] sm:$0xff]   ;;  %2434 = vst [vmem:[#allocation6] sm:$0xf] %v2433_v32  ;;  %6378 = vmatprep.subr.bf16.mxu1 %v6905_v31  ;;  %2440 = vst [vmem:[#allocation6 + $0x10] sm:$0xf] %v2439_v35 }
  0xe3   : > { %6357 = vmatpush3.bf16.msra.mxu0 %v6906_v33  ;;  %6379 = vmatpush3.bf16.msra.mxu1 %v6907_v34  ;;  %v6923_v5 = vld [vmem:[#allocation10 + $0xb0] sm:$0xff]  }
  0xe4   : > { %6358 = vmatprep.subr.bf16.mxu0 %v6908_v36  ;;  %6380 = vmatprep.subr.bf16.mxu1 %v6909_v37 }
  0xe8   : > { %2299 = vmatmul.mubr.bf16.gmra.mrb[60].mxu0 %v824_v39 }
  0xe9   : > { %2364 = vmatmul.mubr.bf16.gmra.mrb[60].mxu1 %v826_v40  ;;  %v6910_v40 = vld [vmem:[#allocation10 + $0x18] sm:$0xff]  }
  0xea   : > { %6359 = vmatpush3.bf16.msra.mxu0 %v6910_v40 }
 0x143   : > { %v6048_v41 = vpop.f32.mrb[0].mxu0 }
 0x144   : > { %v6088_v42 = vpop.f32.mrb[0].mxu1  ;;  %v6049_v43 = vpop.f32.mrb[1].mxu0 }
 0x145   : > { %v6089_v44 = vpop.f32.mrb[1].mxu1  ;;  %v6050_v45 = vadd.f32 %v6049_v43, %v6048_v41  ;;  %v6051_v47 = vpop.f32.mrb[2].mxu0  ;;  %v6911_v41 = vld [vmem:[#allocation10 + $0x98] sm:$0xff]  }
 0x146   : > { %v6090_v46 = vadd.f32 %v6089_v44, %v6088_v42  ;;  %v6091_v48 = vpop.f32.mrb[2].mxu1  ;;  %v6052_v49 = vpop.f32.mrb[3].mxu0  ;;  %6381 = vmatpush3.bf16.msra.mxu1 %v6911_v41 }
 0x147   : > { %v6092_v50 = vpop.f32.mrb[3].mxu1  ;;  %v6053_v52 = vadd.f32 %v6052_v49, %v6051_v47 }
 0x148   : > { %v7863_v51 = vadd.f32 %v6090_v46, %v6050_v45  ;;  %v6093_v53 = vadd.f32 %v6092_v50, %v6091_v48  ;;  %v6912_v50 = vld [vmem:[#allocation10 + $0x60] sm:$0xff]  }
 0x149   : > { %6360 = vmatprep.subr.bf16.mxu0 %v6912_v50 }
 0x14a   : > { %v7865_v54 = vadd.f32 %v6093_v53, %v6053_v52  ;;  %v6913_v52 = vld [vmem:[#allocation10 + $0xe0] sm:$0xff]  }
 0x14b   : > { %v6054_v55 = vpop.f32.mrb[4].mxu0  ;;  %6382 = vmatprep.subr.bf16.mxu1 %v6913_v52 }
 0x14c   : > { %v6094_v56 = vpop.f32.mrb[4].mxu1  ;;  %v6055_v57 = vpop.f32.mrb[5].mxu0 }
 0x14d   : > { %v6095_v58 = vpop.f32.mrb[5].mxu1  ;;  %v6056_v59 = vadd.f32 %v6055_v57, %v6054_v55  ;;  %v6057_v61 = vpop.f32.mrb[6].mxu0  ;;  %v6914_v57 = vld [vmem:[#allocation10 + $0x20] sm:$0xff]  }
 0x14e   : > { %v6096_v60 = vadd.f32 %v6095_v58, %v6094_v56  ;;  %v6097_v62 = vpop.f32.mrb[6].mxu1  ;;  %v6058_v63 = vpop.f32.mrb[7].mxu0  ;;  %v6915_v58 = vld [vmem:[#allocation10 + $0xa0] sm:$0xff]   ;;  %6361 = vmatpush3.bf16.msra.mxu0 %v6914_v57 }
 0x14f   : > { %v6098_v0 = vpop.f32.mrb[7].mxu1  ;;  %v6059_v2 = vadd.f32 %v6058_v63, %v6057_v61  ;;  %6383 = vmatpush3.bf16.msra.mxu1 %v6915_v58  ;;  %v6917_v61 = vld [vmem:[#allocation10 + $0xe8] sm:$0xff]  }
 0x150   : > { %v7867_v1 = vadd.f32 %v6096_v60, %v6056_v59  ;;  %v6099_v3 = vadd.f32 %v6098_v0, %v6097_v62  ;;  %v6916_v60 = vld [vmem:[#allocation10 + $0x68] sm:$0xff]   ;;  %6384 = vmatprep.subr.bf16.mxu1 %v6917_v61  ;;  %v6920_v0 = vld [vmem:[#allocation10 + $0x70] sm:$0xff]  }
 0x151   : > { %v6918_v62 = vld [vmem:[#allocation10 + $0x28] sm:$0xff]   ;;  %6362 = vmatprep.subr.bf16.mxu0 %v6916_v60 }
 0x152   : > { %v7869_v4 = vadd.f32 %v6099_v3, %v6059_v2  ;;  %v6919_v63 = vld [vmem:[#allocation10 + $0xa8] sm:$0xff]   ;;  %v6921_v2 = vld [vmem:[#allocation10 + $0xf0] sm:$0xff]   ;;  %6363 = vmatpush3.bf16.msra.mxu0 %v6918_v62 }
 0x153   : > { %v6060_v8 = vpop.f32.mrb[8].mxu0  ;;  %6385 = vmatpush3.bf16.msra.mxu1 %v6919_v63  ;;  %v6922_v3 = vld [vmem:[#allocation10 + $0x30] sm:$0xff]   ;;  %6364 = vmatprep.subr.bf16.mxu0 %v6920_v0 }
 0x154   : > { %v6100_v11 = vpop.f32.mrb[8].mxu1  ;;  %v6061_v12 = vpop.f32.mrb[9].mxu0  ;;  %6386 = vmatprep.subr.bf16.mxu1 %v6921_v2  ;;  %v2679_v62 = vld [vmem:[#allocation3 + $0x5b] ss:$2 sm:$0xf] }
 0x155   : > { %v6062_v13 = vadd.f32 %v6061_v12, %v6060_v8  ;;  %v6101_v14 = vpop.f32.mrb[9].mxu1  ;;  %v6063_v15 = vpop.f32.mrb[10].mxu0  ;;  %v2691_v63 = vld [vmem:[#allocation3 + $0x5d] ss:$2 sm:$0xf]  ;;  %v2681_v0 = vrot.slane %v2679_v62, 4 }
 0x156   : > { %v6102_v16 = vadd.f32 %v6101_v14, %v6100_v11  ;;  %v6103_v17 = vpop.f32.mrb[10].mxu1  ;;  %v6064_v18 = vpop.f32.mrb[11].mxu0  ;;  %v6927_v11 = vld [vmem:[#allocation10 + $0xb8] sm:$0xff]   ;;  %6365 = vmatpush3.bf16.msra.mxu0 %v6922_v3  ;;  %v2693_v2 = vrot.slane %v2691_v63, 4 }
 0x157   : > { %v6065_v19 = vadd.f32 %v6064_v18, %v6063_v15  ;;  %v6104_v20 = vpop.f32.mrb[11].mxu1  ;;  %6387 = vmatpush3.bf16.msra.mxu1 %v6923_v5  ;;  %6366 = vmatprep.subr.bf16.mxu0 %v6924_v6  ;;  %2683 = vst [vmem:[#allocation6 + $0xe8] sm:$0xf0] %v2681_v0 }
 0x158   : > { %v7871_v23 = vadd.f32 %v6102_v16, %v6062_v13  ;;  %v6105_v24 = vadd.f32 %v6104_v20, %v6103_v17  ;;  %6388 = vmatprep.subr.bf16.mxu1 %v6925_v7  ;;  %2695 = vst [vmem:[#allocation6 + $0xf8] sm:$0xf0] %v2693_v2 }
 0x15a   : > { %v7873_v27 = vadd.f32 %v6105_v24, %v6065_v19  ;;  %6367 = vmatpush3.bf16.msra.mxu0 %v6926_v10 }
 0x15b   : > { %v6066_v38 = vpop.f32.mrb[12].mxu0  ;;  %6389 = vmatpush3.bf16.msra.mxu1 %v6927_v11  ;;  %6396 = vmatprep.subr.bf16.mxu0 %v6928_v26 }
 0x15c   : > { %v6106_v39 = vpop.f32.mrb[12].mxu1  ;;  %v6067_v42 = vpop.f32.mrb[13].mxu0  ;;  %6418 = vmatprep.subr.bf16.mxu1 %v6929_v28 }
 0x15d   : > { %v6107_v43 = vpop.f32.mrb[13].mxu1  ;;  %v6068_v44 = vadd.f32 %v6067_v42, %v6066_v38  ;;  %v6069_v46 = vpop.f32.mrb[14].mxu0 }
 0x15e   : > { %v6108_v45 = vadd.f32 %v6107_v43, %v6106_v39  ;;  %v6109_v47 = vpop.f32.mrb[14].mxu1  ;;  %v6070_v48 = vpop.f32.mrb[15].mxu0 }
 0x15f   : > { %v6110_v49 = vpop.f32.mrb[15].mxu1  ;;  %v6071_v55 = vadd.f32 %v6070_v48, %v6069_v46 }
 0x160   : > { %v7875_v53 = vadd.f32 %v6108_v45, %v6068_v44  ;;  %v6111_v56 = vadd.f32 %v6110_v49, %v6109_v47 }
 0x162   : > { %v7877_v59 = vadd.f32 %v6111_v56, %v6071_v55 }
 0x163   : > { %v6128_v8 = vpop.f32.mrb[16].mxu0 }
 0x164   : > { %v6168_v9 = vpop.f32.mrb[16].mxu1  ;;  %v6129_v12 = vpop.f32.mrb[17].mxu0 }
 0x165   : > { %v6169_v13 = vpop.f32.mrb[17].mxu1  ;;  %v6130_v14 = vadd.f32 %v6129_v12, %v6128_v8  ;;  %v6131_v16 = vpop.f32.mrb[18].mxu0 }
 0x166   : > { %v6170_v15 = vadd.f32 %v6169_v13, %v6168_v9  ;;  %v6171_v17 = vpop.f32.mrb[18].mxu1  ;;  %v6132_v18 = vpop.f32.mrb[19].mxu0  ;;  %v2685_v13 = vld [vmem:[#allocation3 + $0x5c] ss:$2 sm:$0xf] }
 0x167   : > { %v6172_v19 = vpop.f32.mrb[19].mxu1  ;;  %v2017_v20 = vadd.f32 %v6130_v14, %v7863_v51  ;;  %v6133_v21 = vadd.f32 %v6132_v18, %v6131_v16 }
 0x168   : > { %v6173_v22 = vadd.f32 %v6172_v19, %v6171_v17 }
 0x169   : > { %v7880_v24 = vadd.f32 %v6170_v15, %v2017_v20  ;;  %v2020_v25 = vadd.f32 %v6133_v21, %v7865_v54  ;;  %v2687_v15 = vrot.slane %v2685_v13, 4 }
 0x16b   : > { %v7883_v29 = vadd.f32 %v6173_v22, %v2020_v25  ;;  %v6134_v30 = vpop.f32.mrb[20].mxu0  ;;  %2689 = vst [vmem:[#allocation6 + $0xf0] sm:$0xf0] %v2687_v15 }
 0x16c   : > { %v6174_v31 = vpop.f32.mrb[20].mxu1  ;;  %v6135_v32 = vpop.f32.mrb[21].mxu0 }
 0x16d   : > { %v6175_v33 = vpop.f32.mrb[21].mxu1  ;;  %v6136_v34 = vadd.f32 %v6135_v32, %v6134_v30  ;;  %v6137_v35 = vpop.f32.mrb[22].mxu0 }
 0x16e   : > { %v6176_v51 = vadd.f32 %v6175_v33, %v6174_v31  ;;  %v6177_v36 = vpop.f32.mrb[22].mxu1  ;;  %v6138_v37 = vpop.f32.mrb[23].mxu0 }
 0x16f   : > { %v6178_v38 = vpop.f32.mrb[23].mxu1  ;;  %v2025_v54 = vadd.f32 %v6136_v34, %v7867_v1  ;;  %v6139_v39 = vadd.f32 %v6138_v37, %v6137_v35 }
 0x170   : > { %v6179_v40 = vadd.f32 %v6178_v38, %v6177_v36 }
 0x171   : > { %v7886_v41 = vadd.f32 %v6176_v51, %v2025_v54  ;;  %v2028_v42 = vadd.f32 %v6139_v39, %v7869_v4 }
 0x173   : > { %v7889_v43 = vadd.f32 %v6179_v40, %v2028_v42  ;;  %v6140_v44 = vpop.f32.mrb[24].mxu0 }
 0x174   : > { %v6180_v45 = vpop.f32.mrb[24].mxu1  ;;  %v6141_v46 = vpop.f32.mrb[25].mxu0 }
 0x175   : > { %v6142_v47 = vadd.f32 %v6141_v46, %v6140_v44  ;;  %v6181_v48 = vpop.f32.mrb[25].mxu1  ;;  %v6143_v49 = vpop.f32.mrb[26].mxu0 }
 0x176   : > { %v6182_v50 = vadd.f32 %v6181_v48, %v6180_v45  ;;  %v6183_v52 = vpop.f32.mrb[26].mxu1  ;;  %v6144_v55 = vpop.f32.mrb[27].mxu0 }
 0x177   : > { %v2033_v56 = vadd.f32 %v6142_v47, %v7871_v23  ;;  %v6145_v1 = vadd.f32 %v6144_v55, %v6143_v49  ;;  %v6184_v57 = vpop.f32.mrb[27].mxu1  ;;  %v2673_v23 = vld [vmem:[#allocation3 + $0x5a] ss:$2 sm:$0xf] }
 0x178   : > { %v6185_v58 = vadd.f32 %v6184_v57, %v6183_v52  ;;  %v2675_v12 = vrot.slane %v2673_v23, 4 }
 0x179   : > { %v7892_v60 = vadd.f32 %v6182_v50, %v2033_v56  ;;  %v2036_v4 = vadd.f32 %v6145_v1, %v7873_v27 }
 0x17a   : > { %2677 = vst [vmem:[#allocation6 + $0xe0] sm:$0xf0] %v2675_v12 }
 0x17b   : > { %v7895_v61 = vadd.f32 %v6185_v58, %v2036_v4  ;;  %v6146_v3 = vpop.f32.mrb[28].mxu0 }
 0x17c   : > { %v6186_v5 = vpop.f32.mrb[28].mxu1  ;;  %v6147_v6 = vpop.f32.mrb[29].mxu0 }
 0x17d   : > { %v6187_v7 = vpop.f32.mrb[29].mxu1  ;;  %v6148_v8 = vadd.f32 %v6147_v6, %v6146_v3  ;;  %v6149_v10 = vpop.f32.mrb[30].mxu0 }
 0x17e   : > { %v6188_v9 = vadd.f32 %v6187_v7, %v6186_v5  ;;  %v6189_v11 = vpop.f32.mrb[30].mxu1  ;;  %v6150_v27 = vpop.f32.mrb[31].mxu0 }
 0x17f   : > { %v6190_v14 = vpop.f32.mrb[31].mxu1  ;;  %v2041_v16 = vadd.f32 %v6148_v8, %v7875_v53  ;;  %v6151_v17 = vadd.f32 %v6150_v27, %v6149_v10 }
 0x180   : > { %v6191_v18 = vadd.f32 %v6190_v14, %v6189_v11 }
 0x181   : > { %v2106_v19 = vadd.f32 %v6188_v9, %v2041_v16  ;;  %v2044_v20 = vadd.f32 %v6151_v17, %v7877_v59 }
 0x183   : > { %v7899_v21 = vadd.f32 %v6191_v18, %v2044_v20  ;;  %v6208_v22 = vpop.f32.mrb[32].mxu0 }
 0x184   : > { %v6248_v25 = vpop.f32.mrb[32].mxu1  ;;  %v6209_v26 = vpop.f32.mrb[33].mxu0 }
 0x185   : > { %v6249_v28 = vpop.f32.mrb[33].mxu1  ;;  %v6210_v30 = vadd.f32 %v6209_v26, %v6208_v22  ;;  %v6211_v32 = vpop.f32.mrb[34].mxu0 }
 0x186   : > { %v6250_v31 = vadd.f32 %v6249_v28, %v6248_v25  ;;  %v6251_v33 = vpop.f32.mrb[34].mxu1  ;;  %v6212_v34 = vpop.f32.mrb[35].mxu0 }
 0x187   : > { %v6252_v51 = vpop.f32.mrb[35].mxu1  ;;  %v2147_v53 = vadd.f32 %v6210_v30, %v7880_v24  ;;  %v6213_v35 = vadd.f32 %v6212_v34, %v6211_v32 }
 0x188   : > { %v6253_v36 = vadd.f32 %v6252_v51, %v6251_v33 }
 0x189   : > { %v2212_v37 = vadd.f32 %v6250_v31, %v2147_v53  ;;  %v2150_v38 = vadd.f32 %v6213_v35, %v7883_v29 }
 0x18b   : > { %v7903_v59 = vadd.f32 %v6253_v36, %v2150_v38  ;;  %v6214_v54 = vpop.f32.mrb[36].mxu0 }
 0x18c   : > { %v6254_v39 = vpop.f32.mrb[36].mxu1  ;;  %v6215_v40 = vpop.f32.mrb[37].mxu0 }
 0x18d   : > { %v6255_v42 = vpop.f32.mrb[37].mxu1  ;;  %v6216_v44 = vadd.f32 %v6215_v40, %v6214_v54  ;;  %v6217_v46 = vpop.f32.mrb[38].mxu0 }
 0x18e   : > { %v6256_v45 = vadd.f32 %v6255_v42, %v6254_v39  ;;  %v6257_v47 = vpop.f32.mrb[38].mxu1  ;;  %v6218_v48 = vpop.f32.mrb[39].mxu0 }
 0x18f   : > { %v6258_v49 = vpop.f32.mrb[39].mxu1  ;;  %v2155_v50 = vadd.f32 %v6216_v44, %v7886_v41  ;;  %v6219_v24 = vadd.f32 %v6218_v48, %v6217_v46 }
 0x190   : > { %v6259_v52 = vadd.f32 %v6258_v49, %v6257_v47 }
 0x191   : > { %v7906_v55 = vadd.f32 %v6256_v45, %v2155_v50  ;;  %v2158_v29 = vadd.f32 %v6219_v24, %v7889_v43 }
 0x193   : > { %v7909_v56 = vadd.f32 %v6259_v52, %v2158_v29  ;;  %v6220_v1 = vpop.f32.mrb[40].mxu0 }
 0x194   : > { %v6260_v57 = vpop.f32.mrb[40].mxu1  ;;  %v6221_v58 = vpop.f32.mrb[41].mxu0 }
 0x195   : > { %v6222_v4 = vadd.f32 %v6221_v58, %v6220_v1  ;;  %v6261_v62 = vpop.f32.mrb[41].mxu1  ;;  %v6223_v63 = vpop.f32.mrb[42].mxu0 }
 0x196   : > { %v6262_v0 = vadd.f32 %v6261_v62, %v6260_v57  ;;  %v6263_v2 = vpop.f32.mrb[42].mxu1  ;;  %v6224_v3 = vpop.f32.mrb[43].mxu0 }
 0x197   : > { %v2163_v5 = vadd.f32 %v6222_v4, %v7892_v60  ;;  %v6225_v41 = vadd.f32 %v6224_v3, %v6223_v63  ;;  %v6264_v6 = vpop.f32.mrb[43].mxu1 }
 0x198   : > { %v6265_v7 = vadd.f32 %v6264_v6, %v6263_v2 }
 0x199   : > { %v7912_v23 = vadd.f32 %v6262_v0, %v2163_v5  ;;  %v2166_v43 = vadd.f32 %v6225_v41, %v7895_v61 }
 0x19b   : > { %v7915_v8 = vadd.f32 %v6265_v7, %v2166_v43  ;;  %v6226_v9 = vpop.f32.mrb[44].mxu0 }
 0x19c   : > { %v6266_v10 = vpop.f32.mrb[44].mxu1  ;;  %v6227_v11 = vpop.f32.mrb[45].mxu0 }
 0x19d   : > { %v6228_v12 = vadd.f32 %v6227_v11, %v6226_v9  ;;  %v6267_v13 = vpop.f32.mrb[45].mxu1  ;;  %v6229_v27 = vpop.f32.mrb[46].mxu0 }
 0x19e   : > { %v6268_v14 = vadd.f32 %v6267_v13, %v6266_v10  ;;  %v6269_v15 = vpop.f32.mrb[46].mxu1  ;;  %v6230_v16 = vpop.f32.mrb[47].mxu0 }
 0x19f   : > { %v2171_v17 = vadd.f32 %v6228_v12, %v2106_v19  ;;  %v6231_v60 = vadd.f32 %v6230_v16, %v6229_v27  ;;  %v6270_v18 = vpop.f32.mrb[47].mxu1 }
 0x1a0   : > { %v6271_v20 = vadd.f32 %v6270_v18, %v6269_v15 }
 0x1a1   : > { %v7917_v22 = vadd.f32 %v6268_v14, %v2171_v17  ;;  %v2174_v25 = vadd.f32 %v6231_v60, %v7899_v21 }
 0x1a3   : > { %v7920_v61 = vadd.f32 %v6271_v20, %v2174_v25  ;;  %v6288_v26 = vpop.f32.mrb[48].mxu0 }
 0x1a4   : > { %v6328_v28 = vpop.f32.mrb[48].mxu1  ;;  %v6289_v30 = vpop.f32.mrb[49].mxu0 }
 0x1a5   : > { %v6290_v31 = vadd.f32 %v6289_v30, %v6288_v26  ;;  %v6329_v32 = vpop.f32.mrb[49].mxu1  ;;  %v6291_v33 = vpop.f32.mrb[50].mxu0 }
 0x1a6   : > { %v6330_v34 = vadd.f32 %v6329_v32, %v6328_v28  ;;  %v6331_v51 = vpop.f32.mrb[50].mxu1  ;;  %v6292_v53 = vpop.f32.mrb[51].mxu0 }
 0x1a7   : > { %v2277_v35 = vadd.f32 %v6290_v31, %v2212_v37  ;;  %v6293_v19 = vadd.f32 %v6292_v53, %v6291_v33  ;;  %v6332_v36 = vpop.f32.mrb[51].mxu1 }
 0x1a8   : > { %v6333_v38 = vadd.f32 %v6332_v36, %v6331_v51 }
 0x1a9   : > { %v2342_v54 = vadd.f32 %v6330_v34, %v2277_v35  ;;  %v2280_v39 = vadd.f32 %v6293_v19, %v7903_v59 }
 0x1ab   : > { %vm2372_vm0 = vcmp.ge.f32.partialorder %v2342_v54, 0.0  ;;  %v2380_v21 = vmul.f32 0.2, %v2342_v54  ;;  %v2345_v40 = vadd.f32 %v6333_v38, %v2280_v39  ;;  %v6294_v42 = vpop.f32.mrb[52].mxu0 }
 0x1ac   : > { %v6334_v44 = vpop.f32.mrb[52].mxu1  ;;  %v6295_v45 = vpop.f32.mrb[53].mxu0 }
 0x1ad   : > { %v2388_v46 = vsel %vm2372_vm0, %v2342_v54, %v2380_v21  ;;  %vm2373_vm1 = vcmp.ge.f32.partialorder %v2345_v40, 0.0  ;;  %v2381_v47 = vmul.f32 0.2, %v2345_v40  ;;  %v6296_v48 = vadd.f32 %v6295_v45, %v6294_v42  ;;  %v6335_v49 = vpop.f32.mrb[53].mxu1  ;;  %v6297_v50 = vpop.f32.mrb[54].mxu0 }
 0x1ae   : > { %2418 = vst [vmem:[#allocation3 + $0xb] sm:$0xff] %v2388_v46  ;;  %v6336_v37 = vadd.f32 %v6335_v49, %v6334_v44  ;;  %v6337_v24 = vpop.f32.mrb[54].mxu1  ;;  %v6298_v52 = vpop.f32.mrb[55].mxu0 }
 0x1af   : > { %v2389_v29 = vsel %vm2373_vm1, %v2345_v40, %v2381_v47  ;;  %v2285_v1 = vadd.f32 %v6296_v48, %v7906_v55  ;;  %v6299_v59 = vadd.f32 %v6298_v52, %v6297_v50  ;;  %v6338_v57 = vpop.f32.mrb[55].mxu1 }
 0x1b0   : > { %2420 = vst [vmem:[#allocation3 + $0x15] sm:$0xff] %v2389_v29  ;;  %v6339_v58 = vadd.f32 %v6338_v57, %v6337_v24 }
 0x1b1   : > { %v2350_v4 = vadd.f32 %v6336_v37, %v2285_v1  ;;  %v2288_v62 = vadd.f32 %v6299_v59, %v7909_v56 }
 0x1b3   : > { %vm2374_vm2 = vcmp.ge.f32.partialorder %v2350_v4, 0.0  ;;  %v2382_v63 = vmul.f32 0.2, %v2350_v4  ;;  %v2353_v0 = vadd.f32 %v6339_v58, %v2288_v62  ;;  %v6300_v2 = vpop.f32.mrb[56].mxu0 }
 0x1b4   : > { %v6340_v3 = vpop.f32.mrb[56].mxu1  ;;  %v6301_v5 = vpop.f32.mrb[57].mxu0 }
 0x1b5   : > { %v2390_v41 = vsel %vm2374_vm2, %v2350_v4, %v2382_v63  ;;  %vm2375_vm3 = vcmp.ge.f32.partialorder %v2353_v0, 0.0  ;;  %v2383_v6 = vmul.f32 0.2, %v2353_v0  ;;  %v6302_v7 = vadd.f32 %v6301_v5, %v6300_v2  ;;  %v6341_v43 = vpop.f32.mrb[57].mxu1  ;;  %v6303_v9 = vpop.f32.mrb[58].mxu0 }
 0x1b6   : > { %2422 = vst [vmem:[#allocation3 + $0x1f] sm:$0xff] %v2390_v41  ;;  %v6342_v55 = vadd.f32 %v6341_v43, %v6340_v3  ;;  %v6343_v10 = vpop.f32.mrb[58].mxu1  ;;  %v6304_v11 = vpop.f32.mrb[59].mxu0  ;;  %v2448_v12 = vld [vmem:[#allocation3 + $0xb] ss:$2 sm:$0xf] }
 0x1b7   : > { %v2480_v13 = vld [vmem:[#allocation3 + $0x14] ss:$2 sm:$0xf]  ;;  %v2391_v56 = vsel %vm2375_vm3, %v2353_v0, %v2383_v6  ;;  %v2293_v14 = vadd.f32 %v6302_v7, %v7912_v23  ;;  %v6305_v15 = vadd.f32 %v6304_v11, %v6303_v9  ;;  %2449 = vst [vmem:[#allocation6 + $0x28] sm:$0xf] %v2448_v12  ;;  %v6344_v60 = vpop.f32.mrb[59].mxu1 }
 0x1b8   : > { %v2490_v27 = vld [vmem:[#allocation3 + $0x16] ss:$2 sm:$0xf]  ;;  %v2482_v16 = vrot.slane %v2480_v13, 4  ;;  %2424 = vst [vmem:[#allocation3 + $0x29] sm:$0xff] %v2391_v56  ;;  %v6345_v26 = vadd.f32 %v6344_v60, %v6343_v10 }
 0x1b9   : > { %v2492_v17 = vrot.slane %v2490_v27, 4  ;;  %v2485_v18 = vld [vmem:[#allocation3 + $0x15] ss:$2 sm:$0xf]  ;;  %v2358_v20 = vadd.f32 %v6342_v55, %v2293_v14  ;;  %v2296_v25 = vadd.f32 %v6305_v15, %v7915_v8 }
 0x1ba   : > { %v2487_v28 = vrot.slane %v2485_v18, 4  ;;  %v2495_v30 = vld [vmem:[#allocation3 + $0x17] ss:$2 sm:$0xf]  ;;  %2484 = vst [vmem:[#allocation6] sm:$0xf0] %v2482_v16 }
 0x1bb   : > { %2494 = vst [vmem:[#allocation6 + $0x10] sm:$0xf0] %v2492_v17  ;;  %v2497_v31 = vrot.slane %v2495_v30, 4  ;;  %v2454_v32 = vld [vmem:[#allocation3 + $0xd] ss:$2 sm:$0xf]  ;;  %v2361_v23 = vadd.f32 %v6345_v26, %v2296_v25 }
 0x1bc   : > { %vm2376_vm4 = vcmp.ge.f32.partialorder %v2358_v20, 0.0  ;;  %v2384_v33 = vmul.f32 0.2, %v2358_v20  ;;  %v6306_v34 = vpop.f32.mrb[60].mxu0  ;;  %2489 = vst [vmem:[#allocation6 + $0x8] sm:$0xf0] %v2487_v28 }
 0x1bd   : > { %2455 = vst [vmem:[#allocation6 + $0x38] sm:$0xf] %v2454_v32  ;;  %v6307_v51 = vpop.f32.mrb[61].mxu0  ;;  %v6346_v53 = vpop.f32.mrb[60].mxu1  ;;  %2499 = vst [vmem:[#allocation6 + $0x18] sm:$0xf0] %v2497_v31 }
 0x1be   : > { %v2445_v35 = vld [vmem:[#allocation3 + $0xa] ss:$2 sm:$0xf]  ;;  %v2392_v19 = vsel %vm2376_vm4, %v2358_v20, %v2384_v33  ;;  %vm2377_vm5 = vcmp.ge.f32.partialorder %v2361_v23, 0.0  ;;  %v2385_v8 = vmul.f32 0.2, %v2361_v23  ;;  %v6308_v36 = vadd.f32 %v6307_v51, %v6306_v34 }
 0x1bf   : > { %v6309_v38 = vpop.f32.mrb[62].mxu0  ;;  %v6347_v54 = vpop.f32.mrb[61].mxu1  ;;  %2446 = vst [vmem:[#allocation6 + $0x20] sm:$0xf] %v2445_v35  ;;  %2426 = vst [vmem:[#allocation3 + $0x33] sm:$0xff] %v2392_v19  ;;  %v6930_v34 = vld [vmem:[#allocation10 + $0x100] sm:$0xff]  }
 0x1c0   : > { %v6310_v39 = vpop.f32.mrb[63].mxu0  ;;  %v6348_v21 = vadd.f32 %v6347_v54, %v6346_v53  ;;  %v6349_v40 = vpop.f32.mrb[62].mxu1  ;;  %v2505_v42 = vld [vmem:[#allocation3 + $0x1f] ss:$2 sm:$0xf]  ;;  %v2393_v46 = vsel %vm2377_vm5, %v2361_v23, %v2385_v8  ;;  %v2301_v47 = vadd.f32 %v6308_v36, %v7917_v22  ;;  %v6931_v8 = vld [vmem:[#allocation10 + $0x180] sm:$0xff]  }
 0x1c1   : > { %v2568_v44 = vld [vmem:[#allocation3 + $0x28] ss:$2 sm:$0xf]  ;;  %v6311_v48 = vadd.f32 %v6310_v39, %v6309_v38  ;;  %2428 = vst [vmem:[#allocation3 + $0x3d] sm:$0xff] %v2393_v46  ;;  %v6350_v49 = vpop.f32.mrb[63].mxu1  ;;  %v2507_v37 = vrot.slane %v2505_v42, 4 }
 0x1c2   : > { %v2572_v45 = vld [vmem:[#allocation3 + $0x2a] ss:$2 sm:$0xf]  ;;  %2569 = vst [vmem:[#allocation6 + $0x80] sm:$0xf] %v2568_v44  ;;  %v2366_v52 = vadd.f32 %v6348_v21, %v2301_v47  ;;  %v6351_v29 = vadd.f32 %v6350_v49, %v6349_v40  ;;  %v2696_v20 = vld [vmem:[#allocation6] sm:$0xff] }
 0x1c3   : > { %2573 = vst [vmem:[#allocation6 + $0x90] sm:$0xf] %v2572_v45  ;;  %v2570_v50 = vld [vmem:[#allocation3 + $0x29] ss:$2 sm:$0xf]  ;;  %v2304_v24 = vadd.f32 %v6311_v48, %v7920_v61  ;;  %v2697_v28 = vld [vmem:[#allocation6 + $0x8] sm:$0xff] }
 0x1c4   : > { %2571 = vst [vmem:[#allocation6 + $0x88] sm:$0xf] %v2570_v50  ;;  %v2574_v1 = vld [vmem:[#allocation3 + $0x2b] ss:$2 sm:$0xf]  ;;  %vm2378_vm6 = vcmp.ge.f32.partialorder %v2366_v52, 0.0 }
 0x1c5   : > { %2575 = vst [vmem:[#allocation6 + $0x98] sm:$0xf] %v2574_v1  ;;  %2509 = vst [vmem:[#allocation6 + $0x28] sm:$0xf0] %v2507_v37  ;;  %v2386_v57 = vmul.f32 0.2, %v2366_v52  ;;  %v2369_v58 = vadd.f32 %v6351_v29, %v2304_v24 }
 0x1c6   : > { %v2515_v59 = vld [vmem:[#allocation3 + $0x21] ss:$2 sm:$0xf]  ;;  %v2500_v4 = vld [vmem:[#allocation3 + $0x1e] ss:$2 sm:$0xf] }
 0x1c7   : > { %v2517_v22 = vrot.slane %v2515_v59, 4  ;;  %v2451_v62 = vld [vmem:[#allocation3 + $0xc] ss:$2 sm:$0xf]  ;;  %v2394_v63 = vsel %vm2378_vm6, %v2366_v52, %v2386_v57  ;;  %vm2379_vm7 = vcmp.ge.f32.partialorder %v2369_v58, 0.0  ;;  %v2502_v3 = vrot.slane %v2500_v4, 4 }
 0x1c8   : > { %v2387_v0 = vmul.f32 0.2, %v2369_v58  ;;  %v2578_v2 = vld [vmem:[#allocation3 + $0x33] ss:$2 sm:$0xf]  ;;  %2430 = vst [vmem:[#allocation3 + $0x47] sm:$0xff] %v2394_v63 }
 0x1c9   : > { %2519 = vst [vmem:[#allocation6 + $0x38] sm:$0xf0] %v2517_v22  ;;  %2452 = vst [vmem:[#allocation6 + $0x30] sm:$0xf] %v2451_v62  ;;  %v2698_v30 = vld [vmem:[#allocation6 + $0x10] sm:$0xff]  ;;  %v6932_v36 = vld [vmem:[#allocation10 + $0x148] sm:$0xff]  }
 0x1ca   : > { %2579 = vst [vmem:[#allocation6 + $0xa8] sm:$0xf] %v2578_v2  ;;  %v2582_v61 = vld [vmem:[#allocation3 + $0x35] ss:$2 sm:$0xf]  ;;  %v2395_v6 = vsel %vm2379_vm7, %v2369_v58, %v2387_v0 }
 0x1cb   : > { %v2608_v5 = vld [vmem:[#allocation3 + $0x3c] ss:$2 sm:$0xf]  ;;  %2583 = vst [vmem:[#allocation6 + $0xb8] sm:$0xf] %v2582_v61  ;;  %2432 = vst [vmem:[#allocation3 + $0x51] sm:$0xff] %v2395_v6 }
 0x1cc   : > { %v2618_v41 = vld [vmem:[#allocation3 + $0x3e] ss:$2 sm:$0xf]  ;;  %v2610_v7 = vrot.slane %v2608_v5, 4  ;;  %2504 = vst [vmem:[#allocation6 + $0x20] sm:$0xf0] %v2502_v3 }
 0x1cd   : > { %v2620_v43 = vrot.slane %v2618_v41, 4  ;;  %v2613_v9 = vld [vmem:[#allocation3 + $0x3d] ss:$2 sm:$0xf]  ;;  %v2699_v39 = vld [vmem:[#allocation6 + $0x18] sm:$0xff] }
 0x1ce   : > { %v2615_v55 = vrot.slane %v2613_v9, 4  ;;  %v2623_v10 = vld [vmem:[#allocation3 + $0x3f] ss:$2 sm:$0xf]  ;;  %2612 = vst [vmem:[#allocation6 + $0x80] sm:$0xf0] %v2610_v7 }
 0x1cf   : > { %2622 = vst [vmem:[#allocation6 + $0x90] sm:$0xf0] %v2620_v43  ;;  %v2625_v11 = vrot.slane %v2623_v10, 4  ;;  %v2576_v12 = vld [vmem:[#allocation3 + $0x32] ss:$2 sm:$0xf] }
 0x1d0   : > { %2617 = vst [vmem:[#allocation6 + $0x88] sm:$0xf0] %v2615_v55  ;;  %2577 = vst [vmem:[#allocation6 + $0xa0] sm:$0xf] %v2576_v12  ;;  %v6933_v42 = vld [vmem:[#allocation10 + $0x1c8] sm:$0xff]   ;;  %v2701_v50 = vld [vmem:[#allocation6 + $0x28] sm:$0xff] }
 0x1d1   : > { %v2510_v13 = vld [vmem:[#allocation3 + $0x20] ss:$2 sm:$0xf]  ;;  %v2580_v27 = vld [vmem:[#allocation3 + $0x34] ss:$2 sm:$0xf] }
 0x1d2   : > { %2627 = vst [vmem:[#allocation6 + $0x98] sm:$0xf0] %v2625_v11  ;;  %v2512_v56 = vrot.slane %v2510_v13, 4  ;;  %2581 = vst [vmem:[#allocation6 + $0xb0] sm:$0xf] %v2580_v27  ;;  %v6934_v49 = vld [vmem:[#allocation10 + $0x108] sm:$0xff]  }
 0x1d3   : > { %v2460_v14 = vld [vmem:[#allocation3 + $0x15] ss:$2 sm:$0xf]  ;;  %v2633_v15 = vld [vmem:[#allocation3 + $0x47] ss:$2 sm:$0xf] }
 0x1d4   : > { %v2643_v16 = vld [vmem:[#allocation3 + $0x49] ss:$2 sm:$0xf]  ;;  %2461 = vst [vmem:[#allocation6 + $0x48] sm:$0xf] %v2460_v14  ;;  %v2635_v17 = vrot.slane %v2633_v15, 4 }
 0x1d5   : > { %v2645_v60 = vrot.slane %v2643_v16, 4  ;;  %v2628_v18 = vld [vmem:[#allocation3 + $0x46] ss:$2 sm:$0xf]  ;;  %2514 = vst [vmem:[#allocation6 + $0x30] sm:$0xf0] %v2512_v56 }
 0x1d6   : > { %v2630_v25 = vrot.slane %v2628_v18, 4  ;;  %v2638_v26 = vld [vmem:[#allocation3 + $0x48] ss:$2 sm:$0xf]  ;;  %2637 = vst [vmem:[#allocation6 + $0xa8] sm:$0xf0] %v2635_v17 }
 0x1d7   : > { %2647 = vst [vmem:[#allocation6 + $0xb8] sm:$0xf0] %v2645_v60  ;;  %v2640_v31 = vrot.slane %v2638_v26, 4  ;;  %v2527_v32 = vld [vmem:[#allocation3 + $0x29] ss:$2 sm:$0xf] }
 0x1d8   : > { %v2712_v33 = vld [vmem:[#allocation6 + $0x80] sm:$0xff]  ;;  %v2714_v23 = vld [vmem:[#allocation6 + $0x90] sm:$0xff]  ;;  %2632 = vst [vmem:[#allocation6 + $0xa0] sm:$0xf0] %v2630_v25  ;;  %v2529_v51 = vrot.slane %v2527_v32, 4  ;;  %v2713_v35 = vld [vmem:[#allocation6 + $0x88] sm:$0xff] }
 0x1d9   : > { %v2588_v53 = vld [vmem:[#allocation3 + $0x3d] ss:$2 sm:$0xf]  ;;  %v2728_v19 = vpack.c.bf16 %v2712_v33, %v2696_v20  ;;  %2642 = vst [vmem:[#allocation6 + $0xb0] sm:$0xf0] %v2640_v31  ;;  %v2729_v54 = vpack.c.bf16 %v2713_v35, %v2697_v28  ;;  %v2715_v21 = vld [vmem:[#allocation6 + $0x98] sm:$0xff]  ;;  %v2730_v40 = vpack.c.bf16 %v2714_v23, %v2698_v30 }
 0x1da   : > { %2589 = vst [vmem:[#allocation6 + $0xc8] sm:$0xf] %v2588_v53  ;;  %v2655_v38 = vld [vmem:[#allocation3 + $0x51] ss:$2 sm:$0xf]  ;;  %v2731_v46 = vpack.c.bf16 %v2715_v21, %v2699_v39  ;;  %v6936_v63 = vld [vmem:[#allocation10 + $0x150] sm:$0xff]  }
 0x1db   : > { %2531 = vst [vmem:[#allocation6 + $0x48] sm:$0xf0] %v2529_v51  ;;  %v2657_v44 = vrot.slane %v2655_v38, 4  ;;  %v2466_v45 = vld [vmem:[#allocation3 + $0x17] ss:$2 sm:$0xf]  ;;  %3800 = vmatprep.mubr.bf16.mxu0 %v2729_v54 }
 0x1dc   : > { %2467 = vst [vmem:[#allocation6 + $0x58] sm:$0xf] %v2466_v45  ;;  %v2539_v47 = vld [vmem:[#allocation3 + $0x2b] ss:$2 sm:$0xf]  ;;  %3841 = vmatprep.mubr.bf16.mxu1 %v2731_v46  ;;  %3801 = vmatmul.mubr.bf16.vlgmr.msra.gmra.mrb[64].mxu0 %v2728_v19  ;;  %v6937_v61 = vld [vmem:[#allocation10 + $0x1d0] sm:$0xff]  }
 0x1dd   : > { %v2594_v48 = vld [vmem:[#allocation3 + $0x3f] ss:$2 sm:$0xf]  ;;  %v2703_v37 = vld [vmem:[#allocation6 + $0x38] sm:$0xff]  ;;  %2659 = vst [vmem:[#allocation6 + $0xc8] sm:$0xf0] %v2657_v44  ;;  %3842 = vmatmul.mubr.bf16.vlgmr.msra.gmra.mrb[64].mxu1 %v2730_v40  ;;  %6397 = vmatpush3.bf16.msra.mxu0 %v6930_v34 }
 0x1de   : > { %v2541_v24 = vrot.slane %v2539_v47, 4  ;;  %2595 = vst [vmem:[#allocation6 + $0xd8] sm:$0xf] %v2594_v48  ;;  %v2667_v52 = vld [vmem:[#allocation3 + $0x53] ss:$2 sm:$0xf]  ;;  %6419 = vmatpush3.bf16.msra.mxu1 %v6931_v8  ;;  %6398 = vmatprep.subr.bf16.mxu0 %v6932_v36 }
 0x1df   : > { %v2669_v29 = vrot.slane %v2667_v52, 4  ;;  %v2457_v1 = vld [vmem:[#allocation3 + $0x14] ss:$2 sm:$0xf]  ;;  %v2717_v59 = vld [vmem:[#allocation6 + $0xa8] sm:$0xff]  ;;  %6420 = vmatprep.subr.bf16.mxu1 %v6933_v42  ;;  %v6944_v16 = vld [vmem:[#allocation10 + $0x160] sm:$0xff]  }
 0x1e0   : > { %v2719_v57 = vld [vmem:[#allocation6 + $0xb8] sm:$0xff]  ;;  %2543 = vst [vmem:[#allocation6 + $0x58] sm:$0xf0] %v2541_v24  ;;  %2458 = vst [vmem:[#allocation6 + $0x40] sm:$0xf] %v2457_v1  ;;  %v2733_v4 = vpack.c.bf16 %v2717_v59, %v2701_v50  ;;  %v6938_v5 = vld [vmem:[#allocation10 + $0x110] sm:$0xff]  }
 0x1e1   : > { %v2521_v58 = vld [vmem:[#allocation3 + $0x28] ss:$2 sm:$0xf]  ;;  %v6935_v22 = vld [vmem:[#allocation10 + $0x188] sm:$0xff]   ;;  %v2735_v62 = vpack.c.bf16 %v2719_v57, %v2703_v37  ;;  %2671 = vst [vmem:[#allocation6 + $0xd8] sm:$0xf0] %v2669_v29  ;;  %6399 = vmatpush3.bf16.msra.mxu0 %v6934_v49 }
 0x1e2   : > { %v2523_v0 = vrot.slane %v2521_v58, 4  ;;  %v2585_v2 = vld [vmem:[#allocation3 + $0x3c] ss:$2 sm:$0xf]  ;;  %3882 = vmatprep.mubr.bf16.mxu0 %v2733_v4  ;;  %6421 = vmatpush3.bf16.msra.mxu1 %v6935_v22  ;;  %v6945_v25 = vld [vmem:[#allocation10 + $0x1e0] sm:$0xff]   ;;  %v6948_v23 = vld [vmem:[#allocation10 + $0x168] sm:$0xff]  }
 0x1e3   : > { %2586 = vst [vmem:[#allocation6 + $0xc0] sm:$0xf] %v2585_v2  ;;  %v2649_v3 = vld [vmem:[#allocation3 + $0x50] ss:$2 sm:$0xf]  ;;  %3923 = vmatprep.mubr.bf16.mxu1 %v2735_v62  ;;  %v6939_v41 = vld [vmem:[#allocation10 + $0x190] sm:$0xff]   ;;  %6400 = vmatprep.subr.bf16.mxu0 %v6936_v63 }
 0x1e4   : > { %2525 = vst [vmem:[#allocation6 + $0x40] sm:$0xf0] %v2523_v0  ;;  %v2651_v6 = vrot.slane %v2649_v3, 4  ;;  %v2463_v7 = vld [vmem:[#allocation3 + $0x16] ss:$2 sm:$0xf]  ;;  %6422 = vmatprep.subr.bf16.mxu1 %v6937_v61 }
 0x1e5   : > { %2464 = vst [vmem:[#allocation6 + $0x50] sm:$0xf] %v2463_v7  ;;  %v2533_v43 = vld [vmem:[#allocation3 + $0x2a] ss:$2 sm:$0xf]  ;;  %v6940_v55 = vld [vmem:[#allocation10 + $0x158] sm:$0xff]   ;;  %6401 = vmatpush3.bf16.msra.mxu0 %v6938_v5 }
 0x1e6   : > { %v2591_v9 = vld [vmem:[#allocation3 + $0x3e] ss:$2 sm:$0xf]  ;;  %2653 = vst [vmem:[#allocation6 + $0xc0] sm:$0xf0] %v2651_v6  ;;  %v2535_v11 = vrot.slane %v2533_v43, 4  ;;  %6423 = vmatpush3.bf16.msra.mxu1 %v6939_v41  ;;  %6402 = vmatprep.subr.bf16.mxu0 %v6940_v55 }
 0x1e7   : > { %v6941_v10 = vld [vmem:[#allocation10 + $0x1d8] sm:$0xff]   ;;  %2592 = vst [vmem:[#allocation6 + $0xd0] sm:$0xf] %v2591_v9  ;;  %v2661_v12 = vld [vmem:[#allocation3 + $0x52] ss:$2 sm:$0xf] }
 0x1e8   : > { %v2663_v13 = vrot.slane %v2661_v12, 4  ;;  %v2472_v27 = vld [vmem:[#allocation3 + $0x1f] ss:$2 sm:$0xf]  ;;  %2537 = vst [vmem:[#allocation6 + $0x50] sm:$0xf0] %v2535_v11  ;;  %6424 = vmatprep.subr.bf16.mxu1 %v6941_v10 }
 0x1e9   : > { %v6942_v56 = vld [vmem:[#allocation10 + $0x118] sm:$0xff]   ;;  %2473 = vst [vmem:[#allocation6 + $0x68] sm:$0xf] %v2472_v27  ;;  %v2551_v14 = vld [vmem:[#allocation3 + $0x33] ss:$2 sm:$0xf] }
 0x1ea   : > { %v6943_v15 = vld [vmem:[#allocation10 + $0x198] sm:$0xff]   ;;  %2665 = vst [vmem:[#allocation6 + $0xd0] sm:$0xf0] %v2663_v13  ;;  %v2553_v17 = vrot.slane %v2551_v14, 4  ;;  %v6946_v26 = vld [vmem:[#allocation10 + $0x120] sm:$0xff]   ;;  %6403 = vmatpush3.bf16.msra.mxu0 %v6942_v56  ;;  %v6949_v19 = vld [vmem:[#allocation10 + $0x1e8] sm:$0xff]  }
 0x1eb   : > { %v2600_v60 = vld [vmem:[#allocation3 + $0x47] ss:$2 sm:$0xf]  ;;  %v2563_v20 = vld [vmem:[#allocation3 + $0x35] ss:$2 sm:$0xf]  ;;  %6425 = vmatpush3.bf16.msra.mxu1 %v6943_v15  ;;  %6404 = vmatprep.subr.bf16.mxu0 %v6944_v16 }
 0x1ec   : > { %2601 = vst [vmem:[#allocation6 + $0xe8] sm:$0xf] %v2600_v60  ;;  %v2478_v18 = vld [vmem:[#allocation3 + $0x21] ss:$2 sm:$0xf]  ;;  %v2565_v28 = vrot.slane %v2563_v20, 4  ;;  %6426 = vmatprep.subr.bf16.mxu1 %v6945_v25 }
 0x1ed   : > { %2555 = vst [vmem:[#allocation6 + $0x68] sm:$0xf0] %v2553_v17  ;;  %2479 = vst [vmem:[#allocation6 + $0x78] sm:$0xf] %v2478_v18  ;;  %v6947_v33 = vld [vmem:[#allocation10 + $0x1a0] sm:$0xff]   ;;  %v6950_v38 = vld [vmem:[#allocation10 + $0x128] sm:$0xff]  }
 0x1ee   : > { %v2606_v30 = vld [vmem:[#allocation3 + $0x49] ss:$2 sm:$0xf]  ;;  %v2469_v31 = vld [vmem:[#allocation3 + $0x1e] ss:$2 sm:$0xf]  ;;  %6405 = vmatpush3.bf16.msra.mxu0 %v6946_v26 }
 0x1ef   : > { %2607 = vst [vmem:[#allocation6 + $0xf8] sm:$0xf] %v2606_v30  ;;  %v2545_v32 = vld [vmem:[#allocation3 + $0x32] ss:$2 sm:$0xf]  ;;  %6427 = vmatpush3.bf16.msra.mxu1 %v6947_v33  ;;  %6406 = vmatprep.subr.bf16.mxu0 %v6948_v23  ;;  %v6956_v44 = vld [vmem:[#allocation10 + $0x178] sm:$0xff]  }
 0x1f0   : > { %2567 = vst [vmem:[#allocation6 + $0x78] sm:$0xf0] %v2565_v28  ;;  %2470 = vst [vmem:[#allocation6 + $0x60] sm:$0xf] %v2469_v31  ;;  %v2547_v34 = vrot.slane %v2545_v32, 4  ;;  %v6951_v54 = vld [vmem:[#allocation10 + $0x1a8] sm:$0xff]   ;;  %6428 = vmatprep.subr.bf16.mxu1 %v6949_v19 }
 0x1f1   : > { %v2597_v51 = vld [vmem:[#allocation3 + $0x46] ss:$2 sm:$0xf]  ;;  %v2557_v35 = vld [vmem:[#allocation3 + $0x34] ss:$2 sm:$0xf] }
 0x1f2   : > { %2598 = vst [vmem:[#allocation6 + $0xe0] sm:$0xf] %v2597_v51  ;;  %v2475_v53 = vld [vmem:[#allocation3 + $0x20] ss:$2 sm:$0xf]  ;;  %v2559_v8 = vrot.slane %v2557_v35, 4  ;;  %6407 = vmatpush3.bf16.msra.mxu0 %v6950_v38 }
 0x1f3   : > { %2549 = vst [vmem:[#allocation6 + $0x60] sm:$0xf0] %v2547_v34  ;;  %2476 = vst [vmem:[#allocation6 + $0x70] sm:$0xf] %v2475_v53  ;;  %v6952_v39 = vld [vmem:[#allocation10 + $0x170] sm:$0xff]   ;;  %6429 = vmatpush3.bf16.msra.mxu1 %v6951_v54  ;;  %v6957_v45 = vld [vmem:[#allocation10 + $0x1f8] sm:$0xff]  }
 0x1f4   : > { %v2603_v36 = vld [vmem:[#allocation3 + $0x48] ss:$2 sm:$0xf]  ;;  %2561 = vst [vmem:[#allocation6 + $0x70] sm:$0xf0] %v2559_v8  ;;  %v6953_v21 = vld [vmem:[#allocation10 + $0x1f0] sm:$0xff]   ;;  %6408 = vmatprep.subr.bf16.mxu0 %v6952_v39 }
 0x1f5   : > { %2604 = vst [vmem:[#allocation6 + $0xf0] sm:$0xf] %v2603_v36  ;;  %v6954_v40 = vld [vmem:[#allocation10 + $0x130] sm:$0xff]   ;;  %6430 = vmatprep.subr.bf16.mxu1 %v6953_v21  ;;  %v6958_v46 = vld [vmem:[#allocation10 + $0x138] sm:$0xff]   ;;  %v6960_v48 = vld [vmem:[#allocation10 + $0x240] sm:$0xff]  }
 0x1f6   : > { %v6955_v42 = vld [vmem:[#allocation10 + $0x1b0] sm:$0xff]   ;;  %6409 = vmatpush3.bf16.msra.mxu0 %v6954_v40  ;;  %v6959_v47 = vld [vmem:[#allocation10 + $0x1b8] sm:$0xff]   ;;  %v6961_v50 = vld [vmem:[#allocation10 + $0x2c0] sm:$0xff]  }
 0x1f7   : > { %6431 = vmatpush3.bf16.msra.mxu1 %v6955_v42  ;;  %6410 = vmatprep.subr.bf16.mxu0 %v6956_v44  ;;  %v2716_v49 = vld [vmem:[#allocation6 + $0xa0] sm:$0xff]  ;;  %v2718_v37 = vld [vmem:[#allocation6 + $0xb0] sm:$0xff]  ;;  %v2721_v29 = vld [vmem:[#allocation6 + $0xc8] sm:$0xff] }
 0x1f8   : > { %6432 = vmatprep.subr.bf16.mxu1 %v6957_v45  ;;  %v2700_v24 = vld [vmem:[#allocation6 + $0x20] sm:$0xff]  ;;  %v6962_v52 = vld [vmem:[#allocation10 + $0x200] sm:$0xff]   ;;  %v2723_v58 = vld [vmem:[#allocation6 + $0xd8] sm:$0xff] }
 0x1f9   : > { %v2732_v1 = vpack.c.bf16 %v2716_v49, %v2700_v24  ;;  %v2702_v59 = vld [vmem:[#allocation6 + $0x30] sm:$0xff]  ;;  %v2705_v4 = vld [vmem:[#allocation6 + $0x48] sm:$0xff]  ;;  %v6964_v62 = vld [vmem:[#allocation10 + $0x248] sm:$0xff]  }
 0x1fa   : > { %6411 = vmatpush3.bf16.msra.mxu0 %v6958_v46  ;;  %v6963_v57 = vld [vmem:[#allocation10 + $0x280] sm:$0xff]   ;;  %v2734_v22 = vpack.c.bf16 %v2718_v37, %v2702_v59  ;;  %v2737_v63 = vpack.c.bf16 %v2721_v29, %v2705_v4  ;;  %v2707_v0 = vld [vmem:[#allocation6 + $0x58] sm:$0xff]  ;;  %v6968_v41 = vld [vmem:[#allocation10 + $0x250] sm:$0xff]  }
 0x1fb   : > { %6433 = vmatpush3.bf16.msra.mxu1 %v6959_v47  ;;  %6440 = vmatprep.subr.bf16.mxu0 %v6960_v48  ;;  %v6965_v2 = vld [vmem:[#allocation10 + $0x2c8] sm:$0xff]   ;;  %v2739_v61 = vpack.c.bf16 %v2723_v58, %v2707_v0  ;;  %v6969_v6 = vld [vmem:[#allocation10 + $0x2d0] sm:$0xff]   ;;  %v6972_v9 = vld [vmem:[#allocation10 + $0x258] sm:$0xff]  }
 0x1fc   : > { %6462 = vmatprep.subr.bf16.mxu1 %v6961_v50  ;;  %v6966_v3 = vld [vmem:[#allocation10 + $0x208] sm:$0xff]   ;;  %v6970_v7 = vld [vmem:[#allocation10 + $0x210] sm:$0xff]   ;;  %v6973_v55 = vld [vmem:[#allocation10 + $0x2d8] sm:$0xff]  }
 0x1fd   : > { %3883 = vmatmul.mubr.bf16.vlgmr.msra.gmra.mrb[68].mxu0 %v2732_v1  ;;  %v6967_v5 = vld [vmem:[#allocation10 + $0x288] sm:$0xff]   ;;  %v6971_v43 = vld [vmem:[#allocation10 + $0x290] sm:$0xff]   ;;  %v6974_v10 = vld [vmem:[#allocation10 + $0x218] sm:$0xff]  }
 0x1fe   : > { %3924 = vmatmul.mubr.bf16.vlgmr.msra.gmra.mrb[68].mxu1 %v2734_v22  ;;  %6441 = vmatpush3.bf16.msra.mxu0 %v6962_v52  ;;  %v6975_v11 = vld [vmem:[#allocation10 + $0x298] sm:$0xff]   ;;  %v6976_v12 = vld [vmem:[#allocation10 + $0x260] sm:$0xff]   ;;  %v6980_v14 = vld [vmem:[#allocation10 + $0x268] sm:$0xff]  }
 0x1ff   : > { %3964 = vmatprep.mubr.bf16.mxu0 %v2737_v63  ;;  %6463 = vmatpush3.bf16.msra.mxu1 %v6963_v57  ;;  %v6977_v13 = vld [vmem:[#allocation10 + $0x2e0] sm:$0xff]   ;;  %v6981_v15 = vld [vmem:[#allocation10 + $0x2e8] sm:$0xff]   ;;  %v6984_v60 = vld [vmem:[#allocation10 + $0x270] sm:$0xff]  }
 0x200   : > { %4005 = vmatprep.mubr.bf16.mxu1 %v2739_v61  ;;  %6442 = vmatprep.subr.bf16.mxu0 %v6964_v62  ;;  %v6978_v27 = vld [vmem:[#allocation10 + $0x220] sm:$0xff]   ;;  %v6982_v16 = vld [vmem:[#allocation10 + $0x228] sm:$0xff]   ;;  %v6985_v18 = vld [vmem:[#allocation10 + $0x2f0] sm:$0xff]  }
 0x201   : > { %6464 = vmatprep.subr.bf16.mxu1 %v6965_v2  ;;  %v6979_v56 = vld [vmem:[#allocation10 + $0x2a0] sm:$0xff]   ;;  %v6983_v17 = vld [vmem:[#allocation10 + $0x2a8] sm:$0xff]   ;;  %v6986_v20 = vld [vmem:[#allocation10 + $0x230] sm:$0xff]  }
 0x202   : > { %6443 = vmatpush3.bf16.msra.mxu0 %v6966_v3  ;;  %v6987_v25 = vld [vmem:[#allocation10 + $0x2b0] sm:$0xff]   ;;  %v6988_v26 = vld [vmem:[#allocation10 + $0x278] sm:$0xff]   ;;  %v6992_v32 = vld [vmem:[#allocation10 + $0x340] sm:$0xff]  }
 0x203   : > { %6465 = vmatpush3.bf16.msra.mxu1 %v6967_v5  ;;  %6444 = vmatprep.subr.bf16.mxu0 %v6968_v41  ;;  %v6989_v28 = vld [vmem:[#allocation10 + $0x2f8] sm:$0xff]   ;;  %v2720_v33 = vld [vmem:[#allocation6 + $0xc0] sm:$0xff]  ;;  %v6993_v23 = vld [vmem:[#allocation10 + $0x3c0] sm:$0xff]  }
 0x204   : > { %6466 = vmatprep.subr.bf16.mxu1 %v6969_v6  ;;  %v6990_v30 = vld [vmem:[#allocation10 + $0x238] sm:$0xff]   ;;  %v2722_v34 = vld [vmem:[#allocation6 + $0xd0] sm:$0xff]  ;;  %v2704_v51 = vld [vmem:[#allocation6 + $0x40] sm:$0xff] }
 0x205   : > { %v6991_v31 = vld [vmem:[#allocation10 + $0x2b8] sm:$0xff]   ;;  %v6994_v53 = vld [vmem:[#allocation10 + $0x300] sm:$0xff]   ;;  %v2736_v19 = vpack.c.bf16 %v2720_v33, %v2704_v51  ;;  %v2727_v38 = vld [vmem:[#allocation6 + $0xf8] sm:$0xff] }
 0x206   : > { %6445 = vmatpush3.bf16.msra.mxu0 %v6970_v7  ;;  %v2725_v35 = vld [vmem:[#allocation6 + $0xe8] sm:$0xff]  ;;  %v2706_v8 = vld [vmem:[#allocation6 + $0x50] sm:$0xff]  ;;  %v6996_v21 = vld [vmem:[#allocation10 + $0x348] sm:$0xff]  }
 0x207   : > { %6467 = vmatpush3.bf16.msra.mxu1 %v6971_v43  ;;  %6446 = vmatprep.subr.bf16.mxu0 %v6972_v9  ;;  %v6995_v36 = vld [vmem:[#allocation10 + $0x380] sm:$0xff]   ;;  %v2738_v54 = vpack.c.bf16 %v2722_v34, %v2706_v8  ;;  %v2709_v39 = vld [vmem:[#allocation6 + $0x68] sm:$0xff]  ;;  %v2711_v42 = vld [vmem:[#allocation6 + $0x78] sm:$0xff] }
 0x208   : > { %6468 = vmatprep.subr.bf16.mxu1 %v6973_v55  ;;  %v2741_v40 = vpack.c.bf16 %v2725_v35, %v2709_v39  ;;  %v6997_v44 = vld [vmem:[#allocation10 + $0x3c8] sm:$0xff]   ;;  %v2743_v45 = vpack.c.bf16 %v2727_v38, %v2711_v42  ;;  %v7000_v48 = vld [vmem:[#allocation10 + $0x350] sm:$0xff]   ;;  %v7004_v24 = vld [vmem:[#allocation10 + $0x358] sm:$0xff]  }
 0x209   : > { %v6998_v46 = vld [vmem:[#allocation10 + $0x308] sm:$0xff]   ;;  %v7001_v49 = vld [vmem:[#allocation10 + $0x3d0] sm:$0xff]   ;;  %v7005_v52 = vld [vmem:[#allocation10 + $0x3d8] sm:$0xff]  }
 0x20a   : > { %6447 = vmatpush3.bf16.msra.mxu0 %v6974_v10  ;;  %v6999_v47 = vld [vmem:[#allocation10 + $0x388] sm:$0xff]   ;;  %v7002_v50 = vld [vmem:[#allocation10 + $0x310] sm:$0xff]   ;;  %v7006_v29 = vld [vmem:[#allocation10 + $0x318] sm:$0xff]  }
 0x20b   : > { %6469 = vmatpush3.bf16.msra.mxu1 %v6975_v11  ;;  %6448 = vmatprep.subr.bf16.mxu0 %v6976_v12  ;;  %v7003_v37 = vld [vmem:[#allocation10 + $0x390] sm:$0xff]   ;;  %v7007_v1 = vld [vmem:[#allocation10 + $0x398] sm:$0xff]   ;;  %v7008_v59 = vld [vmem:[#allocation10 + $0x360] sm:$0xff]  }
 0x20c   : > { %6470 = vmatprep.subr.bf16.mxu1 %v6977_v13  ;;  %v7009_v57 = vld [vmem:[#allocation10 + $0x3e0] sm:$0xff]   ;;  %v7012_v4 = vld [vmem:[#allocation10 + $0x368] sm:$0xff]   ;;  %v7016_v2 = vld [vmem:[#allocation10 + $0x370] sm:$0xff]  }
 0x20d   : > { %v7010_v58 = vld [vmem:[#allocation10 + $0x320] sm:$0xff]   ;;  %v7013_v62 = vld [vmem:[#allocation10 + $0x3e8] sm:$0xff]   ;;  %v7017_v61 = vld [vmem:[#allocation10 + $0x3f0] sm:$0xff]  }
 0x20e   : > { %6449 = vmatpush3.bf16.msra.mxu0 %v6978_v27  ;;  %v7011_v22 = vld [vmem:[#allocation10 + $0x3a0] sm:$0xff]   ;;  %v7014_v63 = vld [vmem:[#allocation10 + $0x328] sm:$0xff]   ;;  %v7018_v3 = vld [vmem:[#allocation10 + $0x330] sm:$0xff]  }
 0x20f   : > { %6471 = vmatpush3.bf16.msra.mxu1 %v6979_v56  ;;  %6450 = vmatprep.subr.bf16.mxu0 %v6980_v14  ;;  %v7015_v0 = vld [vmem:[#allocation10 + $0x3a8] sm:$0xff]   ;;  %v7019_v5 = vld [vmem:[#allocation10 + $0x3b0] sm:$0xff]   ;;  %v7020_v41 = vld [vmem:[#allocation10 + $0x378] sm:$0xff]  }
 0x210   : > { %6472 = vmatprep.subr.bf16.mxu1 %v6981_v15  ;;  %v7021_v6 = vld [vmem:[#allocation10 + $0x3f8] sm:$0xff]   ;;  %v2724_v9 = vld [vmem:[#allocation6 + $0xe0] sm:$0xff]  ;;  %v2726_v55 = vld [vmem:[#allocation6 + $0xf0] sm:$0xff] }
 0x211   : > { %v7022_v7 = vld [vmem:[#allocation10 + $0x338] sm:$0xff]   ;;  %v2708_v10 = vld [vmem:[#allocation6 + $0x60] sm:$0xff]  ;;  %v2710_v12 = vld [vmem:[#allocation6 + $0x70] sm:$0xff] }
 0x212   : > { %6451 = vmatpush3.bf16.msra.mxu0 %v6982_v16  ;;  %v7023_v43 = vld [vmem:[#allocation10 + $0x3b8] sm:$0xff]   ;;  %v2740_v11 = vpack.c.bf16 %v2724_v9, %v2708_v10  ;;  %v2742_v13 = vpack.c.bf16 %v2726_v55, %v2710_v12  ;;  %v7024_v27 = vld [vmem:[#allocation13 + $0x40] sm:$0xff]   ;;  %v7028_v16 = vld [vmem:[#allocation13 + $0x48] sm:$0xff]  }
 0x213   : > { %6473 = vmatpush3.bf16.msra.mxu1 %v6983_v17  ;;  %6452 = vmatprep.subr.bf16.mxu0 %v6984_v60  ;;  %v7025_v56 = vld [vmem:[#allocation13 + $0xc0] sm:$0xff]   ;;  %v7029_v17 = vld [vmem:[#allocation13 + $0xc8] sm:$0xff]   ;;  %v7038_v33 = vld [vmem:[#allocation13 + $0x18] sm:$0xff]  }
 0x214   : > { %6474 = vmatprep.subr.bf16.mxu1 %v6985_v18  ;;  %v7026_v14 = vld [vmem:[#allocation13] sm:$0xff]   ;;  %v7030_v60 = vld [vmem:[#allocation13 + $0x8] sm:$0xff]  }
 0x215   : > { %v7027_v15 = vld [vmem:[#allocation13 + $0x80] sm:$0xff]   ;;  %v7031_v18 = vld [vmem:[#allocation13 + $0x88] sm:$0xff]  }
 0x216   : > { %6453 = vmatpush3.bf16.msra.mxu0 %v6986_v20  ;;  %v7032_v20 = vld [vmem:[#allocation13 + $0x50] sm:$0xff]   ;;  %v7041_v35 = vld [vmem:[#allocation13 + $0xe0] sm:$0xff]  }
 0x217   : > { %6475 = vmatpush3.bf16.msra.mxu1 %v6987_v25  ;;  %6454 = vmatprep.subr.bf16.mxu0 %v6988_v26  ;;  %v7033_v25 = vld [vmem:[#allocation13 + $0xd0] sm:$0xff]   ;;  %v7042_v42 = vld [vmem:[#allocation13 + $0x20] sm:$0xff]  }
 0x218   : > { %6476 = vmatprep.subr.bf16.mxu1 %v6989_v28  ;;  %v7034_v26 = vld [vmem:[#allocation13 + $0x10] sm:$0xff]  }
 0x219   : > { %v7035_v28 = vld [vmem:[#allocation13 + $0x90] sm:$0xff]  }
 0x21a   : > { %6455 = vmatpush3.bf16.msra.mxu0 %v6990_v30  ;;  %v7036_v30 = vld [vmem:[#allocation13 + $0x58] sm:$0xff]  }
 0x21b   : > { %6477 = vmatpush3.bf16.msra.mxu1 %v6991_v31  ;;  %6484 = vmatprep.subr.bf16.mxu0 %v6992_v32  ;;  %v7037_v31 = vld [vmem:[#allocation13 + $0xd8] sm:$0xff]  }
 0x21c   : > { %6506 = vmatprep.subr.bf16.mxu1 %v6993_v23  ;;  %v7039_v23 = vld [vmem:[#allocation13 + $0x98] sm:$0xff]  }
 0x21d   : > { %3965 = vmatmul.mubr.bf16.vlgmr.msra.gmra.mrb[72].mxu0 %v2736_v19 }
 0x21e   : > { %4006 = vmatmul.mubr.bf16.vlgmr.msra.gmra.mrb[72].mxu1 %v2738_v54  ;;  %6485 = vmatpush3.bf16.msra.mxu0 %v6994_v53  ;;  %v7040_v53 = vld [vmem:[#allocation13 + $0x60] sm:$0xff]  }
 0x21f   : > { %4046 = vmatprep.mubr.bf16.mxu0 %v2741_v40  ;;  %6507 = vmatpush3.bf16.msra.mxu1 %v6995_v36 }
 0x220   : > { %4087 = vmatprep.mubr.bf16.mxu1 %v2743_v45  ;;  %6486 = vmatprep.subr.bf16.mxu0 %v6996_v21 }
 0x221   : > { %6508 = vmatprep.subr.bf16.mxu1 %v6997_v44  ;;  %v7043_v44 = vld [vmem:[#allocation13 + $0xa0] sm:$0xff]  }
 0x222   : > { %6487 = vmatpush3.bf16.msra.mxu0 %v6998_v46 }
 0x223   : > { %6509 = vmatpush3.bf16.msra.mxu1 %v6999_v47  ;;  %6488 = vmatprep.subr.bf16.mxu0 %v7000_v48  ;;  %v7044_v47 = vld [vmem:[#allocation13 + $0x68] sm:$0xff]  }
 0x224   : > { %6510 = vmatprep.subr.bf16.mxu1 %v7001_v49  ;;  %v7045_v48 = vld [vmem:[#allocation13 + $0xe8] sm:$0xff]  }
 0x226   : > { %6489 = vmatpush3.bf16.msra.mxu0 %v7002_v50  ;;  %v7046_v50 = vld [vmem:[#allocation13 + $0x28] sm:$0xff]  }
 0x227   : > { %6511 = vmatpush3.bf16.msra.mxu1 %v7003_v37  ;;  %6490 = vmatprep.subr.bf16.mxu0 %v7004_v24  ;;  %v7047_v37 = vld [vmem:[#allocation13 + $0xa8] sm:$0xff]   ;;  %v7048_v24 = vld [vmem:[#allocation13 + $0x70] sm:$0xff]  }
 0x228   : > { %6512 = vmatprep.subr.bf16.mxu1 %v7005_v52  ;;  %v7049_v52 = vld [vmem:[#allocation13 + $0xf0] sm:$0xff]  }
 0x22a   : > { %6491 = vmatpush3.bf16.msra.mxu0 %v7006_v29  ;;  %v7050_v29 = vld [vmem:[#allocation13 + $0x30] sm:$0xff]  }
 0x22b   : > { %6513 = vmatpush3.bf16.msra.mxu1 %v7007_v1  ;;  %6492 = vmatprep.subr.bf16.mxu0 %v7008_v59  ;;  %v7051_v1 = vld [vmem:[#allocation13 + $0xb0] sm:$0xff]   ;;  %v7052_v59 = vld [vmem:[#allocation13 + $0x78] sm:$0xff]  }
 0x22c   : > { %6514 = vmatprep.subr.bf16.mxu1 %v7009_v57  ;;  %v7053_v57 = vld [vmem:[#allocation13 + $0xf8] sm:$0xff]  }
 0x22e   : > { %6493 = vmatpush3.bf16.msra.mxu0 %v7010_v58  ;;  %v7054_v58 = vld [vmem:[#allocation13 + $0x38] sm:$0xff]  }
 0x22f   : > { %6515 = vmatpush3.bf16.msra.mxu1 %v7011_v22  ;;  %6494 = vmatprep.subr.bf16.mxu0 %v7012_v4  ;;  %v7055_v22 = vld [vmem:[#allocation13 + $0xb8] sm:$0xff]   ;;  %v7056_v4 = vld [vmem:[#allocation13 + $0x140] sm:$0xff]  }
 0x230   : > { %6516 = vmatprep.subr.bf16.mxu1 %v7013_v62  ;;  %v7057_v62 = vld [vmem:[#allocation13 + $0x1c0] sm:$0xff]  }
 0x232   : > { %6495 = vmatpush3.bf16.msra.mxu0 %v7014_v63 }
 0x233   : > { %6517 = vmatpush3.bf16.msra.mxu1 %v7015_v0  ;;  %6496 = vmatprep.subr.bf16.mxu0 %v7016_v2 }
 0x234   : > { %6518 = vmatprep.subr.bf16.mxu1 %v7017_v61 }
 0x236   : > { %6497 = vmatpush3.bf16.msra.mxu0 %v7018_v3 }
 0x237   : > { %6519 = vmatpush3.bf16.msra.mxu1 %v7019_v5  ;;  %6498 = vmatprep.subr.bf16.mxu0 %v7020_v41 }
 0x238   : > { %6520 = vmatprep.subr.bf16.mxu1 %v7021_v6 }
 0x23a   : > { %6499 = vmatpush3.bf16.msra.mxu0 %v7022_v7 }
 0x23b   : > { %6521 = vmatpush3.bf16.msra.mxu1 %v7023_v43  ;;  %6528 = vmatprep.subr.bf16.mxu0 %v7024_v27 }
 0x23c   : > { %6550 = vmatprep.subr.bf16.mxu1 %v7025_v56 }
 0x23d   : > { %4047 = vmatmul.mubr.bf16.vlgmr.msra.gmra.mrb[76].mxu0 %v2740_v11 }
 0x23e   : > { %4088 = vmatmul.mubr.bf16.vlgmr.msra.gmra.mrb[76].mxu1 %v2742_v13  ;;  %6529 = vmatpush3.bf16.msra.mxu0 %v7026_v14 }
 0x23f   : > { %6551 = vmatpush3.bf16.msra.mxu1 %v7027_v15  ;;  %6530 = vmatprep.subr.bf16.mxu0 %v7028_v16 }
 0x240   : > { %6552 = vmatprep.subr.bf16.mxu1 %v7029_v17 }
 0x242   : > { %6531 = vmatpush3.bf16.msra.mxu0 %v7030_v60 }
 0x243   : > { %6553 = vmatpush3.bf16.msra.mxu1 %v7031_v18  ;;  %6532 = vmatprep.subr.bf16.mxu0 %v7032_v20 }
 0x244   : > { %6554 = vmatprep.subr.bf16.mxu1 %v7033_v25 }
 0x246   : > { %6533 = vmatpush3.bf16.msra.mxu0 %v7034_v26 }
 0x247   : > { %6555 = vmatpush3.bf16.msra.mxu1 %v7035_v28  ;;  %6534 = vmatprep.subr.bf16.mxu0 %v7036_v30 }
 0x248   : > { %6556 = vmatprep.subr.bf16.mxu1 %v7037_v31 }
 0x24a   : > { %6535 = vmatpush3.bf16.msra.mxu0 %v7038_v33 }
 0x24b   : > { %6557 = vmatpush3.bf16.msra.mxu1 %v7039_v23  ;;  %6536 = vmatprep.subr.bf16.mxu0 %v7040_v53 }
 0x24c   : > { %6558 = vmatprep.subr.bf16.mxu1 %v7041_v35 }
 0x24e   : > { %6537 = vmatpush3.bf16.msra.mxu0 %v7042_v42 }
 0x24f   : > { %6559 = vmatpush3.bf16.msra.mxu1 %v7043_v44  ;;  %6538 = vmatprep.subr.bf16.mxu0 %v7044_v47 }
 0x250   : > { %6560 = vmatprep.subr.bf16.mxu1 %v7045_v48 }
 0x252   : > { %6539 = vmatpush3.bf16.msra.mxu0 %v7046_v50 }
 0x253   : > { %6561 = vmatpush3.bf16.msra.mxu1 %v7047_v37  ;;  %6540 = vmatprep.subr.bf16.mxu0 %v7048_v24 }
 0x254   : > { %6562 = vmatprep.subr.bf16.mxu1 %v7049_v52 }
 0x256   : > { %6541 = vmatpush3.bf16.msra.mxu0 %v7050_v29 }
 0x257   : > { %6563 = vmatpush3.bf16.msra.mxu1 %v7051_v1  ;;  %6542 = vmatprep.subr.bf16.mxu0 %v7052_v59 }
 0x258   : > { %6564 = vmatprep.subr.bf16.mxu1 %v7053_v57 }
 0x25a   : > { %6543 = vmatpush3.bf16.msra.mxu0 %v7054_v58 }
 0x25b   : > { %6565 = vmatpush3.bf16.msra.mxu1 %v7055_v22  ;;  %6572 = vmatprep.subr.bf16.mxu0 %v7056_v4 }
 0x25c   : > { %6594 = vmatprep.subr.bf16.mxu1 %v7057_v62 }
 0x2af   : > { %v6368_v32 = vpop.f32.mrb[64].mxu0 }
 0x2b0   : > { %v6390_v34 = vpop.f32.mrb[64].mxu1  ;;  %v6369_v51 = vpop.f32.mrb[65].mxu0 }
 0x2b1   : > { %v6370_v19 = vadd.f32 %v6369_v51, %v6368_v32  ;;  %v6391_v8 = vpop.f32.mrb[65].mxu1  ;;  %v6371_v36 = vpop.f32.mrb[66].mxu0 }
 0x2b2   : > { %v6392_v38 = vadd.f32 %v6391_v8, %v6390_v34  ;;  %v6393_v54 = vpop.f32.mrb[66].mxu1  ;;  %v6372_v39 = vpop.f32.mrb[67].mxu0 }
 0x2b3   : > { %v6373_v21 = vadd.f32 %v6372_v39, %v6371_v36  ;;  %v6394_v40 = vpop.f32.mrb[67].mxu1 }
 0x2b4   : > { %v3844_v45 = vadd.f32 %v6392_v38, %v6370_v19  ;;  %v6395_v46 = vadd.f32 %v6394_v40, %v6393_v54 }
 0x2b6   : > { %v3847_v49 = vadd.f32 %v6395_v46, %v6373_v21 }
 0x2d0   : > { %v6412_v63 = vpop.f32.mrb[68].mxu0 }
 0x2d1   : > { %v6434_v0 = vpop.f32.mrb[68].mxu1  ;;  %v6413_v2 = vpop.f32.mrb[69].mxu0 }
 0x2d2   : > { %v6414_v61 = vadd.f32 %v6413_v2, %v6412_v63  ;;  %v6435_v3 = vpop.f32.mrb[69].mxu1  ;;  %v6415_v5 = vpop.f32.mrb[70].mxu0 }
 0x2d3   : > { %v6436_v41 = vadd.f32 %v6435_v3, %v6434_v0  ;;  %v6437_v6 = vpop.f32.mrb[70].mxu1  ;;  %v6416_v7 = vpop.f32.mrb[71].mxu0 }
 0x2d4   : > { %v3885_v43 = vadd.f32 %v6414_v61, %v3844_v45  ;;  %v6417_v9 = vadd.f32 %v6416_v7, %v6415_v5  ;;  %v6438_v55 = vpop.f32.mrb[71].mxu1 }
 0x2d5   : > { %v6439_v10 = vadd.f32 %v6438_v55, %v6437_v6  ;;  %v7059_v6 = vld [vmem:[#allocation13 + $0x180] sm:$0xff]  }
 0x2d6   : > { %v3926_v11 = vadd.f32 %v6436_v41, %v3885_v43  ;;  %v3888_v12 = vadd.f32 %v6417_v9, %v3847_v49  ;;  %v7058_v41 = vld [vmem:[#allocation13 + $0x100] sm:$0xff]  }
 0x2d8   : > { %v3929_v13 = vadd.f32 %v6439_v10, %v3888_v12 }
 0x2f0   : > { %v6456_v27 = vpop.f32.mrb[72].mxu0 }
 0x2f1   : > { %v6478_v56 = vpop.f32.mrb[72].mxu1  ;;  %v6457_v14 = vpop.f32.mrb[73].mxu0 }
 0x2f2   : > { %v6458_v15 = vadd.f32 %v6457_v14, %v6456_v27  ;;  %v6479_v16 = vpop.f32.mrb[73].mxu1  ;;  %v6459_v17 = vpop.f32.mrb[74].mxu0  ;;  %v7060_v14 = vld [vmem:[#allocation13 + $0x148] sm:$0xff]  }
 0x2f3   : > { %v6480_v60 = vadd.f32 %v6479_v16, %v6478_v56  ;;  %v6481_v18 = vpop.f32.mrb[74].mxu1  ;;  %v6460_v20 = vpop.f32.mrb[75].mxu0 }
 0x2f4   : > { %v3967_v25 = vadd.f32 %v6458_v15, %v3926_v11  ;;  %v6461_v26 = vadd.f32 %v6460_v20, %v6459_v17  ;;  %v6482_v28 = vpop.f32.mrb[75].mxu1  ;;  %v7061_v15 = vld [vmem:[#allocation13 + $0x1c8] sm:$0xff]   ;;  %v7064_v20 = vld [vmem:[#allocation13 + $0x150] sm:$0xff]  }
 0x2f5   : > { %v6483_v30 = vadd.f32 %v6482_v28, %v6481_v18  ;;  %v7063_v18 = vld [vmem:[#allocation13 + $0x188] sm:$0xff]   ;;  %v7067_v28 = vld [vmem:[#allocation13 + $0x190] sm:$0xff]  }
 0x2f6   : > { %v4008_v31 = vadd.f32 %v6480_v60, %v3967_v25  ;;  %v3970_v32 = vadd.f32 %v6461_v26, %v3929_v13  ;;  %v7062_v60 = vld [vmem:[#allocation13 + $0x108] sm:$0xff]   ;;  %v7065_v25 = vld [vmem:[#allocation13 + $0x1d0] sm:$0xff]  }
 0x2f7   : > { %v7066_v26 = vld [vmem:[#allocation13 + $0x110] sm:$0xff]  }
 0x2f8   : > { %v4011_v33 = vadd.f32 %v6483_v30, %v3970_v32  ;;  %v7068_v30 = vld [vmem:[#allocation13 + $0x158] sm:$0xff]  }
 0x2f9   : > { %v7070_v32 = vld [vmem:[#allocation13 + $0x118] sm:$0xff]  }
 0x310   : > { %v6500_v23 = vpop.f32.mrb[76].mxu0 }
 0x311   : > { %v6522_v34 = vpop.f32.mrb[76].mxu1  ;;  %v6501_v51 = vpop.f32.mrb[77].mxu0 }
 0x312   : > { %v6502_v53 = vadd.f32 %v6501_v51, %v6500_v23  ;;  %v6523_v35 = vpop.f32.mrb[77].mxu1  ;;  %v6503_v19 = vpop.f32.mrb[78].mxu0  ;;  %v7072_v23 = vld [vmem:[#allocation13 + $0x160] sm:$0xff]  }
 0x313   : > { %v6524_v8 = vadd.f32 %v6523_v35, %v6522_v34  ;;  %v6525_v36 = vpop.f32.mrb[78].mxu1  ;;  %v6504_v38 = vpop.f32.mrb[79].mxu0  ;;  %v7073_v34 = vld [vmem:[#allocation13 + $0x1e0] sm:$0xff]   ;;  %v7076_v35 = vld [vmem:[#allocation13 + $0x168] sm:$0xff]  }
 0x314   : > { %v4049_v54 = vadd.f32 %v6502_v53, %v4008_v31  ;;  %v6505_v39 = vadd.f32 %v6504_v38, %v6503_v19  ;;  %v6526_v21 = vpop.f32.mrb[79].mxu1  ;;  %v7069_v31 = vld [vmem:[#allocation13 + $0x1d8] sm:$0xff]   ;;  %v7074_v51 = vld [vmem:[#allocation13 + $0x120] sm:$0xff]   ;;  %v7077_v19 = vld [vmem:[#allocation13 + $0x1e8] sm:$0xff]  }
 0x315   : > { %v6527_v40 = vadd.f32 %v6526_v21, %v6525_v36  ;;  %v7075_v53 = vld [vmem:[#allocation13 + $0x1a0] sm:$0xff]   ;;  %v7079_v36 = vld [vmem:[#allocation13 + $0x1a8] sm:$0xff]   ;;  %v7080_v38 = vld [vmem:[#allocation13 + $0x170] sm:$0xff]  }
 0x316   : > { %v4090_v42 = vadd.f32 %v6524_v8, %v4049_v54  ;;  %v4052_v44 = vadd.f32 %v6505_v39, %v4011_v33  ;;  %v7071_v33 = vld [vmem:[#allocation13 + $0x198] sm:$0xff]   ;;  %v7078_v8 = vld [vmem:[#allocation13 + $0x128] sm:$0xff]   ;;  %v7081_v54 = vld [vmem:[#allocation13 + $0x1f0] sm:$0xff]  }
 0x317   : > { %v7082_v39 = vld [vmem:[#allocation13 + $0x130] sm:$0xff]  }
 0x318   : > { %vm4096_vm8 = vcmp.ge.f32.partialorder %v4090_v42, 0.0  ;;  %v4098_v45 = vmul.f32 0.2, %v4090_v42  ;;  %v4093_v46 = vadd.f32 %v6527_v40, %v4052_v44  ;;  %v7083_v21 = vld [vmem:[#allocation13 + $0x1b0] sm:$0xff]   ;;  %v7084_v40 = vld [vmem:[#allocation13 + $0x178] sm:$0xff]  }
 0x319   : > { %v7086_v44 = vld [vmem:[#allocation13 + $0x138] sm:$0xff]  }
 0x31a   : > { %v4100_v47 = vsel %vm4096_vm8, %v4090_v42, %v4098_v45  ;;  %vm4097_vm9 = vcmp.ge.f32.partialorder %v4093_v46, 0.0  ;;  %v4099_v48 = vmul.f32 0.2, %v4093_v46  ;;  %v7085_v42 = vld [vmem:[#allocation13 + $0x1f8] sm:$0xff]  }
 0x31b   : > { %4102 = vst [vmem:[#allocation9] sm:$0xff] %v4100_v47  ;;  %v7087_v45 = vld [vmem:[#allocation13 + $0x1b8] sm:$0xff]   ;;  %v7089_v47 = vld [vmem:[#allocation13 + $0x2c0] sm:$0xff]  }
 0x31c   : > { %v4101_v49 = vsel %vm4097_vm9, %v4093_v46, %v4099_v48  ;;  %v7088_v46 = vld [vmem:[#allocation13 + $0x240] sm:$0xff]  }
 0x31d   : > { %4103 = vst [vmem:[#allocation9 + $0x8] sm:$0xff] %v4101_v49 }
 0x322   : > { %v4106_v50 = vld [vmem:[#allocation9] sm:$0xff]  }
 0x323   : > { %4107 = vst [vmem:[#allocation4] sm:$0xff] %v4106_v50  }
 0x324   : > { %v4110_v37 = vld [vmem:[#allocation9 + $0x8] sm:$0xff]  }
 0x325   : > { %4111 = vst [vmem:[#allocation4 + $0x8] sm:$0xff] %v4110_v37   ;;  %v7090_v37 = vld [vmem:[#allocation13 + $0x200] sm:$0xff]  }
 0x32a   : > { %v4132_v24 = vld [vmem:[#allocation4 + $0x1] sm:$0x1]  ;;  %v4136_v52 = vld [vmem:[#allocation4 + $0x3] sm:$0x1]  ;;  %v4130_v29 = vld [vmem:[#allocation4] sm:$0x1] }
 0x32b   : > { %4133 = vst [vmem:[#allocation7 + $0x8] sm:$0x1] %v4132_v24  ;;  %4137 = vst [vmem:[#allocation7 + $0x18] sm:$0x1] %v4136_v52  ;;  %v4134_v1 = vld [vmem:[#allocation4 + $0x2] sm:$0x1] }
 0x32c   : > { %4131 = vst [vmem:[#allocation7] sm:$0x1] %v4130_v29  ;;  %v4140_v59 = vld [vmem:[#allocation4 + $0x5] sm:$0x1]  ;;  %v4144_v57 = vld [vmem:[#allocation4 + $0x7] sm:$0x1] }
 0x32d   : > { %4135 = vst [vmem:[#allocation7 + $0x10] sm:$0x1] %v4134_v1  ;;  %4141 = vst [vmem:[#allocation7 + $0x28] sm:$0x1] %v4140_v59  ;;  %v4138_v58 = vld [vmem:[#allocation4 + $0x4] sm:$0x1] }
 0x32e   : > { %4145 = vst [vmem:[#allocation7 + $0x38] sm:$0x1] %v4144_v57  ;;  %v4142_v22 = vld [vmem:[#allocation4 + $0x6] sm:$0x1]  ;;  %v4148_v4 = vld [vmem:[#allocation4 + $0x9] sm:$0x1] }
 0x32f   : > { %4139 = vst [vmem:[#allocation7 + $0x20] sm:$0x1] %v4138_v58  ;;  %4143 = vst [vmem:[#allocation7 + $0x30] sm:$0x1] %v4142_v22  ;;  %v4152_v62 = vld [vmem:[#allocation4 + $0xb] sm:$0x1] }
 0x330   : > { %4149 = vst [vmem:[#allocation7 + $0x48] sm:$0x1] %v4148_v4  ;;  %v4146_v63 = vld [vmem:[#allocation4 + $0x8] sm:$0x1]  ;;  %v4150_v0 = vld [vmem:[#allocation4 + $0xa] sm:$0x1] }
 0x331   : > { %4153 = vst [vmem:[#allocation7 + $0x58] sm:$0x1] %v4152_v62  ;;  %4147 = vst [vmem:[#allocation7 + $0x40] sm:$0x1] %v4146_v63  ;;  %v4156_v2 = vld [vmem:[#allocation4 + $0xd] sm:$0x1] }
 0x332   : > { %4151 = vst [vmem:[#allocation7 + $0x50] sm:$0x1] %v4150_v0  ;;  %v4160_v61 = vld [vmem:[#allocation4 + $0xf] sm:$0x1]  ;;  %v4154_v3 = vld [vmem:[#allocation4 + $0xc] sm:$0x1] }
 0x333   : > { %4157 = vst [vmem:[#allocation7 + $0x68] sm:$0x1] %v4156_v2  ;;  %4161 = vst [vmem:[#allocation7 + $0x78] sm:$0x1] %v4160_v61  ;;  %v4158_v5 = vld [vmem:[#allocation4 + $0xe] sm:$0x1] }
 0x334   : > { %4155 = vst [vmem:[#allocation7 + $0x60] sm:$0x1] %v4154_v3  ;;  %4159 = vst [vmem:[#allocation7 + $0x70] sm:$0x1] %v4158_v5  ;;  %v4163_v7 = vld [vmem:[#allocation7 + $0x8] sm:$0xff]  ;;  %v4165_v43 = vld [vmem:[#allocation7 + $0x18] sm:$0xff] }
 0x335   : > { %v4162_v9 = vld [vmem:[#allocation7] sm:$0xff]  ;;  %v4179_v55 = vpack.c.bf16 %v4163_v7, %v4163_v7  ;;  %v4181_v10 = vpack.c.bf16 %v4165_v43, %v4165_v43  ;;  %v4164_v12 = vld [vmem:[#allocation7 + $0x10] sm:$0xff]  ;;  %v4167_v13 = vld [vmem:[#allocation7 + $0x28] sm:$0xff] }
 0x336   : > { %v4178_v11 = vpack.c.bf16 %v4162_v9, %v4162_v9  ;;  %v4169_v27 = vld [vmem:[#allocation7 + $0x38] sm:$0xff]  ;;  %v4180_v56 = vpack.c.bf16 %v4164_v12, %v4164_v12  ;;  %v4183_v16 = vpack.c.bf16 %v4167_v13, %v4167_v13  ;;  %v4166_v48 = vld [vmem:[#allocation7 + $0x20] sm:$0xff]  ;;  %v4168_v49 = vld [vmem:[#allocation7 + $0x30] sm:$0xff] }
 0x337   : > { %5250 = vmatprep.mubr.bf16.mxu0 %v4179_v55  ;;  %5290 = vmatprep.mubr.bf16.mxu1 %v4181_v10  ;;  %v4185_v17 = vpack.c.bf16 %v4169_v27, %v4169_v27  ;;  %v4171_v50 = vld [vmem:[#allocation7 + $0x48] sm:$0xff]  ;;  %v4182_v52 = vpack.c.bf16 %v4166_v48, %v4166_v48  ;;  %v4184_v29 = vpack.c.bf16 %v4168_v49, %v4168_v49  ;;  %v7091_v1 = vld [vmem:[#allocation13 + $0x280] sm:$0xff]   ;;  %v7092_v57 = vld [vmem:[#allocation13 + $0x248] sm:$0xff]  }
 0x338   : > { %5251 = vmatmul.mubr.bf16.vlgmr.msra.gmra.mrb[80].mxu0 %v4178_v11  ;;  %5291 = vmatmul.mubr.bf16.vlgmr.msra.gmra.mrb[80].mxu1 %v4180_v56  ;;  %v4173_v24 = vld [vmem:[#allocation7 + $0x58] sm:$0xff]  ;;  %v4187_v59 = vpack.c.bf16 %v4171_v50, %v4171_v50  ;;  %v7096_v63 = vld [vmem:[#allocation13 + $0x250] sm:$0xff]   ;;  %v7100_v3 = vld [vmem:[#allocation13 + $0x258] sm:$0xff]  }
 0x339   : > { %6573 = vmatpush3.bf16.msra.mxu0 %v7058_v41  ;;  %6595 = vmatpush3.bf16.msra.mxu1 %v7059_v6  ;;  %v7093_v58 = vld [vmem:[#allocation13 + $0x2c8] sm:$0xff]   ;;  %v4189_v22 = vpack.c.bf16 %v4173_v24, %v4173_v24  ;;  %v7097_v0 = vld [vmem:[#allocation13 + $0x2d0] sm:$0xff]   ;;  %v7101_v5 = vld [vmem:[#allocation13 + $0x2d8] sm:$0xff]  }
 0x33a   : > { %5330 = vmatprep.mubr.bf16.mxu0 %v4183_v16  ;;  %5370 = vmatprep.mubr.bf16.mxu1 %v4185_v17  ;;  %v7094_v4 = vld [vmem:[#allocation13 + $0x208] sm:$0xff]   ;;  %v7098_v2 = vld [vmem:[#allocation13 + $0x210] sm:$0xff]   ;;  %v7102_v41 = vld [vmem:[#allocation13 + $0x218] sm:$0xff]  }
 0x33b   : > { %6574 = vmatprep.subr.bf16.mxu0 %v7060_v14  ;;  %6596 = vmatprep.subr.bf16.mxu1 %v7061_v15  ;;  %v7095_v62 = vld [vmem:[#allocation13 + $0x288] sm:$0xff]   ;;  %v7099_v61 = vld [vmem:[#allocation13 + $0x290] sm:$0xff]   ;;  %v7103_v6 = vld [vmem:[#allocation13 + $0x298] sm:$0xff]  }
 0x33c   : > { %v7104_v7 = vld [vmem:[#allocation13 + $0x260] sm:$0xff]   ;;  %v7108_v10 = vld [vmem:[#allocation13 + $0x268] sm:$0xff]   ;;  %v7112_v27 = vld [vmem:[#allocation13 + $0x270] sm:$0xff]  }
 0x33d   : > { %6575 = vmatpush3.bf16.msra.mxu0 %v7062_v60  ;;  %6597 = vmatpush3.bf16.msra.mxu1 %v7063_v18  ;;  %v7105_v43 = vld [vmem:[#allocation13 + $0x2e0] sm:$0xff]   ;;  %v7109_v11 = vld [vmem:[#allocation13 + $0x2e8] sm:$0xff]   ;;  %v7113_v56 = vld [vmem:[#allocation13 + $0x2f0] sm:$0xff]  }
 0x33e   : > { %6576 = vmatprep.subr.bf16.mxu0 %v7064_v20  ;;  %6598 = vmatprep.subr.bf16.mxu1 %v7065_v25  ;;  %v7106_v9 = vld [vmem:[#allocation13 + $0x220] sm:$0xff]   ;;  %v7110_v12 = vld [vmem:[#allocation13 + $0x228] sm:$0xff]   ;;  %v7114_v14 = vld [vmem:[#allocation13 + $0x230] sm:$0xff]  }
 0x33f   : > { %v7107_v55 = vld [vmem:[#allocation13 + $0x2a0] sm:$0xff]   ;;  %v7111_v13 = vld [vmem:[#allocation13 + $0x2a8] sm:$0xff]   ;;  %v7115_v15 = vld [vmem:[#allocation13 + $0x2b0] sm:$0xff]  }
 0x340   : > { %v7116_v16 = vld [vmem:[#allocation13 + $0x278] sm:$0xff]   ;;  %v7120_v20 = vld [vmem:[#allocation13 + $0x340] sm:$0xff]   ;;  %v4170_v25 = vld [vmem:[#allocation7 + $0x40] sm:$0xff] }
 0x341   : > { %6577 = vmatpush3.bf16.msra.mxu0 %v7066_v26  ;;  %6599 = vmatpush3.bf16.msra.mxu1 %v7067_v28  ;;  %v7117_v17 = vld [vmem:[#allocation13 + $0x2f8] sm:$0xff]   ;;  %v7121_v26 = vld [vmem:[#allocation13 + $0x3c0] sm:$0xff]   ;;  %v7140_v50 = vld [vmem:[#allocation13 + $0x368] sm:$0xff]  }
 0x342   : > { %6578 = vmatprep.subr.bf16.mxu0 %v7068_v30  ;;  %6600 = vmatprep.subr.bf16.mxu1 %v7069_v31  ;;  %v7118_v60 = vld [vmem:[#allocation13 + $0x238] sm:$0xff]   ;;  %v4172_v28 = vld [vmem:[#allocation7 + $0x50] sm:$0xff]  ;;  %v7142_v24 = vld [vmem:[#allocation13 + $0x328] sm:$0xff]  }
 0x343   : > { %v7119_v18 = vld [vmem:[#allocation13 + $0x2b8] sm:$0xff]   ;;  %v7122_v30 = vld [vmem:[#allocation13 + $0x300] sm:$0xff]  }
 0x344   : > { %v4175_v31 = vld [vmem:[#allocation7 + $0x68] sm:$0xff]  ;;  %v7138_v48 = vld [vmem:[#allocation13 + $0x320] sm:$0xff]  }
 0x345   : > { %6579 = vmatpush3.bf16.msra.mxu0 %v7070_v32  ;;  %6601 = vmatpush3.bf16.msra.mxu1 %v7071_v33  ;;  %v4186_v32 = vpack.c.bf16 %v4170_v25, %v4170_v25  ;;  %v7123_v33 = vld [vmem:[#allocation13 + $0x380] sm:$0xff]  }
 0x346   : > { %6580 = vmatprep.subr.bf16.mxu0 %v7072_v23  ;;  %6602 = vmatprep.subr.bf16.mxu1 %v7073_v34  ;;  %v4177_v23 = vld [vmem:[#allocation7 + $0x78] sm:$0xff]  ;;  %v4188_v34 = vpack.c.bf16 %v4172_v28, %v4172_v28  ;;  %v7139_v49 = vld [vmem:[#allocation13 + $0x3a0] sm:$0xff]  }
 0x349   : > { %6581 = vmatpush3.bf16.msra.mxu0 %v7074_v51  ;;  %6603 = vmatpush3.bf16.msra.mxu1 %v7075_v53  ;;  %v7124_v51 = vld [vmem:[#allocation13 + $0x348] sm:$0xff]   ;;  %v4191_v53 = vpack.c.bf16 %v4175_v31, %v4175_v31 }
 0x34a   : > { %6582 = vmatprep.subr.bf16.mxu0 %v7076_v35  ;;  %6604 = vmatprep.subr.bf16.mxu1 %v7077_v19  ;;  %v7125_v35 = vld [vmem:[#allocation13 + $0x3c8] sm:$0xff]   ;;  %v4193_v19 = vpack.c.bf16 %v4177_v23, %v4177_v23 }
 0x34d   : > { %6583 = vmatpush3.bf16.msra.mxu0 %v7078_v8  ;;  %6605 = vmatpush3.bf16.msra.mxu1 %v7079_v36  ;;  %v7126_v8 = vld [vmem:[#allocation13 + $0x308] sm:$0xff]  }
 0x34e   : > { %6584 = vmatprep.subr.bf16.mxu0 %v7080_v38  ;;  %6606 = vmatprep.subr.bf16.mxu1 %v7081_v54  ;;  %v7127_v36 = vld [vmem:[#allocation13 + $0x388] sm:$0xff]   ;;  %v7128_v38 = vld [vmem:[#allocation13 + $0x350] sm:$0xff]  }
 0x34f   : > { %v7129_v54 = vld [vmem:[#allocation13 + $0x3d0] sm:$0xff]  }
 0x351   : > { %6585 = vmatpush3.bf16.msra.mxu0 %v7082_v39  ;;  %6607 = vmatpush3.bf16.msra.mxu1 %v7083_v21  ;;  %v7130_v39 = vld [vmem:[#allocation13 + $0x310] sm:$0xff]  }
 0x352   : > { %6586 = vmatprep.subr.bf16.mxu0 %v7084_v40  ;;  %6608 = vmatprep.subr.bf16.mxu1 %v7085_v42  ;;  %v7131_v21 = vld [vmem:[#allocation13 + $0x390] sm:$0xff]   ;;  %v7132_v40 = vld [vmem:[#allocation13 + $0x358] sm:$0xff]  }
 0x353   : > { %v7133_v42 = vld [vmem:[#allocation13 + $0x3d8] sm:$0xff]  }
 0x355   : > { %6587 = vmatpush3.bf16.msra.mxu0 %v7086_v44  ;;  %6609 = vmatpush3.bf16.msra.mxu1 %v7087_v45  ;;  %v7134_v44 = vld [vmem:[#allocation13 + $0x318] sm:$0xff]  }
 0x356   : > { %6616 = vmatprep.subr.bf16.mxu0 %v7088_v46  ;;  %6638 = vmatprep.subr.bf16.mxu1 %v7089_v47  ;;  %v7135_v45 = vld [vmem:[#allocation13 + $0x398] sm:$0xff]   ;;  %v7136_v46 = vld [vmem:[#allocation13 + $0x360] sm:$0xff]  }
 0x357   : > { %v7137_v47 = vld [vmem:[#allocation13 + $0x3e0] sm:$0xff]  }
 0x358   : > { %5331 = vmatmul.mubr.bf16.vlgmr.msra.gmra.mrb[84].mxu0 %v4182_v52  ;;  %5371 = vmatmul.mubr.bf16.vlgmr.msra.gmra.mrb[84].mxu1 %v4184_v29  ;;  %v7143_v52 = vld [vmem:[#allocation13 + $0x3a8] sm:$0xff]   ;;  %v7144_v29 = vld [vmem:[#allocation13 + $0x370] sm:$0xff]  }
 0x359   : > { %6617 = vmatpush3.bf16.msra.mxu0 %v7090_v37  ;;  %5410 = vmatprep.mubr.bf16.mxu0 %v4187_v59  ;;  %v7141_v37 = vld [vmem:[#allocation13 + $0x3e8] sm:$0xff]   ;;  %v7146_v59 = vld [vmem:[#allocation13 + $0x330] sm:$0xff]  }
 0x35a   : > { %6639 = vmatpush3.bf16.msra.mxu1 %v7091_v1  ;;  %5450 = vmatprep.mubr.bf16.mxu1 %v4189_v22  ;;  %v7145_v1 = vld [vmem:[#allocation13 + $0x3f0] sm:$0xff]   ;;  %v7149_v22 = vld [vmem:[#allocation13 + $0x3f8] sm:$0xff]  }
 0x35b   : > { %6618 = vmatprep.subr.bf16.mxu0 %v7092_v57  ;;  %6640 = vmatprep.subr.bf16.mxu1 %v7093_v58  ;;  %v7147_v57 = vld [vmem:[#allocation13 + $0x3b0] sm:$0xff]   ;;  %v7148_v58 = vld [vmem:[#allocation13 + $0x378] sm:$0xff]  }
 0x35d   : > { %6619 = vmatpush3.bf16.msra.mxu0 %v7094_v4  ;;  %v7150_v4 = vld [vmem:[#allocation13 + $0x338] sm:$0xff]  }
 0x35e   : > { %6641 = vmatpush3.bf16.msra.mxu1 %v7095_v62  ;;  %6620 = vmatprep.subr.bf16.mxu0 %v7096_v63  ;;  %v7151_v62 = vld [vmem:[#allocation13 + $0x3b8] sm:$0xff]   ;;  %v4174_v63 = vld [vmem:[#allocation7 + $0x60] sm:$0xff] }
 0x35f   : > { %6642 = vmatprep.subr.bf16.mxu1 %v7097_v0  ;;  %v4176_v0 = vld [vmem:[#allocation7 + $0x70] sm:$0xff] }
 0x361   : > { %6621 = vmatpush3.bf16.msra.mxu0 %v7098_v2  ;;  %v4190_v2 = vpack.c.bf16 %v4174_v63, %v4174_v63 }
 0x362   : > { %6643 = vmatpush3.bf16.msra.mxu1 %v7099_v61  ;;  %6622 = vmatprep.subr.bf16.mxu0 %v7100_v3  ;;  %v4192_v61 = vpack.c.bf16 %v4176_v0, %v4176_v0 }
 0x363   : > { %6644 = vmatprep.subr.bf16.mxu1 %v7101_v5 }
 0x365   : > { %6623 = vmatpush3.bf16.msra.mxu0 %v7102_v41 }
 0x366   : > { %6645 = vmatpush3.bf16.msra.mxu1 %v7103_v6  ;;  %6624 = vmatprep.subr.bf16.mxu0 %v7104_v7 }
 0x367   : > { %6646 = vmatprep.subr.bf16.mxu1 %v7105_v43 }
 0x369   : > { %6625 = vmatpush3.bf16.msra.mxu0 %v7106_v9 }
 0x36a   : > { %6647 = vmatpush3.bf16.msra.mxu1 %v7107_v55  ;;  %6626 = vmatprep.subr.bf16.mxu0 %v7108_v10 }
 0x36b   : > { %6648 = vmatprep.subr.bf16.mxu1 %v7109_v11 }
 0x36d   : > { %6627 = vmatpush3.bf16.msra.mxu0 %v7110_v12 }
 0x36e   : > { %6649 = vmatpush3.bf16.msra.mxu1 %v7111_v13  ;;  %6628 = vmatprep.subr.bf16.mxu0 %v7112_v27 }
 0x36f   : > { %6650 = vmatprep.subr.bf16.mxu1 %v7113_v56 }
 0x371   : > { %6629 = vmatpush3.bf16.msra.mxu0 %v7114_v14 }
 0x372   : > { %6651 = vmatpush3.bf16.msra.mxu1 %v7115_v15  ;;  %6630 = vmatprep.subr.bf16.mxu0 %v7116_v16 }
 0x373   : > { %6652 = vmatprep.subr.bf16.mxu1 %v7117_v17 }
 0x375   : > { %6631 = vmatpush3.bf16.msra.mxu0 %v7118_v60 }
 0x376   : > { %6653 = vmatpush3.bf16.msra.mxu1 %v7119_v18  ;;  %6660 = vmatprep.subr.bf16.mxu0 %v7120_v20 }
 0x377   : > { %6682 = vmatprep.subr.bf16.mxu1 %v7121_v26 }
 0x378   : > { %5411 = vmatmul.mubr.bf16.vlgmr.msra.gmra.mrb[88].mxu0 %v4186_v32 }
 0x379   : > { %5451 = vmatmul.mubr.bf16.vlgmr.msra.gmra.mrb[88].mxu1 %v4188_v34  ;;  %6661 = vmatpush3.bf16.msra.mxu0 %v7122_v30 }
 0x37a   : > { %5490 = vmatprep.mubr.bf16.mxu0 %v4191_v53  ;;  %6683 = vmatpush3.bf16.msra.mxu1 %v7123_v33 }
 0x37b   : > { %5530 = vmatprep.mubr.bf16.mxu1 %v4193_v19  ;;  %6662 = vmatprep.subr.bf16.mxu0 %v7124_v51 }
 0x37c   : > { %6684 = vmatprep.subr.bf16.mxu1 %v7125_v35 }
 0x37d   : > { %6663 = vmatpush3.bf16.msra.mxu0 %v7126_v8 }
 0x37e   : > { %6685 = vmatpush3.bf16.msra.mxu1 %v7127_v36  ;;  %6664 = vmatprep.subr.bf16.mxu0 %v7128_v38 }
 0x37f   : > { %6686 = vmatprep.subr.bf16.mxu1 %v7129_v54 }
 0x381   : > { %6665 = vmatpush3.bf16.msra.mxu0 %v7130_v39 }
 0x382   : > { %6687 = vmatpush3.bf16.msra.mxu1 %v7131_v21  ;;  %6666 = vmatprep.subr.bf16.mxu0 %v7132_v40 }
 0x383   : > { %6688 = vmatprep.subr.bf16.mxu1 %v7133_v42 }
 0x385   : > { %6667 = vmatpush3.bf16.msra.mxu0 %v7134_v44 }
 0x386   : > { %6689 = vmatpush3.bf16.msra.mxu1 %v7135_v45  ;;  %6668 = vmatprep.subr.bf16.mxu0 %v7136_v46 }
 0x387   : > { %6690 = vmatprep.subr.bf16.mxu1 %v7137_v47 }
 0x389   : > { %6669 = vmatpush3.bf16.msra.mxu0 %v7138_v48 }
 0x38a   : > { %6691 = vmatpush3.bf16.msra.mxu1 %v7139_v49  ;;  %6670 = vmatprep.subr.bf16.mxu0 %v7140_v50 }
 0x38b   : > { %6692 = vmatprep.subr.bf16.mxu1 %v7141_v37 }
 0x38d   : > { %6671 = vmatpush3.bf16.msra.mxu0 %v7142_v24 }
 0x38e   : > { %6693 = vmatpush3.bf16.msra.mxu1 %v7143_v52  ;;  %6672 = vmatprep.subr.bf16.mxu0 %v7144_v29 }
 0x38f   : > { %6694 = vmatprep.subr.bf16.mxu1 %v7145_v1 }
 0x391   : > { %6673 = vmatpush3.bf16.msra.mxu0 %v7146_v59 }
 0x392   : > { %6695 = vmatpush3.bf16.msra.mxu1 %v7147_v57  ;;  %6674 = vmatprep.subr.bf16.mxu0 %v7148_v58 }
 0x393   : > { %6696 = vmatprep.subr.bf16.mxu1 %v7149_v22 }
 0x395   : > { %6675 = vmatpush3.bf16.msra.mxu0 %v7150_v4 }
 0x396   : > { %6697 = vmatpush3.bf16.msra.mxu1 %v7151_v62 }
 0x398   : > { %5491 = vmatmul.mubr.bf16.vlgmr.msra.gmra.mrb[92].mxu0 %v4190_v2 }
 0x399   : > { %5531 = vmatmul.mubr.bf16.vlgmr.msra.gmra.mrb[92].mxu1 %v4192_v61 }
 0x40b   : > { %v6544_v3 = vpop.f32.mrb[80].mxu0  ;;  %v6566_v5 = vpop.f32.mrb[80].mxu1 }
 0x40c   : > { %v6545_v41 = vpop.f32.mrb[81].mxu0  ;;  %v6567_v6 = vpop.f32.mrb[81].mxu1 }
 0x40d   : > { %v6546_v7 = vadd.f32 %v6545_v41, %v6544_v3  ;;  %v6568_v43 = vadd.f32 %v6567_v6, %v6566_v5  ;;  %v6547_v9 = vpop.f32.mrb[82].mxu0  ;;  %v6569_v55 = vpop.f32.mrb[82].mxu1 }
 0x40e   : > { %v6548_v10 = vpop.f32.mrb[83].mxu0  ;;  %v6570_v11 = vpop.f32.mrb[83].mxu1 }
 0x40f   : > { %v5293_v12 = vadd.f32 %v6568_v43, %v6546_v7 }
 0x42b   : > { %v6588_v13 = vpop.f32.mrb[84].mxu0  ;;  %v6610_v27 = vpop.f32.mrb[84].mxu1 }
 0x42c   : > { %v6589_v56 = vpop.f32.mrb[85].mxu0  ;;  %v6611_v14 = vpop.f32.mrb[85].mxu1 }
 0x42d   : > { %v6590_v15 = vadd.f32 %v6589_v56, %v6588_v13  ;;  %v6612_v16 = vadd.f32 %v6611_v14, %v6610_v27  ;;  %v6591_v17 = vpop.f32.mrb[86].mxu0  ;;  %v6613_v60 = vpop.f32.mrb[86].mxu1 }
 0x42e   : > { %v6592_v18 = vpop.f32.mrb[87].mxu0  ;;  %v6614_v20 = vpop.f32.mrb[87].mxu1 }
 0x42f   : > { %v5333_v25 = vadd.f32 %v6590_v15, %v5293_v12 }
 0x431   : > { %v5373_v26 = vadd.f32 %v6612_v16, %v5333_v25 }
 0x44b   : > { %v6632_v28 = vpop.f32.mrb[88].mxu0 }
 0x44c   : > { %v6654_v30 = vpop.f32.mrb[88].mxu1  ;;  %v6633_v31 = vpop.f32.mrb[89].mxu0 }
 0x44d   : > { %v6634_v32 = vadd.f32 %v6633_v31, %v6632_v28  ;;  %v6655_v33 = vpop.f32.mrb[89].mxu1  ;;  %v6635_v23 = vpop.f32.mrb[90].mxu0 }
 0x44e   : > { %v6656_v34 = vadd.f32 %v6655_v33, %v6654_v30  ;;  %v6657_v51 = vpop.f32.mrb[90].mxu1  ;;  %v6636_v53 = vpop.f32.mrb[91].mxu0 }
 0x44f   : > { %v5413_v35 = vadd.f32 %v6634_v32, %v5373_v26  ;;  %v6658_v19 = vpop.f32.mrb[91].mxu1 }
 0x451   : > { %v5453_v8 = vadd.f32 %v6656_v34, %v5413_v35 }
 0x46b   : > { %v6676_v36 = vpop.f32.mrb[92].mxu0 }
 0x46c   : > { %v6698_v38 = vpop.f32.mrb[92].mxu1  ;;  %v6677_v54 = vpop.f32.mrb[93].mxu0 }
 0x46d   : > { %v6678_v39 = vadd.f32 %v6677_v54, %v6676_v36  ;;  %v6699_v21 = vpop.f32.mrb[93].mxu1  ;;  %v6679_v40 = vpop.f32.mrb[94].mxu0 }
 0x46e   : > { %v6700_v42 = vadd.f32 %v6699_v21, %v6698_v38  ;;  %v6701_v44 = vpop.f32.mrb[94].mxu1  ;;  %v6680_v45 = vpop.f32.mrb[95].mxu0 }
 0x46f   : > { %v5493_v46 = vadd.f32 %v6678_v39, %v5453_v8  ;;  %v6702_v47 = vpop.f32.mrb[95].mxu1 }
 0x471   : > { %v5533_v48 = vadd.f32 %v6700_v42, %v5493_v46 }
 0x473   : > { %5538 = vst [vmem:[%s220_s20] sm:$0xff] %v5533_v48 }
 0x474   : > { %7221 = shalt.err (!%p7218_p11)
}
 0x475   : > { %s7222_s11 = scalar_lea.hbm %s7934_s5, 128  ;;  %s7226_s14 = scalar_lea.hbm %s7980_s4, 256 }
 0x476   : > { %p7223_p13 = scmp.ne.s32.totalorder %s7934_s5, %s7222_s11  ;;  %p7227_p6 = scmp.lt.u32.totalorder %s7934_s5, %s7980_s4 }
 0x477   : > { %p7228_p9 = scmp.lt.u32.totalorder %s7226_s14, %s7222_s11  ;;  %p7230_p10 = scmp.lt.u32.totalorder %s7222_s11, %s7934_s5 }
 0x478   : > { %p7224_p5 = pnand %p7223_p13, %p7993_p1 }
 0x479   : > { %p7229_p12 = por %p7228_p9, %p7227_p6 }
 0x47a   : > { %p7225_p0 = pneg %p7224_p5 }
 0x47b   : > { %p7231_p2 = por %p7230_p10, %p7229_p12 }
 0x47d   : > { %p7232_p3 = pnand %p7231_p2, %p7225_p0 }
 0x47f   : > { %7235 = shalt.err (!%p7232_p3)
}
 0x480   : > { %6713 = dma.vmem_to_hbm [thread:$0]  (%p7993_p1), %s7936_s27, 128, %s7934_s5, %s5540_s7  }
 0x481 PF: > { %p6730_p4 = scmp.ge.s32.totalorder %s7278_s18, 2  ;;  %s5565_s23 = sand.u32 1, %s7266_s15  }
 0x482   : > { %p7994_p7 = scmp.ne.s32.totalorder %s7985_s26, 0  ;;  %s5566_s6 = scalar_lea.sflag [#allocation12], %s5565_s23 }
 0x484   : > { %p6723_p8 = pnand %p6730_p4, %p7994_p7 }
 0x486   : > { %7261 = dma.done.wait (!%p6723_p8), %s5566_s6, 128  }
 0x487   : > { %7263 = vsyncadd (!%p6723_p8), %s5566_s6, 4294967168  ;;  %p16_p11 = scmp.ge.s32.totalorder %s7336_s21, 4   ;;  %s7995_s15 = smov %s7270_s16 }
 0x488   : > { %s7996_s16 = smov %s7274_s17  ;;  %s7997_s17 = smov %s7347_s24 }
 0x489   : > { %s7998_s18 = smov %s7336_s21  ;;  %18 = sbr.rel (!%p16_p11) target bundleno = 5 (0x5), region = 190 }
 0x490   :  { %5571 = vsyncpa [#allocation11], 1 }
 0x491   :  { %5573 = vsyncpa [#allocation11 + $0x1], 1 }
 0x492   :  { %5574 = vsyncpa [#allocation14], 1 }
 0x493   :  { %5575 = vsyncpa [#allocation12], 1 }
 0x494   :  { %5577 = vsyncpa [#allocation12 + $0x1], 1 }

</bundles_post_ra>
